<compile_context>
chip_gen: v6e
topology: v6e:2x2x1
jax: 0.10.0
libtpu: 0.0.40
codegen_flags: <defaults>
</compile_context>

<pallas_src>
import functools

import jax
import jax.numpy as jnp
from jax.experimental import pallas as pl
from jax.experimental.pallas import tpu as pltpu


# ---------------------------------------------------------------------------
# Constants / small helpers
# ---------------------------------------------------------------------------

K_FLAT = 64 * 7 * 7                         # 3136, FC1 contraction dim
TILE_K = 640                                # K tile for the head (multiple of 128)
K_PAD = -(-K_FLAT // TILE_K) * TILE_K       # 3200, zero-padded contraction dim

CONV_CFG = ((8, 4), (4, 2), (3, 1))         # (kernel, stride) for conv1..conv3


def _cdiv(a, b):
    return -(-a // b)


def _round_up(a, b):
    return _cdiv(a, b) * b


# ---------------------------------------------------------------------------
# Conv-as-matmul Pallas kernel (channel-major, lane-dense outputs)
# ---------------------------------------------------------------------------

def _conv_matmul_kernel(w_ref, p_ref, o_ref):
    """o = relu(w @ p).  w: (O, K) bf16, p: (K, tm) bf16, o: (O, tm) bf16.
    Lane dim of the output is batch*spatial -> lane-dense stores; f32 MXU
    accumulation, ReLU on the VPU in f32."""
    acc = jnp.dot(w_ref[...], p_ref[...], preferred_element_type=jnp.float32)
    o_ref[...] = jnp.maximum(acc, 0.0).astype(o_ref.dtype)


def _choose_conv_tile_m(M, tile_m):
    """Lane tile: big (amortize per-step overhead) but always >= 2 blocks when
    M >= 256 so v7x's two TensorCores both get work via the 'parallel' axis."""
    if M < 256:
        return M                                  # single full-extent block
    n_blocks = max(2, _cdiv(M, tile_m))
    return min(tile_m, _round_up(_cdiv(M, n_blocks), 128))


def pallas_conv_matmul(w, p, *, tile_m=2048):
    """w: (O, K) bf16, p: (K, M) bf16 -> (O, M) bf16, relu'd.  Grid tiles M
    (the lane dim); the last block may be partial (masked stores)."""
    O, K = w.shape
    _, M = p.shape
    tm = _choose_conv_tile_m(M, tile_m)
    grid_m = _cdiv(M, tm)
    return pl.pallas_call(
        _conv_matmul_kernel,
        out_shape=jax.ShapeDtypeStruct((O, M), jnp.bfloat16),
        grid=(grid_m,),
        in_specs=[
            pl.BlockSpec((O, K), lambda m: (0, 0)),     # weight stays resident
            pl.BlockSpec((K, tm), lambda m: (0, m)),    # patch columns, tiled
        ],
        out_specs=pl.BlockSpec((O, tm), lambda m: (0, m)),
        compiler_params=pltpu.CompilerParams(
            dimension_semantics=("parallel",)),
    )(w, p)


# ---------------------------------------------------------------------------
# Fused FC1 + dueling head (K-tiled accumulating matmul + epilogue)
# ---------------------------------------------------------------------------

def _fc_dueling_kernel(flat_ref, w1_ref, b1_ref, ws2_ref, bs2_ref,
                       wa2_ref, ba2_ref, o_ref, acc_ref, *, hidden, n_actions):
    k = pl.program_id(0)

    @pl.when(k == 0)
    def _():
        acc_ref[...] = jnp.zeros_like(acc_ref)

    # Partial FC1 product for this K tile (bf16 MXU, f32 VMEM accumulator).
    acc_ref[...] += jnp.dot(flat_ref[...], w1_ref[...],
                            preferred_element_type=jnp.float32)

    @pl.when(k == pl.num_programs(0) - 1)
    def _():
        h = jnp.maximum(acc_ref[...] + b1_ref[...], 0.0)          # (B, 1024) f32
        hs = h[:, :hidden]                                        # (B, 512)
        ha = h[:, hidden:]                                        # (B, 512)
        # State value: VPU multiply + row reduction (no N=1 MXU pass, no
        # lane-width-1 store).
        s = jnp.sum(hs * ws2_ref[...], axis=-1, keepdims=True) + bs2_ref[...]
        # Advantage: (B, 512) @ (512, A_pad); A padded to 128 -> lane-dense.
        a = jnp.dot(ha.astype(jnp.bfloat16), wa2_ref[...],
                    preferred_element_type=jnp.float32) + ba2_ref[...]
        # Reference does `action_value.mean()` => GLOBAL mean over batch AND
        # actions.  Padded action columns are exactly zero, so the full sum
        # divided by B * true_A reproduces it.
        mean_a = jnp.sum(a) / (a.shape[0] * n_actions)
        o_ref[...] = s + a - mean_a


def pallas_fc_dueling_head(flat_pad, w1, b1, ws2_row, bs2, wa2, ba2, *,
                           n_actions, tile_k=TILE_K):
    """flat_pad: (B, 3200) bf16 (zero-padded); w1: (3200, 1024) bf16 ([ws1|wa1],
    zero-padded rows); b1: (1, 1024) f32; ws2_row: (1, 512) f32; bs2: (1, 1) f32;
    wa2: (512, A_pad) bf16 (zero-padded cols); ba2: (1, A_pad) f32.
    Returns (B, n_actions) f32.  Single launch; K grid overlaps w1 DMA with MXU."""
    B, Kp = flat_pad.shape
    H2 = w1.shape[1]
    Hh = H2 // 2
    Ap = wa2.shape[1]
    assert Kp % tile_k == 0 and w1.shape[0] == Kp
    nk = Kp // tile_k
    out = pl.pallas_call(
        functools.partial(_fc_dueling_kernel, hidden=Hh, n_actions=n_actions),
        out_shape=jax.ShapeDtypeStruct((B, Ap), jnp.float32),
        grid=(nk,),
        in_specs=[
            pl.BlockSpec((B, tile_k), lambda k: (0, k)),     # flat, K-tiled
            pl.BlockSpec((tile_k, H2), lambda k: (k, 0)),    # w1, K-tiled
            pl.BlockSpec((1, H2), lambda k: (0, 0)),         # b1      (resident)
            pl.BlockSpec((1, Hh), lambda k: (0, 0)),         # ws2 row (resident)
            pl.BlockSpec((1, 1), lambda k: (0, 0)),          # bs2     (resident)
            pl.BlockSpec((Hh, Ap), lambda k: (0, 0)),        # wa2     (resident)
            pl.BlockSpec((1, Ap), lambda k: (0, 0)),         # ba2     (resident)
        ],
        out_specs=pl.BlockSpec((B, Ap), lambda k: (0, 0)),
        scratch_shapes=[pltpu.VMEM((B, H2), jnp.float32)],   # FC1 accumulator
        compiler_params=pltpu.CompilerParams(
            dimension_semantics=("arbitrary",)),
    )(flat_pad, w1, b1, ws2_row, bs2, wa2, ba2)
    return out[:, :n_actions]


# ---------------------------------------------------------------------------
# JAX glue: channel-major im2col (pure layout work, no FLOPs)
# ---------------------------------------------------------------------------

def conv_relu_cm(x, w_flat, kh, kw, stride):
    """Channel-major strided valid conv (no bias) + ReLU.
    x: (C, B, H, W) bf16, w_flat: (O, C*kh*kw) bf16 -> (O, B, Ho, Wo) bf16."""
    C, B, H, W = x.shape
    O = w_flat.shape[0]
    Ho = (H - kh) // stride + 1
    Wo = (W - kw) // stride + 1
    cols = []
    for i in range(kh):
        for j in range(kw):
            cols.append(x[:, :, i:i + stride * Ho:stride, j:j + stride * Wo:stride])
    # (C, kh*kw, B, Ho, Wo) -> (C*kh*kw, B*Ho*Wo): contiguous merges only.
    patches = jnp.stack(cols, axis=1).reshape(C * kh * kw, B * Ho * Wo)
    out = pallas_conv_matmul(w_flat, patches)            # (O, B*Ho*Wo)
    return out.reshape(O, B, Ho, Wo)


# ---------------------------------------------------------------------------
# DuelingDQN forward
# ---------------------------------------------------------------------------

def dueling_dqn_forward(prep, x, *, action_dim):
    """x: (B, 4, 84, 84) float32 in [0, 255] (NCHW, same as PyTorch)."""
    B = x.shape[0]
    # Channel-major (C, B, H, W): conv matmul outputs are (O, B*Ho*Wo) so the
    # lane dim is batch*spatial and no transposes are needed between layers.
    # The 1/255 scale is already folded into the conv1 weights.
    h = x.astype(jnp.bfloat16).transpose(1, 0, 2, 3)                  # (4, B, 84, 84)
    for w, (k, s) in zip((prep["c1"], prep["c2"], prep["c3"]), CONV_CFG):
        h = conv_relu_cm(h, w, k, k, s)                               # -> (64, B, 7, 7)
    # Torch x.view(B,-1) flatten order (C,H,W): tiny (64,B,49) permute, then
    # zero-pad K 3136 -> 3200 so the head's accumulating K grid never sees OOB data.
    # TODO(synk): fuse conv2+conv3+this flatten into one pallas_call with
    # VMEM-resident activations and fold the permute into w1's row order.
    flat = h.transpose(1, 0, 2, 3).reshape(B, -1)                     # (B, 3136) bf16
    flat = jnp.pad(flat, ((0, 0), (0, K_PAD - flat.shape[1])))        # (B, 3200)
    return pallas_fc_dueling_head(flat, prep["w1"], prep["b1"],
                                  prep["ws2"], prep["bs2"],
                                  prep["wa2"], prep["ba2"],
                                  n_actions=action_dim)               # (B, action_dim)


def init_params(key, action_dim):
    """PyTorch-convention params (conv (O,C,kh,kw), linear stored as (in,out)),
    kaiming-normal-style init, zero biases, conv bias=False."""
    ks = jax.random.split(key, 7)

    def kaiming(k, shape, fan_in):
        return jax.random.normal(k, shape, jnp.float32) * jnp.sqrt(2.0 / fan_in)

    return {
        "conv1": kaiming(ks[0], (32, 4, 8, 8), 4 * 8 * 8),
        "conv2": kaiming(ks[1], (64, 32, 4, 4), 32 * 4 * 4),
        "conv3": kaiming(ks[2], (64, 64, 3, 3), 64 * 3 * 3),
        "ws1": kaiming(ks[3], (K_FLAT, 512), K_FLAT),
        "bs1": jnp.zeros((1, 512), jnp.float32),
        "ws2": kaiming(ks[4], (512, 1), 512),
        "bs2": jnp.zeros((1, 1), jnp.float32),
        "wa1": kaiming(ks[5], (K_FLAT, 512), K_FLAT),
        "ba1": jnp.zeros((1, 512), jnp.float32),
        "wa2": kaiming(ks[6], (512, action_dim), 512),
        "ba2": jnp.zeros((1, action_dim), jnp.float32),
    }


def prepare_params(p):
    """One-time conversion to kernel layout:
    - conv weights flattened to (O, C*kh*kw), 1/255 folded into conv1, cast bf16
    - FC1 state/advantage weights concatenated to (3136, 1024), ZERO-PADDED on K
      to (3200, 1024), cast bf16 (+ concatenated f32 biases)
    - state-value second layer stored as a (1, 512) f32 row (VPU reduction)
    - advantage second layer zero-padded on the action dim to 128 lanes
    """
    def conv_flat(w, scale=1.0):
        O = w.shape[0]
        return (w.reshape(O, -1) * scale).astype(jnp.bfloat16)

    w1 = jnp.concatenate([p["ws1"], p["wa1"]], axis=1)                # (3136, 1024)
    w1 = jnp.pad(w1, ((0, K_PAD - w1.shape[0]), (0, 0))).astype(jnp.bfloat16)

    A = p["wa2"].shape[1]
    a_pad = _round_up(max(A, 128), 128)
    wa2 = jnp.pad(p["wa2"], ((0, 0), (0, a_pad - A))).astype(jnp.bfloat16)
    ba2 = jnp.pad(p["ba2"], ((0, 0), (0, a_pad - A)))                 # f32

    return {
        "c1": conv_flat(p["conv1"], 1.0 / 255.0),
        "c2": conv_flat(p["conv2"]),
        "c3": conv_flat(p["conv3"]),
        "w1": w1,                                                     # (3200, 1024) bf16
        "b1": jnp.concatenate([p["bs1"], p["ba1"]], axis=1),          # (1, 1024) f32
        "ws2": p["ws2"].T,                                            # (1, 512) f32
        "bs2": p["bs2"],                                              # (1, 1) f32
        "wa2": wa2,                                                   # (512, 128) bf16
        "ba2": ba2,                                                   # (1, 128) f32
    }


if __name__ == "__main__":
    ACTION_DIM = 6
    key = jax.random.PRNGKey(0)
    k_params, k_x = jax.random.split(key)

    params = init_params(k_params, ACTION_DIM)
    prep = prepare_params(params)

    # 84x84 input is required by the 64*7*7 flatten in the module; batch=2.
    x = jax.random.uniform(k_x, (2, 4, 84, 84), jnp.float32, minval=0.0, maxval=255.0)

    fwd = jax.jit(functools.partial(dueling_dqn_forward, action_dim=ACTION_DIM))
    out = fwd(prep, x)
    jax.block_until_ready(out)
    assert out.shape == (2, ACTION_DIM) and out.dtype == jnp.float32
    print("KERNEL_OK")
</pallas_src>

<mosaic_0001>
module attributes {stable_mosaic.version = 11 : i64} {
  func.func @_conv_matmul_kernel(%arg0: i32, %arg1: memref<32x256xbf16, #tpu.memory_space<vmem>>, %arg2: memref<256x512xbf16, #tpu.memory_space<vmem>>, %arg3: memref<32x512xbf16, #tpu.memory_space<vmem>>) attributes {dimension_semantics = [#tpu.dimension_semantics<parallel>], iteration_bounds = array<i64: 2>, scalar_prefetch = 0 : i64, scratch_operands = 0 : i64, tpu.core_type = #tpu.core_type<tc>, window_params = [{pipeline_mode = #tpu.pipeline_mode<synchronous>, transform_indices = @transform_0, window_bounds = array<i64: 32, 256>}, {transform_indices = @transform_1, window_bounds = array<i64: 256, 512>}, {transform_indices = @transform_2, window_bounds = array<i64: 32, 512>}]} {
    %c0 = arith.constant 0 : index
    %c0_0 = arith.constant 0 : index
    %0 = vector.load %arg1[%c0, %c0_0] : memref<32x256xbf16, #tpu.memory_space<vmem>>, vector<32x256xbf16>
    %c0_1 = arith.constant 0 : index
    %c0_2 = arith.constant 0 : index
    %1 = vector.load %arg2[%c0_1, %c0_2] : memref<256x512xbf16, #tpu.memory_space<vmem>>, vector<256x512xbf16>
    %cst = arith.constant dense<0.000000e+00> : vector<32x512xf32>
    %2 = tpu.matmul %0, %1, %cst {dimension_numbers = #tpu.dot_dimension_numbers<[1], [0], [0], [1], [0, 0, 1, 1], [], []>} : vector<32x256xbf16>, vector<256x512xbf16>, vector<32x512xf32> -> vector<32x512xf32>
    %cst_3 = arith.constant 0.000000e+00 : f32
    %3 = vector.broadcast %cst_3 : f32 to vector<32x512xf32>
    %4 = arith.maximumf %2, %3 : vector<32x512xf32>
    %5 = arith.truncf %4 : vector<32x512xf32> to vector<32x512xbf16>
    %c0_4 = arith.constant 0 : index
    %c0_5 = arith.constant 0 : index
    %6 = vector.load %arg3[%c0_4, %c0_5] : memref<32x512xbf16, #tpu.memory_space<vmem>>, vector<32x512xbf16>
    tpu.vector_store %arg3[%c0_4, %c0_5], %5 {strides = array<i32>} : memref<32x512xbf16, #tpu.memory_space<vmem>>, vector<32x512xbf16>,
    return
  }
  func.func @transform_0(%arg0: i32) -> (i32, i32) {
    %c0_i32 = arith.constant 0 : i32
    %c0_i32_0 = arith.constant 0 : i32
    %c0_i32_1 = arith.constant 0 : i32
    return %c0_i32, %c0_i32_0 : i32, i32
  }
  func.func @transform_1(%arg0: i32) -> (i32, i32) {
    %c0_i32 = arith.constant 0 : i32
    %c0_i32_0 = arith.constant 0 : i32
    return %c0_i32, %arg0 : i32, i32
  }
  func.func @transform_2(%arg0: i32) -> (i32, i32) {
    %c0_i32 = arith.constant 0 : i32
    %c0_i32_0 = arith.constant 0 : i32
    return %c0_i32, %arg0 : i32, i32
  }
}

module attributes {stable_mosaic.version = 11 : i64} {
  func.func @_conv_matmul_kernel(%arg0: i32, %arg1: memref<64x512xbf16, #tpu.memory_space<vmem>>, %arg2: memref<512x162xbf16, #tpu.memory_space<vmem>>, %arg3: memref<64x162xbf16, #tpu.memory_space<vmem>>) attributes {dimension_semantics = [#tpu.dimension_semantics<parallel>], iteration_bounds = array<i64: 1>, scalar_prefetch = 0 : i64, scratch_operands = 0 : i64, tpu.core_type = #tpu.core_type<tc>, window_params = [{pipeline_mode = #tpu.pipeline_mode<synchronous>, transform_indices = @transform_0, window_bounds = array<i64: 64, 512>}, {transform_indices = @transform_1, window_bounds = array<i64: 512, 162>}, {transform_indices = @transform_2, window_bounds = array<i64: 64, 162>}]} {
    %c0 = arith.constant 0 : index
    %c0_0 = arith.constant 0 : index
    %0 = vector.load %arg1[%c0, %c0_0] : memref<64x512xbf16, #tpu.memory_space<vmem>>, vector<64x512xbf16>
    %c0_1 = arith.constant 0 : index
    %c0_2 = arith.constant 0 : index
    %1 = vector.load %arg2[%c0_1, %c0_2] : memref<512x162xbf16, #tpu.memory_space<vmem>>, vector<512x162xbf16>
    %cst = arith.constant dense<0.000000e+00> : vector<64x162xf32>
    %2 = tpu.matmul %0, %1, %cst {dimension_numbers = #tpu.dot_dimension_numbers<[1], [0], [0], [1], [0, 0, 1, 1], [], []>} : vector<64x512xbf16>, vector<512x162xbf16>, vector<64x162xf32> -> vector<64x162xf32>
    %cst_3 = arith.constant 0.000000e+00 : f32
    %3 = vector.broadcast %cst_3 : f32 to vector<64x162xf32>
    %4 = arith.maximumf %2, %3 : vector<64x162xf32>
    %5 = arith.truncf %4 : vector<64x162xf32> to vector<64x162xbf16>
    %c0_4 = arith.constant 0 : index
    %c0_5 = arith.constant 0 : index
    %6 = vector.load %arg3[%c0_4, %c0_5] : memref<64x162xbf16, #tpu.memory_space<vmem>>, vector<64x162xbf16>
    tpu.vector_store %arg3[%c0_4, %c0_5], %5 {strides = array<i32>} : memref<64x162xbf16, #tpu.memory_space<vmem>>, vector<64x162xbf16>,
    return
  }
  func.func @transform_0(%arg0: i32) -> (i32, i32) {
    %c0_i32 = arith.constant 0 : i32
    %c0_i32_0 = arith.constant 0 : i32
    %c0_i32_1 = arith.constant 0 : i32
    return %c0_i32, %c0_i32_0 : i32, i32
  }
  func.func @transform_1(%arg0: i32) -> (i32, i32) {
    %c0_i32 = arith.constant 0 : i32
    %c0_i32_0 = arith.constant 0 : i32
    return %c0_i32, %arg0 : i32, i32
  }
  func.func @transform_2(%arg0: i32) -> (i32, i32) {
    %c0_i32 = arith.constant 0 : i32
    %c0_i32_0 = arith.constant 0 : i32
    return %c0_i32, %arg0 : i32, i32
  }
}

module attributes {stable_mosaic.version = 11 : i64} {
  func.func @_conv_matmul_kernel(%arg0: i32, %arg1: memref<64x576xbf16, #tpu.memory_space<vmem>>, %arg2: memref<576x98xbf16, #tpu.memory_space<vmem>>, %arg3: memref<64x98xbf16, #tpu.memory_space<vmem>>) attributes {dimension_semantics = [#tpu.dimension_semantics<parallel>], iteration_bounds = array<i64: 1>, scalar_prefetch = 0 : i64, scratch_operands = 0 : i64, tpu.core_type = #tpu.core_type<tc>, window_params = [{pipeline_mode = #tpu.pipeline_mode<synchronous>, transform_indices = @transform_0, window_bounds = array<i64: 64, 576>}, {transform_indices = @transform_1, window_bounds = array<i64: 576, 98>}, {transform_indices = @transform_2, window_bounds = array<i64: 64, 98>}]} {
    %c0 = arith.constant 0 : index
    %c0_0 = arith.constant 0 : index
    %0 = vector.load %arg1[%c0, %c0_0] : memref<64x576xbf16, #tpu.memory_space<vmem>>, vector<64x576xbf16>
    %c0_1 = arith.constant 0 : index
    %c0_2 = arith.constant 0 : index
    %1 = vector.load %arg2[%c0_1, %c0_2] : memref<576x98xbf16, #tpu.memory_space<vmem>>, vector<576x98xbf16>
    %cst = arith.constant dense<0.000000e+00> : vector<64x98xf32>
    %2 = tpu.matmul %0, %1, %cst {dimension_numbers = #tpu.dot_dimension_numbers<[1], [0], [0], [1], [0, 0, 1, 1], [], []>} : vector<64x576xbf16>, vector<576x98xbf16>, vector<64x98xf32> -> vector<64x98xf32>
    %cst_3 = arith.constant 0.000000e+00 : f32
    %3 = vector.broadcast %cst_3 : f32 to vector<64x98xf32>
    %4 = arith.maximumf %2, %3 : vector<64x98xf32>
    %5 = arith.truncf %4 : vector<64x98xf32> to vector<64x98xbf16>
    %c0_4 = arith.constant 0 : index
    %c0_5 = arith.constant 0 : index
    %6 = vector.load %arg3[%c0_4, %c0_5] : memref<64x98xbf16, #tpu.memory_space<vmem>>, vector<64x98xbf16>
    tpu.vector_store %arg3[%c0_4, %c0_5], %5 {strides = array<i32>} : memref<64x98xbf16, #tpu.memory_space<vmem>>, vector<64x98xbf16>,
    return
  }
  func.func @transform_0(%arg0: i32) -> (i32, i32) {
    %c0_i32 = arith.constant 0 : i32
    %c0_i32_0 = arith.constant 0 : i32
    %c0_i32_1 = arith.constant 0 : i32
    return %c0_i32, %c0_i32_0 : i32, i32
  }
  func.func @transform_1(%arg0: i32) -> (i32, i32) {
    %c0_i32 = arith.constant 0 : i32
    %c0_i32_0 = arith.constant 0 : i32
    return %c0_i32, %arg0 : i32, i32
  }
  func.func @transform_2(%arg0: i32) -> (i32, i32) {
    %c0_i32 = arith.constant 0 : i32
    %c0_i32_0 = arith.constant 0 : i32
    return %c0_i32, %arg0 : i32, i32
  }
}

module attributes {stable_mosaic.version = 11 : i64} {
  func.func @_fc_dueling_kernel(%arg0: i32, %arg1: memref<2x640xbf16, #tpu.memory_space<vmem>>, %arg2: memref<640x1024xbf16, #tpu.memory_space<vmem>>, %arg3: memref<1x1024xf32, #tpu.memory_space<vmem>>, %arg4: memref<1x512xf32, #tpu.memory_space<vmem>>, %arg5: memref<1x1xf32, #tpu.memory_space<vmem>>, %arg6: memref<512x128xbf16, #tpu.memory_space<vmem>>, %arg7: memref<1x128xf32, #tpu.memory_space<vmem>>, %arg8: memref<2x128xf32, #tpu.memory_space<vmem>>, %arg9: memref<2x1024xf32, #tpu.memory_space<vmem>>) attributes {dimension_semantics = [#tpu.dimension_semantics<arbitrary>], iteration_bounds = array<i64: 5>, scalar_prefetch = 0 : i64, scratch_operands = 1 : i64, tpu.core_type = #tpu.core_type<tc>, window_params = [{transform_indices = @transform_0, window_bounds = array<i64: 2, 640>}, {transform_indices = @transform_1, window_bounds = array<i64: 640, 1024>}, {pipeline_mode = #tpu.pipeline_mode<synchronous>, transform_indices = @transform_2, window_bounds = array<i64: 1, 1024>}, {pipeline_mode = #tpu.pipeline_mode<synchronous>, transform_indices = @transform_3, window_bounds = array<i64: 1, 512>}, {pipeline_mode = #tpu.pipeline_mode<synchronous>, transform_indices = @transform_4, window_bounds = array<i64: 1, 1>}, {pipeline_mode = #tpu.pipeline_mode<synchronous>, transform_indices = @transform_5, window_bounds = array<i64: 512, 128>}, {pipeline_mode = #tpu.pipeline_mode<synchronous>, transform_indices = @transform_6, window_bounds = array<i64: 1, 128>}, {pipeline_mode = #tpu.pipeline_mode<synchronous>, transform_indices = @transform_7, window_bounds = array<i64: 2, 128>}]} {
    %c0_i32 = arith.constant 0 : i32
    %0 = arith.cmpi eq, %arg0, %c0_i32 : i32
    %1 = arith.extui %0 : i1 to i32
    %c0_i32_0 = arith.constant 0 : i32
    %2 = arith.cmpi ne, %1, %c0_i32_0 : i32
    scf.if %2 {
      %cst_9 = arith.constant 0.000000e+00 : f32
      %12 = vector.broadcast %cst_9 : f32 to vector<2x1024xf32>
      %c0_10 = arith.constant 0 : index
      %c0_11 = arith.constant 0 : index
      %13 = vector.load %arg9[%c0_10, %c0_11] : memref<2x1024xf32, #tpu.memory_space<vmem>>, vector<2x1024xf32>
      tpu.vector_store %arg9[%c0_10, %c0_11], %12 {strides = array<i32>} : memref<2x1024xf32, #tpu.memory_space<vmem>>, vector<2x1024xf32>,
    } else {
    }
    %c0 = arith.constant 0 : index
    %c0_1 = arith.constant 0 : index
    %3 = vector.load %arg9[%c0, %c0_1] : memref<2x1024xf32, #tpu.memory_space<vmem>>, vector<2x1024xf32>
    %c0_2 = arith.constant 0 : index
    %c0_3 = arith.constant 0 : index
    %4 = vector.load %arg1[%c0_2, %c0_3] : memref<2x640xbf16, #tpu.memory_space<vmem>>, vector<2x640xbf16>
    %c0_4 = arith.constant 0 : index
    %c0_5 = arith.constant 0 : index
    %5 = vector.load %arg2[%c0_4, %c0_5] : memref<640x1024xbf16, #tpu.memory_space<vmem>>, vector<640x1024xbf16>
    %cst = arith.constant dense<0.000000e+00> : vector<2x1024xf32>
    %6 = tpu.matmul %4, %5, %cst {dimension_numbers = #tpu.dot_dimension_numbers<[1], [0], [0], [1], [0, 0, 1, 1], [], []>} : vector<2x640xbf16>, vector<640x1024xbf16>, vector<2x1024xf32> -> vector<2x1024xf32>
    %7 = arith.addf %3, %6 : vector<2x1024xf32>
    %c0_6 = arith.constant 0 : index
    %c0_7 = arith.constant 0 : index
    %8 = vector.load %arg9[%c0_6, %c0_7] : memref<2x1024xf32, #tpu.memory_space<vmem>>, vector<2x1024xf32>
    tpu.vector_store %arg9[%c0_6, %c0_7], %7 {strides = array<i32>} : memref<2x1024xf32, #tpu.memory_space<vmem>>, vector<2x1024xf32>,
    %c4_i32 = arith.constant 4 : i32
    %9 = arith.cmpi eq, %arg0, %c4_i32 : i32
    %10 = arith.extui %9 : i1 to i32
    %c0_i32_8 = arith.constant 0 : i32
    %11 = arith.cmpi ne, %10, %c0_i32_8 : i32
    scf.if %11 {
      %c0_9 = arith.constant 0 : index
      %c0_10 = arith.constant 0 : index
      %12 = vector.load %arg9[%c0_9, %c0_10] : memref<2x1024xf32, #tpu.memory_space<vmem>>, vector<2x1024xf32>
      %c0_11 = arith.constant 0 : index
      %c0_12 = arith.constant 0 : index
      %13 = vector.load %arg3[%c0_11, %c0_12] : memref<1x1024xf32, #tpu.memory_space<vmem>>, vector<1x1024xf32>
      %14 = vector.broadcast %13 : vector<1x1024xf32> to vector<2x1024xf32>
      %15 = arith.addf %12, %14 : vector<2x1024xf32>
      %cst_13 = arith.constant 0.000000e+00 : f32
      %16 = vector.broadcast %cst_13 : f32 to vector<2x1024xf32>
      %17 = arith.maximumf %15, %16 : vector<2x1024xf32>
      %18 = vector.extract_strided_slice %17 {offsets = [0, 0], sizes = [2, 512], strides = [1, 1]} : vector<2x1024xf32> to vector<2x512xf32>
      %19 = vector.extract_strided_slice %17 {offsets = [0, 512], sizes = [2, 512], strides = [1, 1]} : vector<2x1024xf32> to vector<2x512xf32>
      %c0_14 = arith.constant 0 : index
      %c0_15 = arith.constant 0 : index
      %20 = vector.load %arg4[%c0_14, %c0_15] : memref<1x512xf32, #tpu.memory_space<vmem>>, vector<1x512xf32>
      %21 = vector.broadcast %20 : vector<1x512xf32> to vector<2x512xf32>
      %22 = arith.mulf %18, %21 : vector<2x512xf32>
      %cst_16 = arith.constant dense<0.000000e+00> : vector<2xf32>
      %23 = vector.multi_reduction <add>, %22, %cst_16 [1] : vector<2x512xf32> to vector<2xf32>
      %24 = vector.shape_cast %23 : vector<2xf32> to vector<2x1xf32>
      %c0_17 = arith.constant 0 : index
      %c0_18 = arith.constant 0 : index
      %25 = vector.load %arg5[%c0_17, %c0_18] : memref<1x1xf32, #tpu.memory_space<vmem>>, vector<1x1xf32>
      %26 = vector.broadcast %25 : vector<1x1xf32> to vector<2x1xf32>
      %27 = arith.addf %24, %26 : vector<2x1xf32>
      %28 = arith.truncf %19 : vector<2x512xf32> to vector<2x512xbf16>
      %c0_19 = arith.constant 0 : index
      %c0_20 = arith.constant 0 : index
      %29 = vector.load %arg6[%c0_19, %c0_20] : memref<512x128xbf16, #tpu.memory_space<vmem>>, vector<512x128xbf16>
      %cst_21 = arith.constant dense<0.000000e+00> : vector<2x128xf32>
      %30 = tpu.matmul %28, %29, %cst_21 {dimension_numbers = #tpu.dot_dimension_numbers<[1], [0], [0], [1], [0, 0, 1, 1], [], []>} : vector<2x512xbf16>, vector<512x128xbf16>, vector<2x128xf32> -> vector<2x128xf32>
      %c0_22 = arith.constant 0 : index
      %c0_23 = arith.constant 0 : index
      %31 = vector.load %arg7[%c0_22, %c0_23] : memref<1x128xf32, #tpu.memory_space<vmem>>, vector<1x128xf32>
      %32 = vector.broadcast %31 : vector<1x128xf32> to vector<2x128xf32>
      %33 = arith.addf %30, %32 : vector<2x128xf32>
      %34 = vector.shape_cast %33 : vector<2x128xf32> to vector<1x2x128xf32>
      %cst_24 = arith.constant dense<0.000000e+00> : vector<1xf32>
      %35 = vector.multi_reduction <add>, %34, %cst_24 [1, 2] : vector<1x2x128xf32> to vector<1xf32>
      %36 = vector.shape_cast %35 : vector<1xf32> to vector<1x1x1xf32>
      %37 = vector.extract %36[0, 0, 0] : f32 from vector<1x1x1xf32>
      %cst_25 = arith.constant 1.200000e+01 : f32
      %38 = arith.divf %37, %cst_25 : f32
      %39 = vector.broadcast %27 : vector<2x1xf32> to vector<2x128xf32>
      %40 = arith.addf %39, %33 : vector<2x128xf32>
      %41 = vector.broadcast %38 : f32 to vector<2x128xf32>
      %42 = arith.subf %40, %41 : vector<2x128xf32>
      %c0_26 = arith.constant 0 : index
      %c0_27 = arith.constant 0 : index
      %43 = vector.load %arg8[%c0_26, %c0_27] : memref<2x128xf32, #tpu.memory_space<vmem>>, vector<2x128xf32>
      tpu.vector_store %arg8[%c0_26, %c0_27], %42 {strides = array<i32>} : memref<2x128xf32, #tpu.memory_space<vmem>>, vector<2x128xf32>,
    } else {
    }
    return
  }
  func.func @transform_0(%arg0: i32) -> (i32, i32) {
    %c0_i32 = arith.constant 0 : i32
    %c0_i32_0 = arith.constant 0 : i32
    return %c0_i32, %arg0 : i32, i32
  }
  func.func @transform_1(%arg0: i32) -> (i32, i32) {
    %c0_i32 = arith.constant 0 : i32
    %c0_i32_0 = arith.constant 0 : i32
    return %arg0, %c0_i32 : i32, i32
  }
  func.func @transform_2(%arg0: i32) -> (i32, i32) {
    %c0_i32 = arith.constant 0 : i32
    %c0_i32_0 = arith.constant 0 : i32
    %c0_i32_1 = arith.constant 0 : i32
    return %c0_i32, %c0_i32_0 : i32, i32
  }
  func.func @transform_3(%arg0: i32) -> (i32, i32) {
    %c0_i32 = arith.constant 0 : i32
    %c0_i32_0 = arith.constant 0 : i32
    %c0_i32_1 = arith.constant 0 : i32
    return %c0_i32, %c0_i32_0 : i32, i32
  }
  func.func @transform_4(%arg0: i32) -> (i32, i32) {
    %c0_i32 = arith.constant 0 : i32
    %c0_i32_0 = arith.constant 0 : i32
    %c0_i32_1 = arith.constant 0 : i32
    return %c0_i32, %c0_i32_0 : i32, i32
  }
  func.func @transform_5(%arg0: i32) -> (i32, i32) {
    %c0_i32 = arith.constant 0 : i32
    %c0_i32_0 = arith.constant 0 : i32
    %c0_i32_1 = arith.constant 0 : i32
    return %c0_i32, %c0_i32_0 : i32, i32
  }
  func.func @transform_6(%arg0: i32) -> (i32, i32) {
    %c0_i32 = arith.constant 0 : i32
    %c0_i32_0 = arith.constant 0 : i32
    %c0_i32_1 = arith.constant 0 : i32
    return %c0_i32, %c0_i32_0 : i32, i32
  }
  func.func @transform_7(%arg0: i32) -> (i32, i32) {
    %c0_i32 = arith.constant 0 : i32
    %c0_i32_0 = arith.constant 0 : i32
    %c0_i32_1 = arith.constant 0 : i32
    return %c0_i32, %c0_i32_0 : i32, i32
  }
}

</mosaic_0001>

<bundles_post_ra>
// kernel: dueling_dqn_forward.4
= control target key start
LH: loop header
LB: loop body
LE: loop exit
PB: predicated region body
PF: predicated region fallthrough
CT: control target
= control target key end

     0   :  { %s2901_s9 = smov 0   ;;  %s2903_s10 = smov 0   ;;  %s4394_s0 = inlined_call_operand.vmem [shape: bf16[32,256], index: 0, kind: input, shape index: {}]   ;;  %s4395_s1 = inlined_call_operand.vmem [shape: bf16[256,800], index: 1, kind: input, shape index: {}]   ;;  %s4396_s2 = inlined_call_operand.vmem [shape: bf16[32,800], index: 2, kind: output, shape index: {}]  }
   0x1   :  { %s2905_s11 = smov 0  }
   0x2 LB: > { %s2917_s12 = sadd.s32 4294967295, %s2752_s11   ;;  %s2920_s13 = sadd.s32 1, %s2752_s11   ;;  %s2752_s11 = sphi %s2905_s11, %s4433_s11   ;;  %s2748_s10 = sphi %s2903_s10, %s4432_s10   ;;  %s2744_s9 = sphi %s2901_s9, %s4431_s9  }
   0x3   : > { %s37_s14 = ssub.s32 %s2752_s11, %s2920_s13  ;;  %s40_s15 = sadd.s32 1, %s2748_s10 }
   0x4   : > { %p38_p0 = scmp.eq.s32.totalorder %s37_s14, 0  ;;  %p47_p1 = scmp.ne.s32.totalorder %s2748_s10, %s2744_s9 }
   0x5   : > { %p48_p2 = scmp.eq.s32.totalorder %s2752_s11, 0  ;;  %p77_p3 = scmp.eq.s32.totalorder %s2917_s12, 1 }
   0x6   : > { %s2930_s16 = scalar_select %p38_p0, %s2748_s10, %s40_s15  }
   0x7   : > { %p49_p4 = por %p48_p2, %p47_p1  ;;  %p2932_p5 = por %p77_p3, %p47_p1 }
   0x8   : > { %p2058_p6 = scmp.ge.s32.totalorder %s2752_s11, 2 }
   0xa   : > { %102 = sbr.rel (%p2058_p6) target bundleno = 244 (0xf4), region = 20 }
   0xf   : > { %105 = sbr.rel (!%p49_p4) target bundleno = 244 (0xf4), region = 24  ;;  %s107_s18 = sand.u32 (%p49_p4), 1, %s2748_s10  }
  0x10   : > { %s2060_s19 = sshll.u32 (%p49_p4), %s2752_s11, 2  ;;  %s2059_s20 = sshll.u32 (%p49_p4), %s107_s18, 9 }
  0x11   : > { %s111_s21 = ssub.s32 (%p49_p4), 7, %s2060_s19  ;;  %s2198_s22 = sshll.u32 (%p49_p4), %s2752_s11, 4 }
  0x12   : > { %p112_p7 = scmp.lt.s32.totalorder (%p49_p4), %s111_s21, 4  ;;  %s2943_s25 = scalar_lea.vmem (%p49_p4), %s4395_s1, %s2198_s22  }
  0x13   : > { %s2947_s28 = scalar_lea.vmem (%p49_p4), [#allocation2], %s2059_s20  }
  0x14   : > { %s4435_s21 = smov (!%p112_p7, %s111_s21), 4 }
  0x15   : > { %s2061_s26 = sshll.u32 %s4435_s21, 11  ;;  %s2945_s27 = sshll.u32 %s4435_s21, 2 }
  0x16   : > { %p2065_p8 = scmp.eq.s32.totalorder %s2061_s26, 0 }
  0x17   : > { %p122_p9 = scmp.lt.u32.totalorder (!%p2065_p8), %s2945_s27, 8 }
  0x18   : > { %121 = sbr.rel (%p2065_p8) target bundleno = 244 (0xf4), region = 28 }
  0x1d   : > { %125 = sbr.rel (%p122_p9) target bundleno = 205 (0xcd), region = 32  ;;  %s2951_s29 = sand.u32 (!%p122_p9), 7, %s2945_s27  }
  0x1e   : > { %p204_p10 = scmp.eq.s32.totalorder (!%p122_p9), %s2951_s29, 0  ;;  %p2066_p11 = scmp.ne.s32.totalorder (!%p122_p9), %s2951_s29, 0 }
  0x22   : > { %207 = sbr.rel (%p2066_p11) target bundleno = 102 (0x66), region = 47  ;;  %s208_s30 = sshrl.u32 (!%p2066_p11), %s2945_s27, 3 }
  0x23   : > { %s2958_s3 = sshrl.u32 (!%p2066_p11), %s208_s30, 1 }
  0x24   : > { %p2067_p12 = scmp.le.s32.totalorder (!%p2066_p11), %s2958_s3, 0 }
  0x27   : > { %1928 = sbr.rel (%p2067_p12) target bundleno = 77 (0x4d), region = 225  ;;  %s4398_s4 = smov (!%p2067_p12), %s2947_s28 }
  0x28   : > { %s4399_s5 = smov (!%p2067_p12), %s2943_s25  ;;  %s2967_s6 = smov (!%p2067_p12), 0  }
  0x29   : > { %s2969_s7 = smov (!%p2067_p12), 0  }
  0x2c LB: >> { %v221_v0 = vld [vmem:[%s2760_s5] sm:$0xff]  ;;  %v223_v1 = vld [vmem:[%s2760_s5 + $0x8] sm:$0xff]  ;;  %s349_s8 = sadd.s32 1, %s2764_s6  ;;  %v229_v4 = vld [vmem:[%s2760_s5 + $0x38] sm:$0xff]  ;;  %s215_s7 = sadd.s32 1, %s2768_s7   ;;  %s2768_s7 = sphi %s2969_s7, %s215_s7   ;;  %s2764_s6 = sphi %s2967_s6, %s4402_s6   ;;  %s2760_s5 = sphi %s4399_s5, %s4401_s5   ;;  %s2756_s4 = sphi %s4398_s4, %s4400_s4  }
  0x2d   : >> { %v225_v2 = vld [vmem:[%s2760_s5 + $0x1c] sm:$0xff]  ;;  %222 = vst [vmem:[%s2756_s4] sm:$0xff] %v221_v0  ;;  %224 = vst [vmem:[%s2756_s4 + $0x8] sm:$0xff] %v223_v1  ;;  %v227_v3 = vld [vmem:[%s2760_s5 + $0x24] sm:$0xff]  ;;  %p350_p13 = scmp.ge.s32.totalorder %s349_s8, %s2958_s3  ;;  %p214_p0 = scmp.ge.s32.totalorder %s215_s7, %s2958_s3 }
  0x2e   : >> { %226 = vst [vmem:[%s2756_s4 + $0x10] sm:$0xff] %v225_v2  ;;  %v231_v5 = vld [vmem:[%s2760_s5 + $0x40] sm:$0xff]  ;;  %228 = vst [vmem:[%s2756_s4 + $0x18] sm:$0xff] %v227_v3  ;;  %v233_v6 = vld [vmem:[%s2760_s5 + $0x54] sm:$0xff] }
  0x2f   : >> { %230 = vst [vmem:[%s2756_s4 + $0x20] sm:$0xff] %v229_v4  ;;  %232 = vst [vmem:[%s2756_s4 + $0x28] sm:$0xff] %v231_v5  ;;  %v235_v7 = vld [vmem:[%s2760_s5 + $0x5c] sm:$0xff]  ;;  %v237_v8 = vld [vmem:[%s2760_s5 + $0x70] sm:$0xff]  ;;  %s4437_s8 = smov (%p350_p13, %s349_s8), 0 }
  0x30   : >> { %234 = vst [vmem:[%s2756_s4 + $0x30] sm:$0xff] %v233_v6  ;;  %236 = vst [vmem:[%s2756_s4 + $0x38] sm:$0xff] %v235_v7  ;;  %v239_v9 = vld [vmem:[%s2760_s5 + $0x78] sm:$0xff]  ;;  %v241_v10 = vld [vmem:[%s2760_s5 + $0x8c] sm:$0xff]  ;;  %s2068_s14 = sshll.u32 %s4437_s8, 4  ;;  %s4402_s6 = smov %s4437_s8 }
  0x31   : >> { %238 = vst [vmem:[%s2756_s4 + $0x40] sm:$0xff] %v237_v8  ;;  %v243_v11 = vld [vmem:[%s2760_s5 + $0x94] sm:$0xff]  ;;  %240 = vst [vmem:[%s2756_s4 + $0x48] sm:$0xff] %v239_v9  ;;  %v245_v12 = vld [vmem:[%s2760_s5 + $0xa8] sm:$0xff]  ;;  %s3025_s15 = scalar_lea.vmem %s2943_s25, %s2068_s14   ;;  %s3028_s18 = scalar_lea.vmem %s2947_s28, %s2068_s14 [#allocation2]  }
  0x32   : >> { %242 = vst [vmem:[%s2756_s4 + $0x50] sm:$0xff] %v241_v10  ;;  %244 = vst [vmem:[%s2756_s4 + $0x58] sm:$0xff] %v243_v11  ;;  %v247_v13 = vld [vmem:[%s2760_s5 + $0xb0] sm:$0xff]  ;;  %v249_v14 = vld [vmem:[%s2760_s5 + $0xc4] sm:$0xff] }
  0x33   : >> { %246 = vst [vmem:[%s2756_s4 + $0x60] sm:$0xff] %v245_v12  ;;  %248 = vst [vmem:[%s2756_s4 + $0x68] sm:$0xff] %v247_v13  ;;  %v251_v15 = vld [vmem:[%s2760_s5 + $0xcc] sm:$0xff]  ;;  %v253_v16 = vld [vmem:[%s2760_s5 + $0xe0] sm:$0xff] }
  0x34   : >> { %250 = vst [vmem:[%s2756_s4 + $0x70] sm:$0xff] %v249_v14  ;;  %v255_v17 = vld [vmem:[%s2760_s5 + $0xe8] sm:$0xff]  ;;  %252 = vst [vmem:[%s2756_s4 + $0x78] sm:$0xff] %v251_v15  ;;  %v257_v18 = vld [vmem:[%s2760_s5 + $0xfc] sm:$0xff] }
  0x35   : >> { %254 = vst [vmem:[%s2756_s4 + $0x80] sm:$0xff] %v253_v16  ;;  %256 = vst [vmem:[%s2756_s4 + $0x88] sm:$0xff] %v255_v17  ;;  %v259_v19 = vld [vmem:[%s2760_s5 + $0x104] sm:$0xff]  ;;  %v261_v20 = vld [vmem:[%s2760_s5 + $0x118] sm:$0xff] }
  0x36   : >> { %258 = vst [vmem:[%s2756_s4 + $0x90] sm:$0xff] %v257_v18  ;;  %260 = vst [vmem:[%s2756_s4 + $0x98] sm:$0xff] %v259_v19  ;;  %v263_v21 = vld [vmem:[%s2760_s5 + $0x120] sm:$0xff]  ;;  %v265_v22 = vld [vmem:[%s2760_s5 + $0x134] sm:$0xff] }
  0x37   : >> { %262 = vst [vmem:[%s2756_s4 + $0xa0] sm:$0xff] %v261_v20  ;;  %v267_v23 = vld [vmem:[%s2760_s5 + $0x13c] sm:$0xff]  ;;  %264 = vst [vmem:[%s2756_s4 + $0xa8] sm:$0xff] %v263_v21  ;;  %v269_v24 = vld [vmem:[%s2760_s5 + $0x150] sm:$0xff] }
  0x38   : >> { %266 = vst [vmem:[%s2756_s4 + $0xb0] sm:$0xff] %v265_v22  ;;  %268 = vst [vmem:[%s2756_s4 + $0xb8] sm:$0xff] %v267_v23  ;;  %v271_v25 = vld [vmem:[%s2760_s5 + $0x158] sm:$0xff]  ;;  %v273_v26 = vld [vmem:[%s2760_s5 + $0x16c] sm:$0xff] }
  0x39   : >> { %270 = vst [vmem:[%s2756_s4 + $0xc0] sm:$0xff] %v269_v24  ;;  %272 = vst [vmem:[%s2756_s4 + $0xc8] sm:$0xff] %v271_v25  ;;  %v275_v27 = vld [vmem:[%s2760_s5 + $0x174] sm:$0xff]  ;;  %v277_v28 = vld [vmem:[%s2760_s5 + $0x188] sm:$0xff] }
  0x3a   : >> { %274 = vst [vmem:[%s2756_s4 + $0xd0] sm:$0xff] %v273_v26  ;;  %v279_v29 = vld [vmem:[%s2760_s5 + $0x190] sm:$0xff]  ;;  %276 = vst [vmem:[%s2756_s4 + $0xd8] sm:$0xff] %v275_v27  ;;  %v281_v30 = vld [vmem:[%s2760_s5 + $0x1a4] sm:$0xff] }
  0x3b   : >> { %278 = vst [vmem:[%s2756_s4 + $0xe0] sm:$0xff] %v277_v28  ;;  %280 = vst [vmem:[%s2756_s4 + $0xe8] sm:$0xff] %v279_v29  ;;  %v283_v31 = vld [vmem:[%s2760_s5 + $0x1ac] sm:$0xff]  ;;  %v285_v32 = vld [vmem:[%s2760_s5 + $0x1c0] sm:$0xff] }
  0x3c   : >> { %282 = vst [vmem:[%s2756_s4 + $0xf0] sm:$0xff] %v281_v30  ;;  %284 = vst [vmem:[%s2756_s4 + $0xf8] sm:$0xff] %v283_v31  ;;  %v287_v33 = vld [vmem:[%s2760_s5 + $0x1c8] sm:$0xff]  ;;  %v289_v34 = vld [vmem:[%s2760_s5 + $0x1dc] sm:$0xff] }
  0x3d   : >> { %286 = vst [vmem:[%s2756_s4 + $0x100] sm:$0xff] %v285_v32  ;;  %v291_v35 = vld [vmem:[%s2760_s5 + $0x1e4] sm:$0xff]  ;;  %288 = vst [vmem:[%s2756_s4 + $0x108] sm:$0xff] %v287_v33  ;;  %v293_v36 = vld [vmem:[%s2760_s5 + $0x1f8] sm:$0xff] }
  0x3e   : >> { %290 = vst [vmem:[%s2756_s4 + $0x110] sm:$0xff] %v289_v34  ;;  %292 = vst [vmem:[%s2756_s4 + $0x118] sm:$0xff] %v291_v35  ;;  %v295_v37 = vld [vmem:[%s2760_s5 + $0x200] sm:$0xff]  ;;  %v297_v38 = vld [vmem:[%s2760_s5 + $0x214] sm:$0xff] }
  0x3f   : >> { %294 = vst [vmem:[%s2756_s4 + $0x120] sm:$0xff] %v293_v36  ;;  %296 = vst [vmem:[%s2756_s4 + $0x128] sm:$0xff] %v295_v37  ;;  %v299_v39 = vld [vmem:[%s2760_s5 + $0x21c] sm:$0xff]  ;;  %v301_v40 = vld [vmem:[%s2760_s5 + $0x230] sm:$0xff] }
  0x40   : >> { %298 = vst [vmem:[%s2756_s4 + $0x130] sm:$0xff] %v297_v38  ;;  %v303_v41 = vld [vmem:[%s2760_s5 + $0x238] sm:$0xff]  ;;  %300 = vst [vmem:[%s2756_s4 + $0x138] sm:$0xff] %v299_v39  ;;  %v305_v42 = vld [vmem:[%s2760_s5 + $0x24c] sm:$0xff] }
  0x41   : >> { %302 = vst [vmem:[%s2756_s4 + $0x140] sm:$0xff] %v301_v40  ;;  %304 = vst [vmem:[%s2756_s4 + $0x148] sm:$0xff] %v303_v41  ;;  %v307_v43 = vld [vmem:[%s2760_s5 + $0x254] sm:$0xff]  ;;  %v309_v44 = vld [vmem:[%s2760_s5 + $0x268] sm:$0xff] }
  0x42   : >> { %306 = vst [vmem:[%s2756_s4 + $0x150] sm:$0xff] %v305_v42  ;;  %308 = vst [vmem:[%s2756_s4 + $0x158] sm:$0xff] %v307_v43  ;;  %v311_v45 = vld [vmem:[%s2760_s5 + $0x270] sm:$0xff]  ;;  %v313_v46 = vld [vmem:[%s2760_s5 + $0x284] sm:$0xff] }
  0x43   : >> { %310 = vst [vmem:[%s2756_s4 + $0x160] sm:$0xff] %v309_v44  ;;  %v315_v47 = vld [vmem:[%s2760_s5 + $0x28c] sm:$0xff]  ;;  %312 = vst [vmem:[%s2756_s4 + $0x168] sm:$0xff] %v311_v45  ;;  %v317_v48 = vld [vmem:[%s2760_s5 + $0x2a0] sm:$0xff] }
  0x44   : >> { %314 = vst [vmem:[%s2756_s4 + $0x170] sm:$0xff] %v313_v46  ;;  %316 = vst [vmem:[%s2756_s4 + $0x178] sm:$0xff] %v315_v47  ;;  %v319_v49 = vld [vmem:[%s2760_s5 + $0x2a8] sm:$0xff]  ;;  %v321_v50 = vld [vmem:[%s2760_s5 + $0x2bc] sm:$0xff] }
  0x45   : >> { %318 = vst [vmem:[%s2756_s4 + $0x180] sm:$0xff] %v317_v48  ;;  %320 = vst [vmem:[%s2756_s4 + $0x188] sm:$0xff] %v319_v49  ;;  %v323_v51 = vld [vmem:[%s2760_s5 + $0x2c4] sm:$0xff]  ;;  %v325_v52 = vld [vmem:[%s2760_s5 + $0x2d8] sm:$0xff] }
  0x46   : >> { %322 = vst [vmem:[%s2756_s4 + $0x190] sm:$0xff] %v321_v50  ;;  %v327_v53 = vld [vmem:[%s2760_s5 + $0x2e0] sm:$0xff]  ;;  %324 = vst [vmem:[%s2756_s4 + $0x198] sm:$0xff] %v323_v51  ;;  %v329_v54 = vld [vmem:[%s2760_s5 + $0x2f4] sm:$0xff] }
  0x47   : >> { %326 = vst [vmem:[%s2756_s4 + $0x1a0] sm:$0xff] %v325_v52  ;;  %328 = vst [vmem:[%s2756_s4 + $0x1a8] sm:$0xff] %v327_v53  ;;  %v331_v55 = vld [vmem:[%s2760_s5 + $0x2fc] sm:$0xff]  ;;  %v333_v56 = vld [vmem:[%s2760_s5 + $0x310] sm:$0xff] }
  0x48   : >> { %330 = vst [vmem:[%s2756_s4 + $0x1b0] sm:$0xff] %v329_v54  ;;  %332 = vst [vmem:[%s2756_s4 + $0x1b8] sm:$0xff] %v331_v55  ;;  %v335_v57 = vld [vmem:[%s2760_s5 + $0x318] sm:$0xff]  ;;  %v337_v58 = vld [vmem:[%s2760_s5 + $0x32c] sm:$0xff]  ;;  %217 = sbr.rel (!%p214_p0) target bundleno = 44 (0x2c), region = 231 }
  0x49   : >> { %334 = vst [vmem:[%s2756_s4 + $0x1c0] sm:$0xff] %v333_v56  ;;  %v339_v59 = vld [vmem:[%s2760_s5 + $0x334] sm:$0xff]  ;;  %336 = vst [vmem:[%s2756_s4 + $0x1c8] sm:$0xff] %v335_v57  ;;  %v341_v60 = vld [vmem:[%s2760_s5 + $0x348] sm:$0xff] }
  0x4a   : >> { %338 = vst [vmem:[%s2756_s4 + $0x1d0] sm:$0xff] %v337_v58  ;;  %340 = vst [vmem:[%s2756_s4 + $0x1d8] sm:$0xff] %v339_v59  ;;  %v343_v61 = vld [vmem:[%s2760_s5 + $0x350] sm:$0xff]  ;;  %v345_v62 = vld [vmem:[%s2760_s5 + $0x364] sm:$0xff] }
  0x4b   : >> { %342 = vst [vmem:[%s2756_s4 + $0x1e0] sm:$0xff] %v341_v60  ;;  %344 = vst [vmem:[%s2756_s4 + $0x1e8] sm:$0xff] %v343_v61  ;;  %v347_v63 = vld [vmem:[%s2760_s5 + $0x36c] sm:$0xff]  ;;  %s4401_s5 = smov %s3025_s15 }
  0x4c   : >> { %346 = vst [vmem:[%s2756_s4 + $0x1f0] sm:$0xff] %v345_v62  ;;  %348 = vst [vmem:[%s2756_s4 + $0x1f8] sm:$0xff] %v347_v63  ;;  %s4400_s4 = smov %s3028_s18 }
  0x4d PF: > { %s3134_s19 = sand.u32 1, %s208_s30   ;;  %s2199_s20 = sshll.u32 %s2958_s3, 8 }
  0x4e   : > { %s360_s21 = sshra.s32 %s2199_s20, 4  ;;  %p2073_p1 = scmp.le.s32.totalorder %s3134_s19, 0 }
  0x4f   : > { %s3138_s22 = scalar_lea.vmem %s2943_s25, %s360_s21   ;;  %s3141_s23 = scalar_lea.vmem %s2947_s28, %s360_s21 [#allocation2]  }
  0x50   : > { %1942 = sbr.rel (%p2073_p1) target bundleno = 102 (0x66), region = 236  ;;  %s4403_s24 = smov (!%p2073_p1), %s3141_s23 }
  0x51   : > { %s4404_s26 = smov (!%p2073_p1), %s3138_s22  ;;  %s3150_s4 = smov (!%p2073_p1), 0  }
  0x52   : > { %s3152_s5 = smov (!%p2073_p1), 0  }
  0x55 LB: >> { %v376_v0 = vld [vmem:[%s2776_s26] sm:$0xff]  ;;  %v380_v2 = vld [vmem:[%s2776_s26 + $0x38] sm:$0xff]  ;;  %s440_s30 = sadd.s32 1, %s2780_s4  ;;  %v384_v4 = vld [vmem:[%s2776_s26 + $0x70] sm:$0xff]  ;;  %s370_s5 = sadd.s32 1, %s2784_s5   ;;  %s2784_s5 = sphi %s3152_s5, %s370_s5   ;;  %s2780_s4 = sphi %s3150_s4, %s4407_s4   ;;  %s2776_s26 = sphi %s4404_s26, %s4406_s26   ;;  %s2772_s24 = sphi %s4403_s24, %s4405_s24  }
  0x56   : >> { %v378_v1 = vld [vmem:[%s2776_s26 + $0x1c] sm:$0xff]  ;;  %377 = vst [vmem:[%s2772_s24] sm:$0xff] %v376_v0  ;;  %381 = vst [vmem:[%s2772_s24 + $0x20] sm:$0xff] %v380_v2  ;;  %v382_v3 = vld [vmem:[%s2776_s26 + $0x54] sm:$0xff]  ;;  %p441_p2 = scmp.ge.s32.totalorder %s440_s30, %s3134_s19  ;;  %p369_p3 = scmp.ge.s32.totalorder %s370_s5, %s3134_s19 }
  0x57   : >> { %379 = vst [vmem:[%s2772_s24 + $0x10] sm:$0xff] %v378_v1  ;;  %v386_v5 = vld [vmem:[%s2776_s26 + $0x8c] sm:$0xff]  ;;  %383 = vst [vmem:[%s2772_s24 + $0x30] sm:$0xff] %v382_v3  ;;  %v390_v7 = vld [vmem:[%s2776_s26 + $0xc4] sm:$0xff] }
  0x58   : >> { %385 = vst [vmem:[%s2772_s24 + $0x40] sm:$0xff] %v384_v4  ;;  %387 = vst [vmem:[%s2772_s24 + $0x50] sm:$0xff] %v386_v5  ;;  %v388_v6 = vld [vmem:[%s2776_s26 + $0xa8] sm:$0xff]  ;;  %v392_v8 = vld [vmem:[%s2776_s26 + $0xe0] sm:$0xff]  ;;  %s4439_s30 = smov (%p441_p2, %s440_s30), 0 }
  0x59   : >> { %389 = vst [vmem:[%s2772_s24 + $0x60] sm:$0xff] %v388_v6  ;;  %391 = vst [vmem:[%s2772_s24 + $0x70] sm:$0xff] %v390_v7  ;;  %v394_v9 = vld [vmem:[%s2776_s26 + $0xfc] sm:$0xff]  ;;  %v398_v11 = vld [vmem:[%s2776_s26 + $0x134] sm:$0xff]  ;;  %s2074_s3 = sshll.u32 %s4439_s30, 3  ;;  %s4407_s4 = smov %s4439_s30 }
  0x5a   : >> { %393 = vst [vmem:[%s2772_s24 + $0x80] sm:$0xff] %v392_v8  ;;  %v396_v10 = vld [vmem:[%s2776_s26 + $0x118] sm:$0xff]  ;;  %395 = vst [vmem:[%s2772_s24 + $0x90] sm:$0xff] %v394_v9  ;;  %v400_v12 = vld [vmem:[%s2776_s26 + $0x150] sm:$0xff]  ;;  %s3208_s6 = scalar_lea.vmem %s3138_s22, %s2074_s3   ;;  %s446_s7 = scalar_lea.vmem %s3141_s23, %s2074_s3 [#allocation2]  }
  0x5b   : >> { %397 = vst [vmem:[%s2772_s24 + $0xa0] sm:$0xff] %v396_v10  ;;  %399 = vst [vmem:[%s2772_s24 + $0xb0] sm:$0xff] %v398_v11  ;;  %v402_v13 = vld [vmem:[%s2776_s26 + $0x16c] sm:$0xff]  ;;  %v406_v15 = vld [vmem:[%s2776_s26 + $0x1a4] sm:$0xff] }
  0x5c   : >> { %v404_v14 = vld [vmem:[%s2776_s26 + $0x188] sm:$0xff]  ;;  %401 = vst [vmem:[%s2772_s24 + $0xc0] sm:$0xff] %v400_v12  ;;  %403 = vst [vmem:[%s2772_s24 + $0xd0] sm:$0xff] %v402_v13  ;;  %v408_v16 = vld [vmem:[%s2776_s26 + $0x1c0] sm:$0xff] }
  0x5d   : >> { %405 = vst [vmem:[%s2772_s24 + $0xe0] sm:$0xff] %v404_v14  ;;  %v410_v17 = vld [vmem:[%s2776_s26 + $0x1dc] sm:$0xff]  ;;  %407 = vst [vmem:[%s2772_s24 + $0xf0] sm:$0xff] %v406_v15  ;;  %v414_v19 = vld [vmem:[%s2776_s26 + $0x214] sm:$0xff] }
  0x5e   : >> { %409 = vst [vmem:[%s2772_s24 + $0x100] sm:$0xff] %v408_v16  ;;  %411 = vst [vmem:[%s2772_s24 + $0x110] sm:$0xff] %v410_v17  ;;  %v412_v18 = vld [vmem:[%s2776_s26 + $0x1f8] sm:$0xff]  ;;  %v416_v20 = vld [vmem:[%s2776_s26 + $0x230] sm:$0xff] }
  0x5f   : >> { %413 = vst [vmem:[%s2772_s24 + $0x120] sm:$0xff] %v412_v18  ;;  %415 = vst [vmem:[%s2772_s24 + $0x130] sm:$0xff] %v414_v19  ;;  %v418_v21 = vld [vmem:[%s2776_s26 + $0x24c] sm:$0xff]  ;;  %v422_v23 = vld [vmem:[%s2776_s26 + $0x284] sm:$0xff] }
  0x60   : >> { %417 = vst [vmem:[%s2772_s24 + $0x140] sm:$0xff] %v416_v20  ;;  %v420_v22 = vld [vmem:[%s2776_s26 + $0x268] sm:$0xff]  ;;  %419 = vst [vmem:[%s2772_s24 + $0x150] sm:$0xff] %v418_v21  ;;  %v424_v24 = vld [vmem:[%s2776_s26 + $0x2a0] sm:$0xff] }
  0x61   : >> { %421 = vst [vmem:[%s2772_s24 + $0x160] sm:$0xff] %v420_v22  ;;  %423 = vst [vmem:[%s2772_s24 + $0x170] sm:$0xff] %v422_v23  ;;  %v426_v25 = vld [vmem:[%s2776_s26 + $0x2bc] sm:$0xff]  ;;  %v430_v27 = vld [vmem:[%s2776_s26 + $0x2f4] sm:$0xff]  ;;  %372 = sbr.rel (!%p369_p3) target bundleno = 85 (0x55), region = 242 }
  0x62   : >> { %v428_v26 = vld [vmem:[%s2776_s26 + $0x2d8] sm:$0xff]  ;;  %425 = vst [vmem:[%s2772_s24 + $0x180] sm:$0xff] %v424_v24  ;;  %427 = vst [vmem:[%s2772_s24 + $0x190] sm:$0xff] %v426_v25  ;;  %v432_v28 = vld [vmem:[%s2776_s26 + $0x310] sm:$0xff] }
  0x63   : >> { %429 = vst [vmem:[%s2772_s24 + $0x1a0] sm:$0xff] %v428_v26  ;;  %v434_v29 = vld [vmem:[%s2776_s26 + $0x32c] sm:$0xff]  ;;  %431 = vst [vmem:[%s2772_s24 + $0x1b0] sm:$0xff] %v430_v27  ;;  %v438_v31 = vld [vmem:[%s2776_s26 + $0x364] sm:$0xff] }
  0x64   : >> { %433 = vst [vmem:[%s2772_s24 + $0x1c0] sm:$0xff] %v432_v28  ;;  %435 = vst [vmem:[%s2772_s24 + $0x1d0] sm:$0xff] %v434_v29  ;;  %v436_v30 = vld [vmem:[%s2776_s26 + $0x348] sm:$0xff]  ;;  %s4406_s26 = smov %s3208_s6 }
  0x65   : >> { %437 = vst [vmem:[%s2772_s24 + $0x1e0] sm:$0xff] %v436_v30  ;;  %439 = vst [vmem:[%s2772_s24 + $0x1f0] sm:$0xff] %v438_v31  ;;  %s4405_s24 = smov %s446_s7 }
  0x66 PF: > { %449 = sbr.rel (%p204_p10) target bundleno = 205 (0xcd), region = 65  ;;  %s451_s8 = ssub.s32 (!%p204_p10), %s2945_s27, %s2951_s29 }
  0x67   : > { %s455_s14 = sshrl.u32 (!%p204_p10), %s2945_s27, 3  ;;  %s3254_s15 = scalar_lea.vmem (!%p204_p10), %s2943_s25, %s451_s8 }
  0x68   : > { %s3257_s18 = scalar_lea.vmem (!%p204_p10), %s2947_s28, %s451_s8 [#allocation2]  ;;  %s3261_s20 = sshrl.u32 (!%p204_p10), %s455_s14, 1 }
  0x69   : > { %p2076_p4 = scmp.le.s32.totalorder (!%p204_p10), %s3261_s20, 0 }
  0x6b   : > { %1956 = sbr.rel (%p2076_p4) target bundleno = 145 (0x91), region = 247  ;;  %s4408_s19 = smov (!%p2076_p4), %s2947_s28 }
  0x6c   : > { %s4409_s21 = smov (!%p2076_p4), %s2943_s25  ;;  %s3270_s22 = smov (!%p2076_p4), 0  }
  0x6d   : > { %s3272_s23 = smov (!%p2076_p4), 0  }
  0x70 LB: >> { %v468_v32 = vld [vmem:[%s2792_s21] sm:$0xff]  ;;  %v470_v33 = vld [vmem:[%s2792_s21 + $0x8] sm:$0xff]  ;;  %s596_s24 = sadd.s32 1, %s2796_s22  ;;  %v476_v36 = vld [vmem:[%s2792_s21 + $0x38] sm:$0xff]  ;;  %s462_s23 = sadd.s32 1, %s2800_s23   ;;  %s2800_s23 = sphi %s3272_s23, %s462_s23   ;;  %s2796_s22 = sphi %s3270_s22, %s4412_s22   ;;  %s2792_s21 = sphi %s4409_s21, %s4411_s21   ;;  %s2788_s19 = sphi %s4408_s19, %s4410_s19  }
  0x71   : >> { %v472_v34 = vld [vmem:[%s2792_s21 + $0x1c] sm:$0xff]  ;;  %469 = vst [vmem:[%s2788_s19] sm:$0xff] %v468_v32  ;;  %471 = vst [vmem:[%s2788_s19 + $0x8] sm:$0xff] %v470_v33  ;;  %v474_v35 = vld [vmem:[%s2792_s21 + $0x24] sm:$0xff]  ;;  %p597_p6 = scmp.ge.s32.totalorder %s596_s24, %s3261_s20  ;;  %p461_p7 = scmp.ge.s32.totalorder %s462_s23, %s3261_s20 }
  0x72   : >> { %473 = vst [vmem:[%s2788_s19 + $0x10] sm:$0xff] %v472_v34  ;;  %v478_v37 = vld [vmem:[%s2792_s21 + $0x40] sm:$0xff]  ;;  %475 = vst [vmem:[%s2788_s19 + $0x18] sm:$0xff] %v474_v35  ;;  %v480_v38 = vld [vmem:[%s2792_s21 + $0x54] sm:$0xff] }
  0x73   : >> { %477 = vst [vmem:[%s2788_s19 + $0x20] sm:$0xff] %v476_v36  ;;  %479 = vst [vmem:[%s2788_s19 + $0x28] sm:$0xff] %v478_v37  ;;  %v482_v39 = vld [vmem:[%s2792_s21 + $0x5c] sm:$0xff]  ;;  %v484_v40 = vld [vmem:[%s2792_s21 + $0x70] sm:$0xff]  ;;  %s4441_s24 = smov (%p597_p6, %s596_s24), 0 }
  0x74   : >> { %481 = vst [vmem:[%s2788_s19 + $0x30] sm:$0xff] %v480_v38  ;;  %483 = vst [vmem:[%s2788_s19 + $0x38] sm:$0xff] %v482_v39  ;;  %v486_v41 = vld [vmem:[%s2792_s21 + $0x78] sm:$0xff]  ;;  %v488_v42 = vld [vmem:[%s2792_s21 + $0x8c] sm:$0xff]  ;;  %s2077_s26 = sshll.u32 %s4441_s24, 4  ;;  %s4412_s22 = smov %s4441_s24 }
  0x75   : >> { %485 = vst [vmem:[%s2788_s19 + $0x40] sm:$0xff] %v484_v40  ;;  %v490_v43 = vld [vmem:[%s2792_s21 + $0x94] sm:$0xff]  ;;  %487 = vst [vmem:[%s2788_s19 + $0x48] sm:$0xff] %v486_v41  ;;  %v492_v44 = vld [vmem:[%s2792_s21 + $0xa8] sm:$0xff]  ;;  %s3328_s4 = scalar_lea.vmem %s2943_s25, %s2077_s26   ;;  %s3331_s5 = scalar_lea.vmem %s2947_s28, %s2077_s26 [#allocation2]  }
  0x76   : >> { %489 = vst [vmem:[%s2788_s19 + $0x50] sm:$0xff] %v488_v42  ;;  %491 = vst [vmem:[%s2788_s19 + $0x58] sm:$0xff] %v490_v43  ;;  %v494_v45 = vld [vmem:[%s2792_s21 + $0xb0] sm:$0xff]  ;;  %v496_v46 = vld [vmem:[%s2792_s21 + $0xc4] sm:$0xff] }
  0x77   : >> { %493 = vst [vmem:[%s2788_s19 + $0x60] sm:$0xff] %v492_v44  ;;  %495 = vst [vmem:[%s2788_s19 + $0x68] sm:$0xff] %v494_v45  ;;  %v498_v47 = vld [vmem:[%s2792_s21 + $0xcc] sm:$0xff]  ;;  %v500_v48 = vld [vmem:[%s2792_s21 + $0xe0] sm:$0xff] }
  0x78   : >> { %497 = vst [vmem:[%s2788_s19 + $0x70] sm:$0xff] %v496_v46  ;;  %v502_v49 = vld [vmem:[%s2792_s21 + $0xe8] sm:$0xff]  ;;  %499 = vst [vmem:[%s2788_s19 + $0x78] sm:$0xff] %v498_v47  ;;  %v504_v50 = vld [vmem:[%s2792_s21 + $0xfc] sm:$0xff] }
  0x79   : >> { %501 = vst [vmem:[%s2788_s19 + $0x80] sm:$0xff] %v500_v48  ;;  %503 = vst [vmem:[%s2788_s19 + $0x88] sm:$0xff] %v502_v49  ;;  %v506_v51 = vld [vmem:[%s2792_s21 + $0x104] sm:$0xff]  ;;  %v508_v52 = vld [vmem:[%s2792_s21 + $0x118] sm:$0xff] }
  0x7a   : >> { %505 = vst [vmem:[%s2788_s19 + $0x90] sm:$0xff] %v504_v50  ;;  %507 = vst [vmem:[%s2788_s19 + $0x98] sm:$0xff] %v506_v51  ;;  %v510_v53 = vld [vmem:[%s2792_s21 + $0x120] sm:$0xff]  ;;  %v512_v54 = vld [vmem:[%s2792_s21 + $0x134] sm:$0xff] }
  0x7b   : >> { %509 = vst [vmem:[%s2788_s19 + $0xa0] sm:$0xff] %v508_v52  ;;  %v514_v55 = vld [vmem:[%s2792_s21 + $0x13c] sm:$0xff]  ;;  %511 = vst [vmem:[%s2788_s19 + $0xa8] sm:$0xff] %v510_v53  ;;  %v516_v56 = vld [vmem:[%s2792_s21 + $0x150] sm:$0xff] }
  0x7c   : >> { %513 = vst [vmem:[%s2788_s19 + $0xb0] sm:$0xff] %v512_v54  ;;  %515 = vst [vmem:[%s2788_s19 + $0xb8] sm:$0xff] %v514_v55  ;;  %v518_v57 = vld [vmem:[%s2792_s21 + $0x158] sm:$0xff]  ;;  %v520_v58 = vld [vmem:[%s2792_s21 + $0x16c] sm:$0xff] }
  0x7d   : >> { %517 = vst [vmem:[%s2788_s19 + $0xc0] sm:$0xff] %v516_v56  ;;  %519 = vst [vmem:[%s2788_s19 + $0xc8] sm:$0xff] %v518_v57  ;;  %v522_v59 = vld [vmem:[%s2792_s21 + $0x174] sm:$0xff]  ;;  %v524_v60 = vld [vmem:[%s2792_s21 + $0x188] sm:$0xff] }
  0x7e   : >> { %521 = vst [vmem:[%s2788_s19 + $0xd0] sm:$0xff] %v520_v58  ;;  %v526_v61 = vld [vmem:[%s2792_s21 + $0x190] sm:$0xff]  ;;  %523 = vst [vmem:[%s2788_s19 + $0xd8] sm:$0xff] %v522_v59  ;;  %v528_v62 = vld [vmem:[%s2792_s21 + $0x1a4] sm:$0xff] }
  0x7f   : >> { %525 = vst [vmem:[%s2788_s19 + $0xe0] sm:$0xff] %v524_v60  ;;  %527 = vst [vmem:[%s2788_s19 + $0xe8] sm:$0xff] %v526_v61  ;;  %v530_v63 = vld [vmem:[%s2792_s21 + $0x1ac] sm:$0xff]  ;;  %v532_v0 = vld [vmem:[%s2792_s21 + $0x1c0] sm:$0xff] }
  0x80   : >> { %529 = vst [vmem:[%s2788_s19 + $0xf0] sm:$0xff] %v528_v62  ;;  %531 = vst [vmem:[%s2788_s19 + $0xf8] sm:$0xff] %v530_v63  ;;  %v534_v1 = vld [vmem:[%s2792_s21 + $0x1c8] sm:$0xff]  ;;  %v536_v2 = vld [vmem:[%s2792_s21 + $0x1dc] sm:$0xff] }
  0x81   : >> { %533 = vst [vmem:[%s2788_s19 + $0x100] sm:$0xff] %v532_v0  ;;  %v538_v3 = vld [vmem:[%s2792_s21 + $0x1e4] sm:$0xff]  ;;  %535 = vst [vmem:[%s2788_s19 + $0x108] sm:$0xff] %v534_v1  ;;  %v540_v4 = vld [vmem:[%s2792_s21 + $0x1f8] sm:$0xff] }
  0x82   : >> { %537 = vst [vmem:[%s2788_s19 + $0x110] sm:$0xff] %v536_v2  ;;  %539 = vst [vmem:[%s2788_s19 + $0x118] sm:$0xff] %v538_v3  ;;  %v542_v5 = vld [vmem:[%s2792_s21 + $0x200] sm:$0xff]  ;;  %v544_v6 = vld [vmem:[%s2792_s21 + $0x214] sm:$0xff] }
  0x83   : >> { %541 = vst [vmem:[%s2788_s19 + $0x120] sm:$0xff] %v540_v4  ;;  %543 = vst [vmem:[%s2788_s19 + $0x128] sm:$0xff] %v542_v5  ;;  %v546_v7 = vld [vmem:[%s2792_s21 + $0x21c] sm:$0xff]  ;;  %v548_v8 = vld [vmem:[%s2792_s21 + $0x230] sm:$0xff] }
  0x84   : >> { %545 = vst [vmem:[%s2788_s19 + $0x130] sm:$0xff] %v544_v6  ;;  %v550_v9 = vld [vmem:[%s2792_s21 + $0x238] sm:$0xff]  ;;  %547 = vst [vmem:[%s2788_s19 + $0x138] sm:$0xff] %v546_v7  ;;  %v552_v10 = vld [vmem:[%s2792_s21 + $0x24c] sm:$0xff] }
  0x85   : >> { %549 = vst [vmem:[%s2788_s19 + $0x140] sm:$0xff] %v548_v8  ;;  %551 = vst [vmem:[%s2788_s19 + $0x148] sm:$0xff] %v550_v9  ;;  %v554_v11 = vld [vmem:[%s2792_s21 + $0x254] sm:$0xff]  ;;  %v556_v12 = vld [vmem:[%s2792_s21 + $0x268] sm:$0xff] }
  0x86   : >> { %553 = vst [vmem:[%s2788_s19 + $0x150] sm:$0xff] %v552_v10  ;;  %555 = vst [vmem:[%s2788_s19 + $0x158] sm:$0xff] %v554_v11  ;;  %v558_v13 = vld [vmem:[%s2792_s21 + $0x270] sm:$0xff]  ;;  %v560_v14 = vld [vmem:[%s2792_s21 + $0x284] sm:$0xff] }
  0x87   : >> { %557 = vst [vmem:[%s2788_s19 + $0x160] sm:$0xff] %v556_v12  ;;  %v562_v15 = vld [vmem:[%s2792_s21 + $0x28c] sm:$0xff]  ;;  %559 = vst [vmem:[%s2788_s19 + $0x168] sm:$0xff] %v558_v13  ;;  %v564_v16 = vld [vmem:[%s2792_s21 + $0x2a0] sm:$0xff] }
  0x88   : >> { %561 = vst [vmem:[%s2788_s19 + $0x170] sm:$0xff] %v560_v14  ;;  %563 = vst [vmem:[%s2788_s19 + $0x178] sm:$0xff] %v562_v15  ;;  %v566_v17 = vld [vmem:[%s2792_s21 + $0x2a8] sm:$0xff]  ;;  %v568_v18 = vld [vmem:[%s2792_s21 + $0x2bc] sm:$0xff] }
  0x89   : >> { %565 = vst [vmem:[%s2788_s19 + $0x180] sm:$0xff] %v564_v16  ;;  %567 = vst [vmem:[%s2788_s19 + $0x188] sm:$0xff] %v566_v17  ;;  %v570_v19 = vld [vmem:[%s2792_s21 + $0x2c4] sm:$0xff]  ;;  %v572_v20 = vld [vmem:[%s2792_s21 + $0x2d8] sm:$0xff] }
  0x8a   : >> { %569 = vst [vmem:[%s2788_s19 + $0x190] sm:$0xff] %v568_v18  ;;  %v574_v21 = vld [vmem:[%s2792_s21 + $0x2e0] sm:$0xff]  ;;  %571 = vst [vmem:[%s2788_s19 + $0x198] sm:$0xff] %v570_v19  ;;  %v576_v22 = vld [vmem:[%s2792_s21 + $0x2f4] sm:$0xff] }
  0x8b   : >> { %573 = vst [vmem:[%s2788_s19 + $0x1a0] sm:$0xff] %v572_v20  ;;  %575 = vst [vmem:[%s2788_s19 + $0x1a8] sm:$0xff] %v574_v21  ;;  %v578_v23 = vld [vmem:[%s2792_s21 + $0x2fc] sm:$0xff]  ;;  %v580_v24 = vld [vmem:[%s2792_s21 + $0x310] sm:$0xff] }
  0x8c   : >> { %577 = vst [vmem:[%s2788_s19 + $0x1b0] sm:$0xff] %v576_v22  ;;  %579 = vst [vmem:[%s2788_s19 + $0x1b8] sm:$0xff] %v578_v23  ;;  %v582_v25 = vld [vmem:[%s2792_s21 + $0x318] sm:$0xff]  ;;  %v584_v26 = vld [vmem:[%s2792_s21 + $0x32c] sm:$0xff]  ;;  %464 = sbr.rel (!%p461_p7) target bundleno = 112 (0x70), region = 253 }
  0x8d   : >> { %581 = vst [vmem:[%s2788_s19 + $0x1c0] sm:$0xff] %v580_v24  ;;  %v586_v27 = vld [vmem:[%s2792_s21 + $0x334] sm:$0xff]  ;;  %583 = vst [vmem:[%s2788_s19 + $0x1c8] sm:$0xff] %v582_v25  ;;  %v588_v28 = vld [vmem:[%s2792_s21 + $0x348] sm:$0xff] }
  0x8e   : >> { %585 = vst [vmem:[%s2788_s19 + $0x1d0] sm:$0xff] %v584_v26  ;;  %587 = vst [vmem:[%s2788_s19 + $0x1d8] sm:$0xff] %v586_v27  ;;  %v590_v29 = vld [vmem:[%s2792_s21 + $0x350] sm:$0xff]  ;;  %v592_v30 = vld [vmem:[%s2792_s21 + $0x364] sm:$0xff] }
  0x8f   : >> { %589 = vst [vmem:[%s2788_s19 + $0x1e0] sm:$0xff] %v588_v28  ;;  %591 = vst [vmem:[%s2788_s19 + $0x1e8] sm:$0xff] %v590_v29  ;;  %v594_v31 = vld [vmem:[%s2792_s21 + $0x36c] sm:$0xff]  ;;  %s4411_s21 = smov %s3328_s4 }
  0x90   : >> { %593 = vst [vmem:[%s2788_s19 + $0x1f0] sm:$0xff] %v592_v30  ;;  %595 = vst [vmem:[%s2788_s19 + $0x1f8] sm:$0xff] %v594_v31  ;;  %s4410_s19 = smov %s3331_s5 }
  0x91 PF: > { %s3437_s30 = sand.u32 1, %s455_s14   ;;  %s2201_s3 = sshll.u32 %s3261_s20, 8 }
  0x92   : > { %s607_s6 = sshra.s32 %s2201_s3, 4  ;;  %p2082_p8 = scmp.le.s32.totalorder %s3437_s30, 0 }
  0x93   : > { %s3441_s7 = scalar_lea.vmem %s2943_s25, %s607_s6   ;;  %s3444_s8 = scalar_lea.vmem %s2947_s28, %s607_s6 [#allocation2]  }
  0x94   : > { %1970 = sbr.rel (%p2082_p8) target bundleno = 170 (0xaa), region = 258  ;;  %s4413_s19 = smov (!%p2082_p8), %s3444_s8 }
  0x95   : > { %s4414_s21 = smov (!%p2082_p8), %s3441_s7  ;;  %s3453_s22 = smov (!%p2082_p8), 0  }
  0x96   : > { %s3455_s23 = smov (!%p2082_p8), 0  }
  0x99 LB: >> { %v623_v32 = vld [vmem:[%s2808_s21] sm:$0xff]  ;;  %v627_v34 = vld [vmem:[%s2808_s21 + $0x38] sm:$0xff]  ;;  %s687_s14 = sadd.s32 1, %s2812_s22  ;;  %v631_v36 = vld [vmem:[%s2808_s21 + $0x70] sm:$0xff]  ;;  %s617_s23 = sadd.s32 1, %s2816_s23   ;;  %s2816_s23 = sphi %s3455_s23, %s617_s23   ;;  %s2812_s22 = sphi %s3453_s22, %s4417_s22   ;;  %s2808_s21 = sphi %s4414_s21, %s4416_s21   ;;  %s2804_s19 = sphi %s4413_s19, %s4415_s19  }
  0x9a   : >> { %v625_v33 = vld [vmem:[%s2808_s21 + $0x1c] sm:$0xff]  ;;  %624 = vst [vmem:[%s2804_s19] sm:$0xff] %v623_v32  ;;  %628 = vst [vmem:[%s2804_s19 + $0x20] sm:$0xff] %v627_v34  ;;  %v629_v35 = vld [vmem:[%s2808_s21 + $0x54] sm:$0xff]  ;;  %p688_p9 = scmp.ge.s32.totalorder %s687_s14, %s3437_s30  ;;  %p616_p10 = scmp.ge.s32.totalorder %s617_s23, %s3437_s30 }
  0x9b   : >> { %626 = vst [vmem:[%s2804_s19 + $0x10] sm:$0xff] %v625_v33  ;;  %v633_v37 = vld [vmem:[%s2808_s21 + $0x8c] sm:$0xff]  ;;  %630 = vst [vmem:[%s2804_s19 + $0x30] sm:$0xff] %v629_v35  ;;  %v637_v39 = vld [vmem:[%s2808_s21 + $0xc4] sm:$0xff] }
  0x9c   : >> { %632 = vst [vmem:[%s2804_s19 + $0x40] sm:$0xff] %v631_v36  ;;  %634 = vst [vmem:[%s2804_s19 + $0x50] sm:$0xff] %v633_v37  ;;  %v635_v38 = vld [vmem:[%s2808_s21 + $0xa8] sm:$0xff]  ;;  %v639_v40 = vld [vmem:[%s2808_s21 + $0xe0] sm:$0xff]  ;;  %s4443_s14 = smov (%p688_p9, %s687_s14), 0 }
  0x9d   : >> { %636 = vst [vmem:[%s2804_s19 + $0x60] sm:$0xff] %v635_v38  ;;  %638 = vst [vmem:[%s2804_s19 + $0x70] sm:$0xff] %v637_v39  ;;  %v641_v41 = vld [vmem:[%s2808_s21 + $0xfc] sm:$0xff]  ;;  %v645_v43 = vld [vmem:[%s2808_s21 + $0x134] sm:$0xff]  ;;  %s2083_s20 = sshll.u32 %s4443_s14, 3  ;;  %s4417_s22 = smov %s4443_s14 }
  0x9e   : >> { %640 = vst [vmem:[%s2804_s19 + $0x80] sm:$0xff] %v639_v40  ;;  %v643_v42 = vld [vmem:[%s2808_s21 + $0x118] sm:$0xff]  ;;  %642 = vst [vmem:[%s2804_s19 + $0x90] sm:$0xff] %v641_v41  ;;  %v647_v44 = vld [vmem:[%s2808_s21 + $0x150] sm:$0xff]  ;;  %s3511_s24 = scalar_lea.vmem %s3441_s7, %s2083_s20   ;;  %s693_s26 = scalar_lea.vmem %s3444_s8, %s2083_s20 [#allocation2]  }
  0x9f   : >> { %644 = vst [vmem:[%s2804_s19 + $0xa0] sm:$0xff] %v643_v42  ;;  %646 = vst [vmem:[%s2804_s19 + $0xb0] sm:$0xff] %v645_v43  ;;  %v649_v45 = vld [vmem:[%s2808_s21 + $0x16c] sm:$0xff]  ;;  %v653_v47 = vld [vmem:[%s2808_s21 + $0x1a4] sm:$0xff] }
  0xa0   : >> { %v651_v46 = vld [vmem:[%s2808_s21 + $0x188] sm:$0xff]  ;;  %648 = vst [vmem:[%s2804_s19 + $0xc0] sm:$0xff] %v647_v44  ;;  %650 = vst [vmem:[%s2804_s19 + $0xd0] sm:$0xff] %v649_v45  ;;  %v655_v48 = vld [vmem:[%s2808_s21 + $0x1c0] sm:$0xff] }
  0xa1   : >> { %652 = vst [vmem:[%s2804_s19 + $0xe0] sm:$0xff] %v651_v46  ;;  %v657_v49 = vld [vmem:[%s2808_s21 + $0x1dc] sm:$0xff]  ;;  %654 = vst [vmem:[%s2804_s19 + $0xf0] sm:$0xff] %v653_v47  ;;  %v661_v51 = vld [vmem:[%s2808_s21 + $0x214] sm:$0xff] }
  0xa2   : >> { %656 = vst [vmem:[%s2804_s19 + $0x100] sm:$0xff] %v655_v48  ;;  %658 = vst [vmem:[%s2804_s19 + $0x110] sm:$0xff] %v657_v49  ;;  %v659_v50 = vld [vmem:[%s2808_s21 + $0x1f8] sm:$0xff]  ;;  %v663_v52 = vld [vmem:[%s2808_s21 + $0x230] sm:$0xff] }
  0xa3   : >> { %660 = vst [vmem:[%s2804_s19 + $0x120] sm:$0xff] %v659_v50  ;;  %662 = vst [vmem:[%s2804_s19 + $0x130] sm:$0xff] %v661_v51  ;;  %v665_v53 = vld [vmem:[%s2808_s21 + $0x24c] sm:$0xff]  ;;  %v669_v55 = vld [vmem:[%s2808_s21 + $0x284] sm:$0xff] }
  0xa4   : >> { %664 = vst [vmem:[%s2804_s19 + $0x140] sm:$0xff] %v663_v52  ;;  %v667_v54 = vld [vmem:[%s2808_s21 + $0x268] sm:$0xff]  ;;  %666 = vst [vmem:[%s2804_s19 + $0x150] sm:$0xff] %v665_v53  ;;  %v671_v56 = vld [vmem:[%s2808_s21 + $0x2a0] sm:$0xff] }
  0xa5   : >> { %668 = vst [vmem:[%s2804_s19 + $0x160] sm:$0xff] %v667_v54  ;;  %670 = vst [vmem:[%s2804_s19 + $0x170] sm:$0xff] %v669_v55  ;;  %v673_v57 = vld [vmem:[%s2808_s21 + $0x2bc] sm:$0xff]  ;;  %v677_v59 = vld [vmem:[%s2808_s21 + $0x2f4] sm:$0xff]  ;;  %619 = sbr.rel (!%p616_p10) target bundleno = 153 (0x99), region = 264 }
  0xa6   : >> { %v675_v58 = vld [vmem:[%s2808_s21 + $0x2d8] sm:$0xff]  ;;  %672 = vst [vmem:[%s2804_s19 + $0x180] sm:$0xff] %v671_v56  ;;  %674 = vst [vmem:[%s2804_s19 + $0x190] sm:$0xff] %v673_v57  ;;  %v679_v60 = vld [vmem:[%s2808_s21 + $0x310] sm:$0xff] }
  0xa7   : >> { %676 = vst [vmem:[%s2804_s19 + $0x1a0] sm:$0xff] %v675_v58  ;;  %v681_v61 = vld [vmem:[%s2808_s21 + $0x32c] sm:$0xff]  ;;  %678 = vst [vmem:[%s2804_s19 + $0x1b0] sm:$0xff] %v677_v59  ;;  %v685_v63 = vld [vmem:[%s2808_s21 + $0x364] sm:$0xff] }
  0xa8   : >> { %680 = vst [vmem:[%s2804_s19 + $0x1c0] sm:$0xff] %v679_v60  ;;  %682 = vst [vmem:[%s2804_s19 + $0x1d0] sm:$0xff] %v681_v61  ;;  %v683_v62 = vld [vmem:[%s2808_s21 + $0x348] sm:$0xff]  ;;  %s4416_s21 = smov %s3511_s24 }
  0xa9   : >> { %684 = vst [vmem:[%s2804_s19 + $0x1e0] sm:$0xff] %v683_v62  ;;  %686 = vst [vmem:[%s2804_s19 + $0x1f0] sm:$0xff] %v685_v63  ;;  %s4415_s19 = smov %s693_s26 }
  0xaa PF: > { %s2882_s4 = smov 1  }
  0xab   : > { %s694_s5 = sshll.u32 %s2882_s4, %s2951_s29 }
  0xac   : > { %s3552_s3 = sadd.s32 4294967295, %s694_s5 }
  0xad   : > { %v704_v0 = vld [vmem:[%s3254_s15] sm:%s3552_s3]  ;;  %v708_v2 = vld [vmem:[%s3254_s15 + $0x38] sm:%s3552_s3] }
  0xae   : > { %v706_v1 = vld [vmem:[%s3254_s15 + $0x1c] sm:%s3552_s3]  ;;  %705 = vst [vmem:[%s3257_s18] sm:%s3552_s3] %v704_v0 }
  0xaf   : > { %707 = vst [vmem:[%s3257_s18 + $0x10] sm:%s3552_s3] %v706_v1  ;;  %v710_v3 = vld [vmem:[%s3254_s15 + $0x54] sm:%s3552_s3] }
  0xb0   : > { %709 = vst [vmem:[%s3257_s18 + $0x20] sm:%s3552_s3] %v708_v2  ;;  %711 = vst [vmem:[%s3257_s18 + $0x30] sm:%s3552_s3] %v710_v3 }
  0xb1   : > { %v712_v4 = vld [vmem:[%s3254_s15 + $0x70] sm:%s3552_s3]  ;;  %v716_v6 = vld [vmem:[%s3254_s15 + $0xa8] sm:%s3552_s3] }
  0xb2   : > { %v714_v5 = vld [vmem:[%s3254_s15 + $0x8c] sm:%s3552_s3]  ;;  %713 = vst [vmem:[%s3257_s18 + $0x40] sm:%s3552_s3] %v712_v4 }
  0xb3   : > { %715 = vst [vmem:[%s3257_s18 + $0x50] sm:%s3552_s3] %v714_v5  ;;  %v718_v7 = vld [vmem:[%s3254_s15 + $0xc4] sm:%s3552_s3] }
  0xb4   : > { %717 = vst [vmem:[%s3257_s18 + $0x60] sm:%s3552_s3] %v716_v6  ;;  %719 = vst [vmem:[%s3257_s18 + $0x70] sm:%s3552_s3] %v718_v7 }
  0xb5   : > { %v720_v8 = vld [vmem:[%s3254_s15 + $0xe0] sm:%s3552_s3]  ;;  %v724_v10 = vld [vmem:[%s3254_s15 + $0x118] sm:%s3552_s3] }
  0xb6   : > { %v722_v9 = vld [vmem:[%s3254_s15 + $0xfc] sm:%s3552_s3]  ;;  %721 = vst [vmem:[%s3257_s18 + $0x80] sm:%s3552_s3] %v720_v8 }
  0xb7   : > { %723 = vst [vmem:[%s3257_s18 + $0x90] sm:%s3552_s3] %v722_v9  ;;  %v726_v11 = vld [vmem:[%s3254_s15 + $0x134] sm:%s3552_s3] }
  0xb8   : > { %725 = vst [vmem:[%s3257_s18 + $0xa0] sm:%s3552_s3] %v724_v10  ;;  %727 = vst [vmem:[%s3257_s18 + $0xb0] sm:%s3552_s3] %v726_v11 }
  0xb9   : > { %v728_v12 = vld [vmem:[%s3254_s15 + $0x150] sm:%s3552_s3]  ;;  %v732_v14 = vld [vmem:[%s3254_s15 + $0x188] sm:%s3552_s3] }
  0xba   : > { %v730_v13 = vld [vmem:[%s3254_s15 + $0x16c] sm:%s3552_s3]  ;;  %729 = vst [vmem:[%s3257_s18 + $0xc0] sm:%s3552_s3] %v728_v12 }
  0xbb   : > { %731 = vst [vmem:[%s3257_s18 + $0xd0] sm:%s3552_s3] %v730_v13  ;;  %v734_v15 = vld [vmem:[%s3254_s15 + $0x1a4] sm:%s3552_s3] }
  0xbc   : > { %733 = vst [vmem:[%s3257_s18 + $0xe0] sm:%s3552_s3] %v732_v14  ;;  %735 = vst [vmem:[%s3257_s18 + $0xf0] sm:%s3552_s3] %v734_v15 }
  0xbd   : > { %v736_v16 = vld [vmem:[%s3254_s15 + $0x1c0] sm:%s3552_s3]  ;;  %v740_v18 = vld [vmem:[%s3254_s15 + $0x1f8] sm:%s3552_s3] }
  0xbe   : > { %v738_v17 = vld [vmem:[%s3254_s15 + $0x1dc] sm:%s3552_s3]  ;;  %737 = vst [vmem:[%s3257_s18 + $0x100] sm:%s3552_s3] %v736_v16 }
  0xbf   : > { %739 = vst [vmem:[%s3257_s18 + $0x110] sm:%s3552_s3] %v738_v17  ;;  %v742_v19 = vld [vmem:[%s3254_s15 + $0x214] sm:%s3552_s3] }
  0xc0   : > { %741 = vst [vmem:[%s3257_s18 + $0x120] sm:%s3552_s3] %v740_v18  ;;  %743 = vst [vmem:[%s3257_s18 + $0x130] sm:%s3552_s3] %v742_v19 }
  0xc1   : > { %v744_v20 = vld [vmem:[%s3254_s15 + $0x230] sm:%s3552_s3]  ;;  %v748_v22 = vld [vmem:[%s3254_s15 + $0x268] sm:%s3552_s3] }
  0xc2   : > { %v746_v21 = vld [vmem:[%s3254_s15 + $0x24c] sm:%s3552_s3]  ;;  %745 = vst [vmem:[%s3257_s18 + $0x140] sm:%s3552_s3] %v744_v20 }
  0xc3   : > { %747 = vst [vmem:[%s3257_s18 + $0x150] sm:%s3552_s3] %v746_v21  ;;  %v750_v23 = vld [vmem:[%s3254_s15 + $0x284] sm:%s3552_s3] }
  0xc4   : > { %749 = vst [vmem:[%s3257_s18 + $0x160] sm:%s3552_s3] %v748_v22  ;;  %751 = vst [vmem:[%s3257_s18 + $0x170] sm:%s3552_s3] %v750_v23 }
  0xc5   : > { %v752_v24 = vld [vmem:[%s3254_s15 + $0x2a0] sm:%s3552_s3]  ;;  %v756_v26 = vld [vmem:[%s3254_s15 + $0x2d8] sm:%s3552_s3] }
  0xc6   : > { %v754_v25 = vld [vmem:[%s3254_s15 + $0x2bc] sm:%s3552_s3]  ;;  %753 = vst [vmem:[%s3257_s18 + $0x180] sm:%s3552_s3] %v752_v24 }
  0xc7   : > { %755 = vst [vmem:[%s3257_s18 + $0x190] sm:%s3552_s3] %v754_v25  ;;  %v758_v27 = vld [vmem:[%s3254_s15 + $0x2f4] sm:%s3552_s3] }
  0xc8   : > { %757 = vst [vmem:[%s3257_s18 + $0x1a0] sm:%s3552_s3] %v756_v26  ;;  %759 = vst [vmem:[%s3257_s18 + $0x1b0] sm:%s3552_s3] %v758_v27 }
  0xc9   : > { %v760_v28 = vld [vmem:[%s3254_s15 + $0x310] sm:%s3552_s3]  ;;  %v764_v30 = vld [vmem:[%s3254_s15 + $0x348] sm:%s3552_s3] }
  0xca   : > { %v762_v29 = vld [vmem:[%s3254_s15 + $0x32c] sm:%s3552_s3]  ;;  %761 = vst [vmem:[%s3257_s18 + $0x1c0] sm:%s3552_s3] %v760_v28 }
  0xcb   : > { %763 = vst [vmem:[%s3257_s18 + $0x1d0] sm:%s3552_s3] %v762_v29  ;;  %v766_v31 = vld [vmem:[%s3254_s15 + $0x364] sm:%s3552_s3] }
  0xcc   : > { %765 = vst [vmem:[%s3257_s18 + $0x1e0] sm:%s3552_s3] %v764_v30  ;;  %767 = vst [vmem:[%s3257_s18 + $0x1f0] sm:%s3552_s3] %v766_v31 }
  0xcd PF: > { %p2086_p11 = scmp.ge.u32.totalorder %s2945_s27, 8 }
  0xce   : > { %s2883_s29 = smov (!%p2086_p11), 1  }
  0xcf   : > { %128 = sbr.rel (%p2086_p11) target bundleno = 244 (0xf4), region = 36  ;;  %s129_s15 = sshll.u32 (!%p2086_p11), %s2883_s29, %s2945_s27 }
  0xd0   : > { %s3684_s18 = sadd.s32 (!%p2086_p11), 4294967295, %s129_s15 }
  0xd4   : > { %v139_v32 = vld [vmem:[%s2943_s25] sm:%s3684_s18]  ;;  %v143_v34 = vld [vmem:[%s2943_s25 + $0x38] sm:%s3684_s18] }
  0xd5   : > { %v141_v33 = vld [vmem:[%s2943_s25 + $0x1c] sm:%s3684_s18]  ;;  %140 = vst [vmem:[%s2947_s28] sm:%s3684_s18] %v139_v32 }
  0xd6   : > { %142 = vst [vmem:[%s2947_s28 + $0x10] sm:%s3684_s18] %v141_v33  ;;  %v145_v35 = vld [vmem:[%s2943_s25 + $0x54] sm:%s3684_s18] }
  0xd7   : > { %144 = vst [vmem:[%s2947_s28 + $0x20] sm:%s3684_s18] %v143_v34  ;;  %146 = vst [vmem:[%s2947_s28 + $0x30] sm:%s3684_s18] %v145_v35 }
  0xd8   : > { %v147_v36 = vld [vmem:[%s2943_s25 + $0x70] sm:%s3684_s18]  ;;  %v151_v38 = vld [vmem:[%s2943_s25 + $0xa8] sm:%s3684_s18] }
  0xd9   : > { %v149_v37 = vld [vmem:[%s2943_s25 + $0x8c] sm:%s3684_s18]  ;;  %148 = vst [vmem:[%s2947_s28 + $0x40] sm:%s3684_s18] %v147_v36 }
  0xda   : > { %150 = vst [vmem:[%s2947_s28 + $0x50] sm:%s3684_s18] %v149_v37  ;;  %v153_v39 = vld [vmem:[%s2943_s25 + $0xc4] sm:%s3684_s18] }
  0xdb   : > { %152 = vst [vmem:[%s2947_s28 + $0x60] sm:%s3684_s18] %v151_v38  ;;  %154 = vst [vmem:[%s2947_s28 + $0x70] sm:%s3684_s18] %v153_v39 }
  0xdc   : > { %v155_v40 = vld [vmem:[%s2943_s25 + $0xe0] sm:%s3684_s18]  ;;  %v159_v42 = vld [vmem:[%s2943_s25 + $0x118] sm:%s3684_s18] }
  0xdd   : > { %v157_v41 = vld [vmem:[%s2943_s25 + $0xfc] sm:%s3684_s18]  ;;  %156 = vst [vmem:[%s2947_s28 + $0x80] sm:%s3684_s18] %v155_v40 }
  0xde   : > { %158 = vst [vmem:[%s2947_s28 + $0x90] sm:%s3684_s18] %v157_v41  ;;  %v161_v43 = vld [vmem:[%s2943_s25 + $0x134] sm:%s3684_s18] }
  0xdf   : > { %160 = vst [vmem:[%s2947_s28 + $0xa0] sm:%s3684_s18] %v159_v42  ;;  %162 = vst [vmem:[%s2947_s28 + $0xb0] sm:%s3684_s18] %v161_v43 }
  0xe0   : > { %v163_v44 = vld [vmem:[%s2943_s25 + $0x150] sm:%s3684_s18]  ;;  %v167_v46 = vld [vmem:[%s2943_s25 + $0x188] sm:%s3684_s18] }
  0xe1   : > { %v165_v45 = vld [vmem:[%s2943_s25 + $0x16c] sm:%s3684_s18]  ;;  %164 = vst [vmem:[%s2947_s28 + $0xc0] sm:%s3684_s18] %v163_v44 }
  0xe2   : > { %166 = vst [vmem:[%s2947_s28 + $0xd0] sm:%s3684_s18] %v165_v45  ;;  %v169_v47 = vld [vmem:[%s2943_s25 + $0x1a4] sm:%s3684_s18] }
  0xe3   : > { %168 = vst [vmem:[%s2947_s28 + $0xe0] sm:%s3684_s18] %v167_v46  ;;  %170 = vst [vmem:[%s2947_s28 + $0xf0] sm:%s3684_s18] %v169_v47 }
  0xe4   : > { %v171_v48 = vld [vmem:[%s2943_s25 + $0x1c0] sm:%s3684_s18]  ;;  %v175_v50 = vld [vmem:[%s2943_s25 + $0x1f8] sm:%s3684_s18] }
  0xe5   : > { %v173_v49 = vld [vmem:[%s2943_s25 + $0x1dc] sm:%s3684_s18]  ;;  %172 = vst [vmem:[%s2947_s28 + $0x100] sm:%s3684_s18] %v171_v48 }
  0xe6   : > { %174 = vst [vmem:[%s2947_s28 + $0x110] sm:%s3684_s18] %v173_v49  ;;  %v177_v51 = vld [vmem:[%s2943_s25 + $0x214] sm:%s3684_s18] }
  0xe7   : > { %176 = vst [vmem:[%s2947_s28 + $0x120] sm:%s3684_s18] %v175_v50  ;;  %178 = vst [vmem:[%s2947_s28 + $0x130] sm:%s3684_s18] %v177_v51 }
  0xe8   : > { %v179_v52 = vld [vmem:[%s2943_s25 + $0x230] sm:%s3684_s18]  ;;  %v183_v54 = vld [vmem:[%s2943_s25 + $0x268] sm:%s3684_s18] }
  0xe9   : > { %v181_v53 = vld [vmem:[%s2943_s25 + $0x24c] sm:%s3684_s18]  ;;  %180 = vst [vmem:[%s2947_s28 + $0x140] sm:%s3684_s18] %v179_v52 }
  0xea   : > { %182 = vst [vmem:[%s2947_s28 + $0x150] sm:%s3684_s18] %v181_v53  ;;  %v185_v55 = vld [vmem:[%s2943_s25 + $0x284] sm:%s3684_s18] }
  0xeb   : > { %184 = vst [vmem:[%s2947_s28 + $0x160] sm:%s3684_s18] %v183_v54  ;;  %186 = vst [vmem:[%s2947_s28 + $0x170] sm:%s3684_s18] %v185_v55 }
  0xec   : > { %v187_v56 = vld [vmem:[%s2943_s25 + $0x2a0] sm:%s3684_s18]  ;;  %v191_v58 = vld [vmem:[%s2943_s25 + $0x2d8] sm:%s3684_s18] }
  0xed   : > { %v189_v57 = vld [vmem:[%s2943_s25 + $0x2bc] sm:%s3684_s18]  ;;  %188 = vst [vmem:[%s2947_s28 + $0x180] sm:%s3684_s18] %v187_v56 }
  0xee   : > { %190 = vst [vmem:[%s2947_s28 + $0x190] sm:%s3684_s18] %v189_v57  ;;  %v193_v59 = vld [vmem:[%s2943_s25 + $0x2f4] sm:%s3684_s18] }
  0xef   : > { %192 = vst [vmem:[%s2947_s28 + $0x1a0] sm:%s3684_s18] %v191_v58  ;;  %194 = vst [vmem:[%s2947_s28 + $0x1b0] sm:%s3684_s18] %v193_v59 }
  0xf0   : > { %v195_v60 = vld [vmem:[%s2943_s25 + $0x310] sm:%s3684_s18]  ;;  %v199_v62 = vld [vmem:[%s2943_s25 + $0x348] sm:%s3684_s18] }
  0xf1   : > { %v197_v61 = vld [vmem:[%s2943_s25 + $0x32c] sm:%s3684_s18]  ;;  %196 = vst [vmem:[%s2947_s28 + $0x1c0] sm:%s3684_s18] %v195_v60 }
  0xf2   : > { %198 = vst [vmem:[%s2947_s28 + $0x1d0] sm:%s3684_s18] %v197_v61  ;;  %v201_v63 = vld [vmem:[%s2943_s25 + $0x364] sm:%s3684_s18] }
  0xf3   : > { %200 = vst [vmem:[%s2947_s28 + $0x1e0] sm:%s3684_s18] %v199_v62  ;;  %202 = vst [vmem:[%s2947_s28 + $0x1f0] sm:%s3684_s18] %v201_v63 }
  0xf4 PF: > { %p2088_p12 = scmp.ge.s32.totalorder %s2752_s11, 1  ;;  %p770_p13 = scmp.lt.s32.totalorder %s2752_s11, 3 }
  0xf6   : > { %p771_p0 = pnand %p2088_p12, %p770_p13 }
  0xf7   : > { %s777_s27 = sand.u32 (!%p771_p0), 1, %s2744_s9  }
  0xf8   : > { %774 = sbr.rel (%p771_p0) target bundleno = 681 (0x2a9), region = 90  ;;  %s2089_s30 = sshll.u32 (!%p771_p0), %s777_s27, 9 }
  0xf9   : > { %s3822_s25 = scalar_lea.vmem (!%p771_p0), [#allocation2], %s2089_s30  ;;  %s2090_s23 = sshll.u32 (!%p771_p0), %s777_s27, 6 }
  0xfa   : > { %s3899_s14 = scalar_lea.vmem (!%p771_p0), [#allocation3], %s2090_s23  }
  0xfd   : > { %v2598_v0 = vld [vmem:[%s4394_s0 + $0x4] ss:$8 sps:$4 sm:$0xff]   ;;  %v2504_v3 = vld [vmem:[%s3822_s25 + $0xe0] ss:$16 sps:$4 sm:$0xff]   ;;  %v2505_v4 = vld [vmem:[%s3822_s25 + $0xe8] ss:$16 sps:$4 sm:$0xff]  }
  0xfe   : > { %v2500_v1 = vld [vmem:[%s3822_s25 + $0xe4] ss:$16 sps:$4 sm:$0xff]   ;;  %1247 = vmatprep.mubr.bf16.mxu0 %v2598_v0  ;;  %1300 = vmatprep.mubr.bf16.mxu1 %v2598_v0  ;;  %v2502_v2 = vld [vmem:[%s3822_s25 + $0xec] ss:$16 sps:$4 sm:$0xff]   ;;  %v2510_v7 = vld [vmem:[%s3822_s25 + $0xc0] ss:$16 sps:$4 sm:$0xff]  }
  0xff   : > { %1215 = vmatprep.subr.bf16.mxu0 %v2500_v1  ;;  %1268 = vmatprep.subr.bf16.mxu1 %v2502_v2  ;;  %v2506_v5 = vld [vmem:[%s3822_s25 + $0xc4] ss:$16 sps:$4 sm:$0xff]   ;;  %v2508_v6 = vld [vmem:[%s3822_s25 + $0xcc] ss:$16 sps:$4 sm:$0xff]   ;;  %v2511_v8 = vld [vmem:[%s3822_s25 + $0xc8] ss:$16 sps:$4 sm:$0xff]  }
 0x100   : > { %1216 = vmatpush1.bf16.msra.mxu0 %v2504_v3  ;;  %1269 = vmatpush1.bf16.msra.mxu1 %v2505_v4  ;;  %v2512_v9 = vld [vmem:[%s3822_s25 + $0xa4] ss:$16 sps:$4 sm:$0xff]   ;;  %v2514_v10 = vld [vmem:[%s3822_s25 + $0xac] ss:$16 sps:$4 sm:$0xff]   ;;  %v2516_v11 = vld [vmem:[%s3822_s25 + $0xa0] ss:$16 sps:$4 sm:$0xff]  }
 0x101   : > { %1217 = vmatprep.subr.bf16.mxu0 %v2506_v5  ;;  %1270 = vmatprep.subr.bf16.mxu1 %v2508_v6  ;;  %v2517_v12 = vld [vmem:[%s3822_s25 + $0xa8] ss:$16 sps:$4 sm:$0xff]   ;;  %v2518_v13 = vld [vmem:[%s3822_s25 + $0x84] ss:$16 sps:$4 sm:$0xff]   ;;  %v2520_v14 = vld [vmem:[%s3822_s25 + $0x8c] ss:$16 sps:$4 sm:$0xff]  }
 0x102   : > { %v2522_v15 = vld [vmem:[%s3822_s25 + $0x80] ss:$16 sps:$4 sm:$0xff]   ;;  %v2523_v16 = vld [vmem:[%s3822_s25 + $0x88] ss:$16 sps:$4 sm:$0xff]   ;;  %v2524_v17 = vld [vmem:[%s3822_s25 + $0x64] ss:$16 sps:$4 sm:$0xff]  }
 0x103   : > { %v2526_v18 = vld [vmem:[%s3822_s25 + $0x6c] ss:$16 sps:$4 sm:$0xff]   ;;  %v2528_v19 = vld [vmem:[%s3822_s25 + $0x60] ss:$16 sps:$4 sm:$0xff]   ;;  %v2529_v20 = vld [vmem:[%s3822_s25 + $0x68] ss:$16 sps:$4 sm:$0xff]  }
 0x104   : > { %1218 = vmatpush1.bf16.msra.mxu0 %v2510_v7  ;;  %1271 = vmatpush1.bf16.msra.mxu1 %v2511_v8  ;;  %v2530_v21 = vld [vmem:[%s3822_s25 + $0x44] ss:$16 sps:$4 sm:$0xff]   ;;  %v2532_v22 = vld [vmem:[%s3822_s25 + $0x4c] ss:$16 sps:$4 sm:$0xff]   ;;  %v2534_v23 = vld [vmem:[%s3822_s25 + $0x40] ss:$16 sps:$4 sm:$0xff]  }
 0x105   : > { %1219 = vmatprep.subr.bf16.mxu0 %v2512_v9  ;;  %1272 = vmatprep.subr.bf16.mxu1 %v2514_v10  ;;  %v2535_v24 = vld [vmem:[%s3822_s25 + $0x48] ss:$16 sps:$4 sm:$0xff]   ;;  %v2536_v25 = vld [vmem:[%s3822_s25 + $0x24] ss:$16 sps:$4 sm:$0xff]   ;;  %v2538_v26 = vld [vmem:[%s3822_s25 + $0x2c] ss:$16 sps:$4 sm:$0xff]  }
 0x106   : > { %v2540_v27 = vld [vmem:[%s3822_s25 + $0x20] ss:$16 sps:$4 sm:$0xff]   ;;  %v2541_v28 = vld [vmem:[%s3822_s25 + $0x28] ss:$16 sps:$4 sm:$0xff]   ;;  %v2542_v29 = vld [vmem:[%s3822_s25 + $0x4] ss:$16 sps:$4 sm:$0xff]  }
 0x107   : > { %v2544_v30 = vld [vmem:[%s3822_s25 + $0xc] ss:$16 sps:$4 sm:$0xff]   ;;  %v2546_v31 = vld [vmem:[%s3822_s25] ss:$16 sps:$4 sm:$0xff]   ;;  %v2547_v32 = vld [vmem:[%s3822_s25 + $0x8] ss:$16 sps:$4 sm:$0xff]  }
 0x108   : > { %1220 = vmatpush1.bf16.msra.mxu0 %v2516_v11  ;;  %1273 = vmatpush1.bf16.msra.mxu1 %v2517_v12  ;;  %v2548_v33 = vld [vmem:[%s3822_s25 + $0x1e4] ss:$16 sps:$4 sm:$0xff]   ;;  %v2550_v34 = vld [vmem:[%s3822_s25 + $0x1ec] ss:$16 sps:$4 sm:$0xff]   ;;  %v2552_v35 = vld [vmem:[%s3822_s25 + $0x1e0] ss:$16 sps:$4 sm:$0xff]  }
 0x109   : > { %1221 = vmatprep.subr.bf16.mxu0 %v2518_v13  ;;  %1274 = vmatprep.subr.bf16.mxu1 %v2520_v14  ;;  %v2553_v36 = vld [vmem:[%s3822_s25 + $0x1e8] ss:$16 sps:$4 sm:$0xff]   ;;  %v2554_v37 = vld [vmem:[%s3822_s25 + $0x1c4] ss:$16 sps:$4 sm:$0xff]   ;;  %v2556_v38 = vld [vmem:[%s3822_s25 + $0x1cc] ss:$16 sps:$4 sm:$0xff]  }
 0x10a   : > { %v2558_v39 = vld [vmem:[%s3822_s25 + $0x1c0] ss:$16 sps:$4 sm:$0xff]   ;;  %v2559_v40 = vld [vmem:[%s3822_s25 + $0x1c8] ss:$16 sps:$4 sm:$0xff]   ;;  %v2560_v41 = vld [vmem:[%s3822_s25 + $0x1a4] ss:$16 sps:$4 sm:$0xff]  }
 0x10b   : > { %v2562_v42 = vld [vmem:[%s3822_s25 + $0x1ac] ss:$16 sps:$4 sm:$0xff]   ;;  %v2564_v43 = vld [vmem:[%s3822_s25 + $0x1a0] ss:$16 sps:$4 sm:$0xff]   ;;  %v2565_v44 = vld [vmem:[%s3822_s25 + $0x1a8] ss:$16 sps:$4 sm:$0xff]  }
 0x10c   : > { %1222 = vmatpush1.bf16.msra.mxu0 %v2522_v15  ;;  %1275 = vmatpush1.bf16.msra.mxu1 %v2523_v16  ;;  %v2566_v45 = vld [vmem:[%s3822_s25 + $0x184] ss:$16 sps:$4 sm:$0xff]   ;;  %v2568_v46 = vld [vmem:[%s3822_s25 + $0x18c] ss:$16 sps:$4 sm:$0xff]   ;;  %v2570_v47 = vld [vmem:[%s3822_s25 + $0x180] ss:$16 sps:$4 sm:$0xff]  }
 0x10d   : > { %1223 = vmatprep.subr.bf16.mxu0 %v2524_v17  ;;  %1276 = vmatprep.subr.bf16.mxu1 %v2526_v18  ;;  %v2571_v48 = vld [vmem:[%s3822_s25 + $0x188] ss:$16 sps:$4 sm:$0xff]   ;;  %v2572_v49 = vld [vmem:[%s3822_s25 + $0x164] ss:$16 sps:$4 sm:$0xff]   ;;  %v2574_v50 = vld [vmem:[%s3822_s25 + $0x16c] ss:$16 sps:$4 sm:$0xff]  }
 0x10e   : > { %v2576_v51 = vld [vmem:[%s3822_s25 + $0x160] ss:$16 sps:$4 sm:$0xff]   ;;  %v2577_v52 = vld [vmem:[%s3822_s25 + $0x168] ss:$16 sps:$4 sm:$0xff]   ;;  %v2578_v53 = vld [vmem:[%s3822_s25 + $0x144] ss:$16 sps:$4 sm:$0xff]  }
 0x10f   : > { %v2580_v54 = vld [vmem:[%s3822_s25 + $0x14c] ss:$16 sps:$4 sm:$0xff]   ;;  %v2582_v55 = vld [vmem:[%s3822_s25 + $0x140] ss:$16 sps:$4 sm:$0xff]   ;;  %v2583_v56 = vld [vmem:[%s3822_s25 + $0x148] ss:$16 sps:$4 sm:$0xff]  }
 0x110   : > { %1224 = vmatpush1.bf16.msra.mxu0 %v2528_v19  ;;  %1277 = vmatpush1.bf16.msra.mxu1 %v2529_v20  ;;  %v2584_v57 = vld [vmem:[%s3822_s25 + $0x124] ss:$16 sps:$4 sm:$0xff]   ;;  %v2586_v58 = vld [vmem:[%s3822_s25 + $0x12c] ss:$16 sps:$4 sm:$0xff]   ;;  %v2588_v59 = vld [vmem:[%s3822_s25 + $0x120] ss:$16 sps:$4 sm:$0xff]  }
 0x111   : > { %1225 = vmatprep.subr.bf16.mxu0 %v2530_v21  ;;  %1278 = vmatprep.subr.bf16.mxu1 %v2532_v22  ;;  %v2589_v60 = vld [vmem:[%s3822_s25 + $0x128] ss:$16 sps:$4 sm:$0xff]   ;;  %v2590_v61 = vld [vmem:[%s3822_s25 + $0x104] ss:$16 sps:$4 sm:$0xff]   ;;  %v2592_v62 = vld [vmem:[%s3822_s25 + $0x10c] ss:$16 sps:$4 sm:$0xff]  }
 0x112   : > { %v2594_v63 = vld [vmem:[%s3822_s25 + $0x100] ss:$16 sps:$4 sm:$0xff]   ;;  %v2595_v0 = vld [vmem:[%s3822_s25 + $0x108] ss:$16 sps:$4 sm:$0xff]   ;;  %v2599_v2 = vld [vmem:[%s4394_s0 + $0x14] ss:$8 sps:$4 sm:$0xff]  }
 0x113   : > { %v2596_v1 = vld [vmem:[%s4394_s0] ss:$8 sps:$4 sm:$0xff]   ;;  %v2601_v3 = vld [vmem:[%s4394_s0 + $0x10] ss:$8 sps:$4 sm:$0xff]   ;;  %s2168_s9 = sshll.u32 (%p2932_p5), %s2917_s12, 2  ;;  %s2211_s20 = sshll.u32 (%p2932_p5), %s2917_s12, 4 }
 0x114   : > { %1226 = vmatpush1.bf16.msra.mxu0 %v2534_v23  ;;  %1279 = vmatpush1.bf16.msra.mxu1 %v2535_v24  ;;  %s1401_s24 = ssub.s32 (%p2932_p5), 7, %s2168_s9  ;;  %s3916_s5 = scalar_lea.vmem (%p2932_p5), %s4396_s2, %s2211_s20  }
 0x115   : > { %1227 = vmatprep.subr.bf16.mxu0 %v2536_v25  ;;  %1280 = vmatprep.subr.bf16.mxu1 %v2538_v26  ;;  %p1402_p1 = scmp.lt.s32.totalorder (%p2932_p5), %s1401_s24, 4 }
 0x118   : > { %1228 = vmatpush1.bf16.msra.mxu0 %v2540_v27  ;;  %1281 = vmatpush1.bf16.msra.mxu1 %v2541_v28 }
 0x119   : > { %1229 = vmatprep.subr.bf16.mxu0 %v2542_v29  ;;  %1282 = vmatprep.subr.bf16.mxu1 %v2544_v30 }
 0x11c   : > { %1230 = vmatpush1.bf16.msra.mxu0 %v2546_v31  ;;  %1283 = vmatpush1.bf16.msra.mxu1 %v2547_v32 }
 0x11d   : > { %1231 = vmatprep.subr.bf16.mxu0 %v2548_v33  ;;  %1284 = vmatprep.subr.bf16.mxu1 %v2550_v34 }
 0x120   : > { %1232 = vmatpush2.bf16.msra.mxu0 %v2552_v35  ;;  %1285 = vmatpush2.bf16.msra.mxu1 %v2553_v36 }
 0x121   : > { %1233 = vmatprep.subr.bf16.mxu0 %v2554_v37  ;;  %1286 = vmatprep.subr.bf16.mxu1 %v2556_v38 }
 0x124   : > { %1234 = vmatpush2.bf16.msra.mxu0 %v2558_v39  ;;  %1287 = vmatpush2.bf16.msra.mxu1 %v2559_v40 }
 0x125   : > { %1235 = vmatprep.subr.bf16.mxu0 %v2560_v41  ;;  %1288 = vmatprep.subr.bf16.mxu1 %v2562_v42 }
 0x128   : > { %1236 = vmatpush2.bf16.msra.mxu0 %v2564_v43  ;;  %1289 = vmatpush2.bf16.msra.mxu1 %v2565_v44 }
 0x129   : > { %1237 = vmatprep.subr.bf16.mxu0 %v2566_v45  ;;  %1290 = vmatprep.subr.bf16.mxu1 %v2568_v46 }
 0x12c   : > { %1238 = vmatpush2.bf16.msra.mxu0 %v2570_v47  ;;  %1291 = vmatpush2.bf16.msra.mxu1 %v2571_v48 }
 0x12d   : > { %1239 = vmatprep.subr.bf16.mxu0 %v2572_v49  ;;  %1292 = vmatprep.subr.bf16.mxu1 %v2574_v50 }
 0x130   : > { %1240 = vmatpush2.bf16.msra.mxu0 %v2576_v51  ;;  %1293 = vmatpush2.bf16.msra.mxu1 %v2577_v52 }
 0x131   : > { %1241 = vmatprep.subr.bf16.mxu0 %v2578_v53  ;;  %1294 = vmatprep.subr.bf16.mxu1 %v2580_v54 }
 0x134   : > { %1242 = vmatpush2.bf16.msra.mxu0 %v2582_v55  ;;  %1295 = vmatpush2.bf16.msra.mxu1 %v2583_v56 }
 0x135   : > { %1243 = vmatprep.subr.bf16.mxu0 %v2584_v57  ;;  %1296 = vmatprep.subr.bf16.mxu1 %v2586_v58 }
 0x138   : > { %1244 = vmatpush2.bf16.msra.mxu0 %v2588_v59  ;;  %1297 = vmatpush2.bf16.msra.mxu1 %v2589_v60 }
 0x139   : > { %1245 = vmatprep.subr.bf16.mxu0 %v2590_v61  ;;  %1298 = vmatprep.subr.bf16.mxu1 %v2592_v62 }
 0x13c   : > { %1246 = vmatpush2.bf16.msra.mxu0 %v2594_v63  ;;  %1299 = vmatpush2.bf16.msra.mxu1 %v2595_v0 }
 0x13f   : > { %1248 = vmatmul.mubr.bf16.vlgmr.msra.gmra.mxu0 %v2596_v1  ;;  %1301 = vmatmul.mubr.bf16.vlgmr.msra.gmra.mxu1 %v2596_v1 }
 0x140   : > { %1257 = vmatprep.mubr.bf16.mxu0 %v2599_v2  ;;  %1310 = vmatprep.mubr.bf16.mxu1 %v2599_v2 }
 0x147   : > { %1258 = vmatmul.mubr.bf16.gmra.mxu0 %v2601_v3  ;;  %1311 = vmatmul.mubr.bf16.gmra.mxu1 %v2601_v3 }
 0x1ff   : > { %v1249_v4 = vpop.f32.mrf.mxu0  ;;  %v1302_v5 = vpop.f32.mrf.mxu1 }
 0x200   : > { %v1321_v8 = vmax.f32 %v1249_v4, 0.0  ;;  %v1323_v9 = vmax.f32 %v1302_v5, 0.0 }
 0x201   : > { %v1251_v6 = vpop.f32.mrf.mxu0  ;;  %v1304_v7 = vpop.f32.mrf.mxu1 }
 0x202   : > { %v1322_v10 = vmax.f32 %v1251_v6, 0.0  ;;  %v1324_v11 = vmax.f32 %v1304_v7, 0.0 }
 0x203   : > { %v1253_v12 = vpop.f32.mrf.mxu0  ;;  %v1306_v13 = vpop.f32.mrf.mxu1 }
 0x204   : > { %v2203_v14 = vpack.c.bf16 %v1322_v10, %v1321_v8  ;;  %v2204_v15 = vpack.c.bf16 %v1324_v11, %v1323_v9  ;;  %v1325_v18 = vmax.f32 %v1253_v12, 0.0  ;;  %v1327_v19 = vmax.f32 %v1306_v13, 0.0 }
 0x205   : > { %v1255_v16 = vpop.f32.mrf.mxu0  ;;  %v1308_v17 = vpop.f32.mrf.mxu1 }
 0x206   : > { %1385 = vst [vmem:[%s3899_s14] sm:$0xff] %v2203_v14  ;;  %1386 = vst [vmem:[%s3899_s14 + $0x8] sm:$0xff] %v2204_v15  ;;  %v1326_v20 = vmax.f32 %v1255_v16, 0.0  ;;  %v1328_v21 = vmax.f32 %v1308_v17, 0.0 }
 0x207   : > { %v1259_v22 = vpop.f32.mrf.mxu0  ;;  %v1312_v23 = vpop.f32.mrf.mxu1 }
 0x208   : > { %v2205_v24 = vpack.c.bf16 %v1326_v20, %v1325_v18  ;;  %v2206_v25 = vpack.c.bf16 %v1328_v21, %v1327_v19  ;;  %v1329_v28 = vmax.f32 %v1259_v22, 0.0  ;;  %v1331_v29 = vmax.f32 %v1312_v23, 0.0 }
 0x209   : > { %v1261_v26 = vpop.f32.mrf.mxu0  ;;  %v1314_v27 = vpop.f32.mrf.mxu1 }
 0x20a   : > { %1387 = vst [vmem:[%s3899_s14 + $0x10] sm:$0xff] %v2205_v24  ;;  %1388 = vst [vmem:[%s3899_s14 + $0x18] sm:$0xff] %v2206_v25  ;;  %v1330_v30 = vmax.f32 %v1261_v26, 0.0  ;;  %v1332_v31 = vmax.f32 %v1314_v27, 0.0 }
 0x20b   : > { %v1263_v32 = vpop.f32.mrf.mxu0  ;;  %v1316_v33 = vpop.f32.mrf.mxu1 }
 0x20c   : > { %v2207_v34 = vpack.c.bf16 %v1330_v30, %v1329_v28  ;;  %v2208_v35 = vpack.c.bf16 %v1332_v31, %v1331_v29  ;;  %v1333_v38 = vmax.f32 %v1263_v32, 0.0  ;;  %v1335_v39 = vmax.f32 %v1316_v33, 0.0 }
 0x20d   : > { %v1265_v36 = vpop.f32.mrf.mxu0  ;;  %v1318_v37 = vpop.f32.mrf.mxu1 }
 0x20e   : > { %1389 = vst [vmem:[%s3899_s14 + $0x20] sm:$0xff] %v2207_v34  ;;  %1390 = vst [vmem:[%s3899_s14 + $0x28] sm:$0xff] %v2208_v35  ;;  %v1334_v40 = vmax.f32 %v1265_v36, 0.0  ;;  %v1336_v41 = vmax.f32 %v1318_v37, 0.0  ;;  %1399 = sbr.rel (!%p2932_p5) target bundleno = 681 (0x2a9), region = 98 }
 0x210   : > { %v2209_v42 = vpack.c.bf16 %v1334_v40, %v1333_v38  ;;  %v2210_v43 = vpack.c.bf16 %v1336_v41, %v1335_v39 }
 0x212   : > { %1391 = vst [vmem:[%s3899_s14 + $0x30] sm:$0xff] %v2209_v42  ;;  %1392 = vst [vmem:[%s3899_s14 + $0x38] sm:$0xff] %v2210_v43 }
 0x213   : > { %s4445_s24 = smov (!%p1402_p1, %s1401_s24), 4 }
 0x214   : > { %s2169_s3 = sshll.u32 %s4445_s24, 8  ;;  %s3918_s29 = sshll.u32 %s4445_s24, 2 }
 0x215   : > { %p2173_p2 = scmp.eq.s32.totalorder %s2169_s3, 0 }
 0x216   : > { %p1412_p3 = scmp.lt.u32.totalorder (!%p2173_p2), %s3918_s29, 8 }
 0x217   : > { %1411 = sbr.rel (%p2173_p2) target bundleno = 681 (0x2a9), region = 102 }
 0x21c   : > { %1415 = sbr.rel (%p1412_p3) target bundleno = 670 (0x29e), region = 106  ;;  %s3922_s17 = sand.u32 (!%p1412_p3), 7, %s3918_s29  }
 0x21d   : > { %p1438_p5 = scmp.eq.s32.totalorder (!%p1412_p3), %s3922_s17, 0  ;;  %p2174_p4 = scmp.ne.s32.totalorder (!%p1412_p3), %s3922_s17, 0 }
 0x221   : > { %1441 = sbr.rel (%p2174_p4) target bundleno = 604 (0x25c), region = 121  ;;  %s1442_s12 = sshrl.u32 (!%p2174_p4), %s3918_s29, 3 }
 0x222   : > { %s3929_s15 = sshrl.u32 (!%p2174_p4), %s1442_s12, 4 }
 0x223   : > { %p2175_p6 = scmp.le.s32.totalorder (!%p2174_p4), %s3929_s15, 0 }
 0x226   : > { %1984 = sbr.rel (%p2175_p6) target bundleno = 588 (0x24c), region = 269  ;;  %s4418_s18 = smov (!%p2175_p6), %s3916_s5 }
 0x227   : > { %s4419_s27 = smov (!%p2175_p6), %s3899_s14  ;;  %s3938_s30 = smov (!%p2175_p6), 0  }
 0x228   : > { %s3940_s6 = smov (!%p2175_p6), 0  }
 0x22b LB: >> { %v3955_v44 = vld [vmem:[%s2824_s27 + $0x48] sm:$0xff]  ;;  %v3958_v45 = vld [vmem:[%s2824_s27 + $0x50] sm:$0xff]  ;;  %v3961_v46 = vld [vmem:[%s2824_s27 + $0x58] sm:$0xff]  ;;  %s1583_s7 = sadd.s32 1, %s2828_s30  ;;  %s1449_s6 = sadd.s32 1, %s2832_s6   ;;  %s2832_s6 = sphi %s3940_s6, %s1449_s6   ;;  %s2828_s30 = sphi %s3938_s30, %s4421_s30   ;;  %s2824_s27 = sphi %s4419_s27, %s1588_s27   ;;  %s2820_s18 = sphi %s4418_s18, %s1589_s18  }
 0x22c   : >> { %1474 = vst [vmem:[%s2820_s18 + $0x48] sm:$0xff] %v3955_v44  ;;  %1476 = vst [vmem:[%s2820_s18 + $0x50] sm:$0xff] %v3958_v45  ;;  %v3970_v47 = vld [vmem:[%s2824_s27 + $0x60] sm:$0xff]  ;;  %v3973_v48 = vld [vmem:[%s2824_s27 + $0x68] sm:$0xff]  ;;  %p4010_p7 = scmp.ge.s32.totalorder %s1583_s7, %s3929_s15  ;;  %p1448_p8 = scmp.ge.s32.totalorder %s1449_s6, %s3929_s15 }
 0x22d   : >> { %1478 = vst [vmem:[%s2820_s18 + $0x58] sm:$0xff] %v3961_v46  ;;  %v3976_v49 = vld [vmem:[%s2824_s27 + $0x70] sm:$0xff]  ;;  %1480 = vst [vmem:[%s2820_s18 + $0x60] sm:$0xff] %v3970_v47  ;;  %v3985_v50 = vld [vmem:[%s2824_s27 + $0x78] sm:$0xff] }
 0x22e   : >> { %1482 = vst [vmem:[%s2820_s18 + $0x68] sm:$0xff] %v3973_v48  ;;  %1484 = vst [vmem:[%s2820_s18 + $0x70] sm:$0xff] %v3976_v49  ;;  %v1467_v51 = vld [vmem:[%s2824_s27 + $0x30] sm:$0xff]  ;;  %v1469_v52 = vld [vmem:[%s2824_s27 + $0x38] sm:$0xff]  ;;  %s4447_s7 = smov (%p4010_p7, %s1583_s7), 0 }
 0x22f   : >> { %1502 = vst [vmem:[%s2820_s18 + $0x54] sm:$0xff] %v3955_v44  ;;  %1486 = vst [vmem:[%s2820_s18 + $0x78] sm:$0xff] %v3985_v50  ;;  %v1471_v53 = vld [vmem:[%s2824_s27 + $0x40] sm:$0xff]  ;;  %v1517_v55 = vld [vmem:[%s2824_s27 + $0x88] sm:$0xff]  ;;  %s2176_s11 = sshll.u32 %s4447_s7, 7  ;;  %s4421_s30 = smov %s4447_s7 }
 0x230   : >> { %1468 = vst [vmem:[%s2820_s18 + $0x30] sm:$0xff] %v1467_v51  ;;  %1470 = vst [vmem:[%s2820_s18 + $0x38] sm:$0xff] %v1469_v52  ;;  %v1515_v54 = vld [vmem:[%s2824_s27 + $0x80] sm:$0xff]  ;;  %v1461_v56 = vld [vmem:[%s2824_s27 + $0x18] sm:$0xff] }
 0x231   : >> { %1504 = vst [vmem:[%s2820_s18 + $0x5c] sm:$0xff] %v3958_v45  ;;  %1506 = vst [vmem:[%s2820_s18 + $0x64] sm:$0xff] %v3961_v46  ;;  %v1463_v57 = vld [vmem:[%s2824_s27 + $0x20] sm:$0xff]  ;;  %v1465_v58 = vld [vmem:[%s2824_s27 + $0x28] sm:$0xff] }
 0x232   : >> { %1508 = vst [vmem:[%s2820_s18 + $0x6c] sm:$0xff] %v3970_v47  ;;  %1514 = vst [vmem:[%s2820_s18 + $0x84] sm:$0xff] %v3985_v50  ;;  %v1547_v59 = vld [vmem:[%s2824_s27 + $0x90] sm:$0xff]  ;;  %v1549_v60 = vld [vmem:[%s2824_s27 + $0x98] sm:$0xff] }
 0x233   : >> { %1472 = vst [vmem:[%s2820_s18 + $0x40] sm:$0xff] %v1471_v53  ;;  %1500 = vst [vmem:[%s2820_s18 + $0x4c] sm:$0xff] %v1471_v53  ;;  %v1455_v61 = vld [vmem:[%s2824_s27] sm:$0xff]  ;;  %v1457_v62 = vld [vmem:[%s2824_s27 + $0x8] sm:$0xff] }
 0x234   : >> { %1510 = vst [vmem:[%s2820_s18 + $0x74] sm:$0xff] %v3973_v48  ;;  %1512 = vst [vmem:[%s2820_s18 + $0x7c] sm:$0xff] %v3976_v49  ;;  %v1459_v63 = vld [vmem:[%s2824_s27 + $0x10] sm:$0xff]  ;;  %v1579_v0 = vld [vmem:[%s2824_s27 + $0xa0] sm:$0xff] }
 0x235   : >> { %1516 = vst [vmem:[%s2820_s18 + $0x8c] sm:$0xff] %v1515_v54  ;;  %1518 = vst [vmem:[%s2820_s18 + $0x94] sm:$0xff] %v1517_v55  ;;  %v1581_v1 = vld [vmem:[%s2824_s27 + $0xa8] sm:$0xff]  ;;  %s1588_s27 = scalar_lea.vmem %s3899_s14, %s2176_s11 [#allocation3]  }
 0x236   : >> { %1528 = vst [vmem:[%s2820_s18 + $0x58] sm:$0xff] %v1471_v53  ;;  %1530 = vst [vmem:[%s2820_s18 + $0x60] sm:$0xff] %v3955_v44 }
 0x237   : >> { %1532 = vst [vmem:[%s2820_s18 + $0x68] sm:$0xff] %v3958_v45  ;;  %1546 = vst [vmem:[%s2820_s18 + $0xa0] sm:$0xff] %v1517_v55 }
 0x238   : >> { %1462 = vst [vmem:[%s2820_s18 + $0x18] sm:$0xff] %v1461_v56  ;;  %1464 = vst [vmem:[%s2820_s18 + $0x20] sm:$0xff] %v1463_v57 }
 0x239   : >> { %1466 = vst [vmem:[%s2820_s18 + $0x28] sm:$0xff] %v1465_v58  ;;  %1494 = vst [vmem:[%s2820_s18 + $0x34] sm:$0xff] %v1465_v58 }
 0x23a   : >> { %1496 = vst [vmem:[%s2820_s18 + $0x3c] sm:$0xff] %v1467_v51  ;;  %1498 = vst [vmem:[%s2820_s18 + $0x44] sm:$0xff] %v1469_v52 }
 0x23b   : >> { %1526 = vst [vmem:[%s2820_s18 + $0x50] sm:$0xff] %v1469_v52  ;;  %1534 = vst [vmem:[%s2820_s18 + $0x70] sm:$0xff] %v3961_v46 }
 0x23c   : >> { %1536 = vst [vmem:[%s2820_s18 + $0x78] sm:$0xff] %v3970_v47  ;;  %1538 = vst [vmem:[%s2820_s18 + $0x80] sm:$0xff] %v3973_v48 }
 0x23d   : >> { %1540 = vst [vmem:[%s2820_s18 + $0x88] sm:$0xff] %v3976_v49  ;;  %1542 = vst [vmem:[%s2820_s18 + $0x90] sm:$0xff] %v3985_v50 }
 0x23e   : >> { %1544 = vst [vmem:[%s2820_s18 + $0x98] sm:$0xff] %v1515_v54  ;;  %1554 = vst [vmem:[%s2820_s18 + $0x5c] sm:$0xff] %v1469_v52 }
 0x23f   : >> { %1556 = vst [vmem:[%s2820_s18 + $0x64] sm:$0xff] %v1471_v53  ;;  %1548 = vst [vmem:[%s2820_s18 + $0xa8] sm:$0xff] %v1547_v59 }
 0x240   : >> { %1550 = vst [vmem:[%s2820_s18 + $0xb0] sm:$0xff] %v1549_v60  ;;  %1456 = vst [vmem:[%s2820_s18] sm:$0xff] %v1455_v61 }
 0x241   : >> { %1490 = vst [vmem:[%s2820_s18 + $0x24] sm:$0xff] %v1461_v56  ;;  %1492 = vst [vmem:[%s2820_s18 + $0x2c] sm:$0xff] %v1463_v57 }
 0x242   : >> { %1520 = vst [vmem:[%s2820_s18 + $0x38] sm:$0xff] %v1463_v57  ;;  %1522 = vst [vmem:[%s2820_s18 + $0x40] sm:$0xff] %v1465_v58 }
 0x243   : >> { %1524 = vst [vmem:[%s2820_s18 + $0x48] sm:$0xff] %v1467_v51  ;;  %1552 = vst [vmem:[%s2820_s18 + $0x54] sm:$0xff] %v1467_v51 }
 0x244   : >> { %1558 = vst [vmem:[%s2820_s18 + $0x6c] sm:$0xff] %v3955_v44  ;;  %1560 = vst [vmem:[%s2820_s18 + $0x74] sm:$0xff] %v3958_v45 }
 0x245   : >> { %1562 = vst [vmem:[%s2820_s18 + $0x7c] sm:$0xff] %v3961_v46  ;;  %1564 = vst [vmem:[%s2820_s18 + $0x84] sm:$0xff] %v3970_v47 }
 0x246   : >> { %1566 = vst [vmem:[%s2820_s18 + $0x8c] sm:$0xff] %v3973_v48  ;;  %1568 = vst [vmem:[%s2820_s18 + $0x94] sm:$0xff] %v3976_v49 }
 0x247   : >> { %1570 = vst [vmem:[%s2820_s18 + $0x9c] sm:$0xff] %v3985_v50  ;;  %1578 = vst [vmem:[%s2820_s18 + $0xbc] sm:$0xff] %v1549_v60  ;;  %1451 = sbr.rel (!%p1448_p8) target bundleno = 555 (0x22b), region = 275 }
 0x248   : >> { %1458 = vst [vmem:[%s2820_s18 + $0x8] sm:$0xff] %v1457_v62  ;;  %1460 = vst [vmem:[%s2820_s18 + $0x10] sm:$0xff] %v1459_v63 }
 0x249   : >> { %1488 = vst [vmem:[%s2820_s18 + $0x1c] sm:$0xff] %v1459_v63  ;;  %1572 = vst [vmem:[%s2820_s18 + $0xa4] sm:$0xff] %v1515_v54 }
 0x24a   : >> { %1574 = vst [vmem:[%s2820_s18 + $0xac] sm:$0xff] %v1517_v55  ;;  %1576 = vst [vmem:[%s2820_s18 + $0xb4] sm:$0xff] %v1547_v59 }
 0x24b   : >> { %1580 = vst [vmem:[%s2820_s18 + $0xc4] sm:$0xff] %v1579_v0  ;;  %1582 = vst [vmem:[%s2820_s18 + $0xcc] sm:$0xff] %v1581_v1  ;;  %s1589_s18 = scalar_lea.vmem %s3916_s5, %s2176_s11  }
 0x24c PF: > { %s4112_s28 = sand.u32 15, %s1442_s12   ;;  %s2212_s8 = sshll.u32 %s3929_s15, 11 }
 0x24d   : > { %s1594_s19 = sshra.s32 %s2212_s8, 4  ;;  %p2181_p9 = scmp.le.s32.totalorder %s4112_s28, 0 }
 0x24e   : > { %s4116_s21 = scalar_lea.vmem %s3899_s14, %s1594_s19 [#allocation3]   ;;  %s4119_s22 = scalar_lea.vmem %s3916_s5, %s1594_s19  }
 0x24f   : > { %1998 = sbr.rel (%p2181_p9) target bundleno = 604 (0x25c), region = 280  ;;  %s4422_s23 = smov (!%p2181_p9), %s4119_s22 }
 0x250   : > { %s4423_s9 = smov (!%p2181_p9), %s4116_s21  ;;  %s4128_s20 = smov (!%p2181_p9), 0  }
 0x251   : > { %s2846_s24 = smov (!%p2181_p9), 0  }
 0x254 LB: >> { %v1610_v2 = vld [vmem:[%s2840_s9] sm:$0xff]  ;;  %v1612_v3 = vld [vmem:[%s2840_s9 + $0x10] sm:$0xff]  ;;  %s1618_s26 = sadd.s32 1, %s2844_s20  ;;  %s1604_s24 = sadd.s32 1, %s2848_s24   ;;  %s2848_s24 = sphi %s2846_s24, %s1604_s24   ;;  %s2844_s20 = sphi %s4128_s20, %s4424_s20   ;;  %s2840_s9 = sphi %s4423_s9, %s1623_s9   ;;  %s2836_s23 = sphi %s4422_s23, %s1624_s23  }
 0x255   : >> { %v1614_v4 = vld [vmem:[%s2840_s9 + $0x20] sm:$0xff]  ;;  %1611 = vst [vmem:[%s2836_s23] sm:$0xff] %v1610_v2  ;;  %1613 = vst [vmem:[%s2836_s23 + $0x1c] sm:$0xff] %v1612_v3  ;;  %v1616_v5 = vld [vmem:[%s2840_s9 + $0x30] sm:$0xff]  ;;  %p1619_p10 = scmp.ge.s32.totalorder %s1618_s26, %s4112_s28  ;;  %p1603_p11 = scmp.ge.s32.totalorder %s1604_s24, %s4112_s28 }
 0x256   : >> { %1615 = vst [vmem:[%s2836_s23 + $0x38] sm:$0xff] %v1614_v4  ;;  %1617 = vst [vmem:[%s2836_s23 + $0x54] sm:$0xff] %v1616_v5 }
 0x257   : >> { %s4449_s26 = smov (%p1619_p10, %s1618_s26), 0  ;;  %1606 = sbr.rel (!%p1603_p11) target bundleno = 596 (0x254), region = 286 }
 0x258   : >> { %s2182_s4 = sshll.u32 %s4449_s26, 3  ;;  %s4424_s20 = smov %s4449_s26 }
 0x259   : >> { %s1623_s9 = scalar_lea.vmem %s4116_s21, %s2182_s4 [#allocation3]   ;;  %s1624_s23 = scalar_lea.vmem %s4119_s22, %s2182_s4  }
 0x25c PF: > { %1627 = sbr.rel (%p1438_p5) target bundleno = 670 (0x29e), region = 139  ;;  %s1629_s3 = ssub.s32 (!%p1438_p5), %s3918_s29, %s3922_s17 }
 0x25d   : > { %s1633_s12 = sshrl.u32 (!%p1438_p5), %s3918_s29, 3  ;;  %s4149_s15 = scalar_lea.vmem (!%p1438_p5), %s3899_s14, %s1629_s3 [#allocation3] }
 0x25e   : > { %s4152_s18 = scalar_lea.vmem (!%p1438_p5), %s3916_s5, %s1629_s3  ;;  %s4156_s27 = sshrl.u32 (!%p1438_p5), %s1633_s12, 4 }
 0x25f   : > { %p2184_p12 = scmp.le.s32.totalorder (!%p1438_p5), %s4156_s27, 0 }
 0x261   : > { %2012 = sbr.rel (%p2184_p12) target bundleno = 647 (0x287), region = 291  ;;  %s4425_s30 = smov (!%p2184_p12), %s3916_s5 }
 0x262   : > { %s4426_s6 = smov (!%p2184_p12), %s3899_s14  ;;  %s4165_s7 = smov (!%p2184_p12), 0  }
 0x263   : > { %s4167_s25 = smov (!%p2184_p12), 0  }
 0x266 LB: >> { %v4182_v6 = vld [vmem:[%s2856_s6 + $0x48] sm:$0xff]  ;;  %v4185_v7 = vld [vmem:[%s2856_s6 + $0x50] sm:$0xff]  ;;  %v4188_v8 = vld [vmem:[%s2856_s6 + $0x58] sm:$0xff]  ;;  %s1774_s11 = sadd.s32 1, %s2860_s7  ;;  %s1640_s25 = sadd.s32 1, %s2864_s25   ;;  %s2864_s25 = sphi %s4167_s25, %s1640_s25   ;;  %s2860_s7 = sphi %s4165_s7, %s4428_s7   ;;  %s2856_s6 = sphi %s4426_s6, %s1779_s6   ;;  %s2852_s30 = sphi %s4425_s30, %s1780_s30  }
 0x267   : >> { %1665 = vst [vmem:[%s2852_s30 + $0x48] sm:$0xff] %v4182_v6  ;;  %1667 = vst [vmem:[%s2852_s30 + $0x50] sm:$0xff] %v4185_v7  ;;  %v4197_v9 = vld [vmem:[%s2856_s6 + $0x60] sm:$0xff]  ;;  %v4200_v10 = vld [vmem:[%s2856_s6 + $0x68] sm:$0xff]  ;;  %p4237_p13 = scmp.ge.s32.totalorder %s1774_s11, %s4156_s27  ;;  %p1639_p0 = scmp.ge.s32.totalorder %s1640_s25, %s4156_s27 }
 0x268   : >> { %1669 = vst [vmem:[%s2852_s30 + $0x58] sm:$0xff] %v4188_v8  ;;  %v4203_v11 = vld [vmem:[%s2856_s6 + $0x70] sm:$0xff]  ;;  %1671 = vst [vmem:[%s2852_s30 + $0x60] sm:$0xff] %v4197_v9  ;;  %v4212_v12 = vld [vmem:[%s2856_s6 + $0x78] sm:$0xff] }
 0x269   : >> { %1673 = vst [vmem:[%s2852_s30 + $0x68] sm:$0xff] %v4200_v10  ;;  %1675 = vst [vmem:[%s2852_s30 + $0x70] sm:$0xff] %v4203_v11  ;;  %v1658_v13 = vld [vmem:[%s2856_s6 + $0x30] sm:$0xff]  ;;  %v1660_v14 = vld [vmem:[%s2856_s6 + $0x38] sm:$0xff]  ;;  %s4451_s11 = smov (%p4237_p13, %s1774_s11), 0 }
 0x26a   : >> { %1693 = vst [vmem:[%s2852_s30 + $0x54] sm:$0xff] %v4182_v6  ;;  %1677 = vst [vmem:[%s2852_s30 + $0x78] sm:$0xff] %v4212_v12  ;;  %v1662_v15 = vld [vmem:[%s2856_s6 + $0x40] sm:$0xff]  ;;  %v1708_v17 = vld [vmem:[%s2856_s6 + $0x88] sm:$0xff]  ;;  %s2185_s8 = sshll.u32 %s4451_s11, 7  ;;  %s4428_s7 = smov %s4451_s11 }
 0x26b   : >> { %1659 = vst [vmem:[%s2852_s30 + $0x30] sm:$0xff] %v1658_v13  ;;  %1661 = vst [vmem:[%s2852_s30 + $0x38] sm:$0xff] %v1660_v14  ;;  %v1706_v16 = vld [vmem:[%s2856_s6 + $0x80] sm:$0xff]  ;;  %v1652_v18 = vld [vmem:[%s2856_s6 + $0x18] sm:$0xff] }
 0x26c   : >> { %1695 = vst [vmem:[%s2852_s30 + $0x5c] sm:$0xff] %v4185_v7  ;;  %1697 = vst [vmem:[%s2852_s30 + $0x64] sm:$0xff] %v4188_v8  ;;  %v1654_v19 = vld [vmem:[%s2856_s6 + $0x20] sm:$0xff]  ;;  %v1656_v20 = vld [vmem:[%s2856_s6 + $0x28] sm:$0xff] }
 0x26d   : >> { %1699 = vst [vmem:[%s2852_s30 + $0x6c] sm:$0xff] %v4197_v9  ;;  %1705 = vst [vmem:[%s2852_s30 + $0x84] sm:$0xff] %v4212_v12  ;;  %v1738_v21 = vld [vmem:[%s2856_s6 + $0x90] sm:$0xff]  ;;  %v1740_v22 = vld [vmem:[%s2856_s6 + $0x98] sm:$0xff] }
 0x26e   : >> { %1663 = vst [vmem:[%s2852_s30 + $0x40] sm:$0xff] %v1662_v15  ;;  %1691 = vst [vmem:[%s2852_s30 + $0x4c] sm:$0xff] %v1662_v15  ;;  %v1646_v23 = vld [vmem:[%s2856_s6] sm:$0xff]  ;;  %v1648_v24 = vld [vmem:[%s2856_s6 + $0x8] sm:$0xff] }
 0x26f   : >> { %1701 = vst [vmem:[%s2852_s30 + $0x74] sm:$0xff] %v4200_v10  ;;  %1703 = vst [vmem:[%s2852_s30 + $0x7c] sm:$0xff] %v4203_v11  ;;  %v1650_v25 = vld [vmem:[%s2856_s6 + $0x10] sm:$0xff]  ;;  %v1770_v26 = vld [vmem:[%s2856_s6 + $0xa0] sm:$0xff] }
 0x270   : >> { %1707 = vst [vmem:[%s2852_s30 + $0x8c] sm:$0xff] %v1706_v16  ;;  %1709 = vst [vmem:[%s2852_s30 + $0x94] sm:$0xff] %v1708_v17  ;;  %v1772_v27 = vld [vmem:[%s2856_s6 + $0xa8] sm:$0xff]  ;;  %s1779_s6 = scalar_lea.vmem %s3899_s14, %s2185_s8 [#allocation3]  }
 0x271   : >> { %1719 = vst [vmem:[%s2852_s30 + $0x58] sm:$0xff] %v1662_v15  ;;  %1721 = vst [vmem:[%s2852_s30 + $0x60] sm:$0xff] %v4182_v6 }
 0x272   : >> { %1723 = vst [vmem:[%s2852_s30 + $0x68] sm:$0xff] %v4185_v7  ;;  %1737 = vst [vmem:[%s2852_s30 + $0xa0] sm:$0xff] %v1708_v17 }
 0x273   : >> { %1653 = vst [vmem:[%s2852_s30 + $0x18] sm:$0xff] %v1652_v18  ;;  %1655 = vst [vmem:[%s2852_s30 + $0x20] sm:$0xff] %v1654_v19 }
 0x274   : >> { %1657 = vst [vmem:[%s2852_s30 + $0x28] sm:$0xff] %v1656_v20  ;;  %1685 = vst [vmem:[%s2852_s30 + $0x34] sm:$0xff] %v1656_v20 }
 0x275   : >> { %1687 = vst [vmem:[%s2852_s30 + $0x3c] sm:$0xff] %v1658_v13  ;;  %1689 = vst [vmem:[%s2852_s30 + $0x44] sm:$0xff] %v1660_v14 }
 0x276   : >> { %1717 = vst [vmem:[%s2852_s30 + $0x50] sm:$0xff] %v1660_v14  ;;  %1725 = vst [vmem:[%s2852_s30 + $0x70] sm:$0xff] %v4188_v8 }
 0x277   : >> { %1727 = vst [vmem:[%s2852_s30 + $0x78] sm:$0xff] %v4197_v9  ;;  %1729 = vst [vmem:[%s2852_s30 + $0x80] sm:$0xff] %v4200_v10 }
 0x278   : >> { %1731 = vst [vmem:[%s2852_s30 + $0x88] sm:$0xff] %v4203_v11  ;;  %1733 = vst [vmem:[%s2852_s30 + $0x90] sm:$0xff] %v4212_v12 }
 0x279   : >> { %1735 = vst [vmem:[%s2852_s30 + $0x98] sm:$0xff] %v1706_v16  ;;  %1745 = vst [vmem:[%s2852_s30 + $0x5c] sm:$0xff] %v1660_v14 }
 0x27a   : >> { %1747 = vst [vmem:[%s2852_s30 + $0x64] sm:$0xff] %v1662_v15  ;;  %1739 = vst [vmem:[%s2852_s30 + $0xa8] sm:$0xff] %v1738_v21 }
 0x27b   : >> { %1741 = vst [vmem:[%s2852_s30 + $0xb0] sm:$0xff] %v1740_v22  ;;  %1647 = vst [vmem:[%s2852_s30] sm:$0xff] %v1646_v23 }
 0x27c   : >> { %1681 = vst [vmem:[%s2852_s30 + $0x24] sm:$0xff] %v1652_v18  ;;  %1683 = vst [vmem:[%s2852_s30 + $0x2c] sm:$0xff] %v1654_v19 }
 0x27d   : >> { %1711 = vst [vmem:[%s2852_s30 + $0x38] sm:$0xff] %v1654_v19  ;;  %1713 = vst [vmem:[%s2852_s30 + $0x40] sm:$0xff] %v1656_v20 }
 0x27e   : >> { %1715 = vst [vmem:[%s2852_s30 + $0x48] sm:$0xff] %v1658_v13  ;;  %1743 = vst [vmem:[%s2852_s30 + $0x54] sm:$0xff] %v1658_v13 }
 0x27f   : >> { %1749 = vst [vmem:[%s2852_s30 + $0x6c] sm:$0xff] %v4182_v6  ;;  %1751 = vst [vmem:[%s2852_s30 + $0x74] sm:$0xff] %v4185_v7 }
 0x280   : >> { %1753 = vst [vmem:[%s2852_s30 + $0x7c] sm:$0xff] %v4188_v8  ;;  %1755 = vst [vmem:[%s2852_s30 + $0x84] sm:$0xff] %v4197_v9 }
 0x281   : >> { %1757 = vst [vmem:[%s2852_s30 + $0x8c] sm:$0xff] %v4200_v10  ;;  %1759 = vst [vmem:[%s2852_s30 + $0x94] sm:$0xff] %v4203_v11 }
 0x282   : >> { %1761 = vst [vmem:[%s2852_s30 + $0x9c] sm:$0xff] %v4212_v12  ;;  %1769 = vst [vmem:[%s2852_s30 + $0xbc] sm:$0xff] %v1740_v22  ;;  %1642 = sbr.rel (!%p1639_p0) target bundleno = 614 (0x266), region = 297 }
 0x283   : >> { %1649 = vst [vmem:[%s2852_s30 + $0x8] sm:$0xff] %v1648_v24  ;;  %1651 = vst [vmem:[%s2852_s30 + $0x10] sm:$0xff] %v1650_v25 }
 0x284   : >> { %1679 = vst [vmem:[%s2852_s30 + $0x1c] sm:$0xff] %v1650_v25  ;;  %1763 = vst [vmem:[%s2852_s30 + $0xa4] sm:$0xff] %v1706_v16 }
 0x285   : >> { %1765 = vst [vmem:[%s2852_s30 + $0xac] sm:$0xff] %v1708_v17  ;;  %1767 = vst [vmem:[%s2852_s30 + $0xb4] sm:$0xff] %v1738_v21 }
 0x286   : >> { %1771 = vst [vmem:[%s2852_s30 + $0xc4] sm:$0xff] %v1770_v26  ;;  %1773 = vst [vmem:[%s2852_s30 + $0xcc] sm:$0xff] %v1772_v27  ;;  %s1780_s30 = scalar_lea.vmem %s3916_s5, %s2185_s8  }
 0x287 PF: > { %s4339_s19 = sand.u32 15, %s1633_s12   ;;  %s2214_s21 = sshll.u32 %s4156_s27, 11 }
 0x288   : > { %s1785_s22 = sshra.s32 %s2214_s21, 4  ;;  %p2190_p1 = scmp.le.s32.totalorder %s4339_s19, 0 }
 0x289   : > { %s4343_s23 = scalar_lea.vmem %s3899_s14, %s1785_s22 [#allocation3]   ;;  %s4346_s9 = scalar_lea.vmem %s3916_s5, %s1785_s22  }
 0x28a   : > { %2026 = sbr.rel (%p2190_p1) target bundleno = 663 (0x297), region = 302  ;;  %s4429_s20 = smov (!%p2190_p1), %s4346_s9 }
 0x28b   : > { %s4430_s24 = smov (!%p2190_p1), %s4343_s23  ;;  %s2874_s26 = smov (!%p2190_p1), 0  }
 0x28c   : > { %s2878_s4 = smov (!%p2190_p1), 0  }
 0x28f LB: >> { %v1801_v28 = vld [vmem:[%s2872_s24] sm:$0xff]  ;;  %v1803_v29 = vld [vmem:[%s2872_s24 + $0x10] sm:$0xff]  ;;  %s1809_s3 = sadd.s32 1, %s2876_s26  ;;  %s1795_s4 = sadd.s32 1, %s2880_s4   ;;  %s2880_s4 = sphi %s2878_s4, %s1795_s4   ;;  %s2876_s26 = sphi %s2874_s26, %s2875_s26   ;;  %s2872_s24 = sphi %s4430_s24, %s1814_s24   ;;  %s2868_s20 = sphi %s4429_s20, %s1815_s20  }
 0x290   : >> { %v1805_v30 = vld [vmem:[%s2872_s24 + $0x20] sm:$0xff]  ;;  %1802 = vst [vmem:[%s2868_s20] sm:$0xff] %v1801_v28  ;;  %1804 = vst [vmem:[%s2868_s20 + $0x1c] sm:$0xff] %v1803_v29  ;;  %v1807_v31 = vld [vmem:[%s2872_s24 + $0x30] sm:$0xff]  ;;  %p1810_p2 = scmp.ge.s32.totalorder %s1809_s3, %s4339_s19  ;;  %p1794_p3 = scmp.ge.s32.totalorder %s1795_s4, %s4339_s19 }
 0x291   : >> { %1806 = vst [vmem:[%s2868_s20 + $0x38] sm:$0xff] %v1805_v30  ;;  %1808 = vst [vmem:[%s2868_s20 + $0x54] sm:$0xff] %v1807_v31 }
 0x292   : >> { %s4453_s3 = smov (%p1810_p2, %s1809_s3), 0  ;;  %1797 = sbr.rel (!%p1794_p3) target bundleno = 655 (0x28f), region = 308 }
 0x293   : >> { %s2191_s12 = sshll.u32 %s4453_s3, 3  ;;  %s2875_s26 = smov %s4453_s3  }
 0x294   : >> { %s1814_s24 = scalar_lea.vmem %s4343_s23, %s2191_s12 [#allocation3]   ;;  %s1815_s20 = scalar_lea.vmem %s4346_s9, %s2191_s12  }
 0x297 PF: > { %s2884_s27 = smov 1  }
 0x298   : > { %s1816_s30 = sshll.u32 %s2884_s27, %s3922_s17 }
 0x299   : > { %s2193_s6 = sadd.s32 4294967295, %s1816_s30 }
 0x29a   : > { %v1826_v32 = vld [vmem:[%s4149_s15] sm:%s2193_s6]  ;;  %v1828_v33 = vld [vmem:[%s4149_s15 + $0x10] sm:%s2193_s6] }
 0x29b   : > { %1827 = vst [vmem:[%s4152_s18] sm:%s2193_s6] %v1826_v32  ;;  %1829 = vst [vmem:[%s4152_s18 + $0x1c] sm:%s2193_s6] %v1828_v33 }
 0x29c   : > { %v1830_v34 = vld [vmem:[%s4149_s15 + $0x20] sm:%s2193_s6]  ;;  %v1832_v35 = vld [vmem:[%s4149_s15 + $0x30] sm:%s2193_s6] }
 0x29d   : > { %1831 = vst [vmem:[%s4152_s18 + $0x38] sm:%s2193_s6] %v1830_v34  ;;  %1833 = vst [vmem:[%s4152_s18 + $0x54] sm:%s2193_s6] %v1832_v35 }
 0x29e PF: > { %p2194_p5 = scmp.ge.u32.totalorder %s3918_s29, 8 }
 0x29f   : > { %s2885_s7 = smov (!%p2194_p5), 1  }
 0x2a0   : > { %1418 = sbr.rel (%p2194_p5) target bundleno = 681 (0x2a9), region = 110  ;;  %s1419_s17 = sshll.u32 (!%p2194_p5), %s2885_s7, %s3918_s29 }
 0x2a1   : > { %s2195_s25 = sadd.s32 (!%p2194_p5), 4294967295, %s1419_s17 }
 0x2a5   : > { %v1429_v36 = vld [vmem:[%s3899_s14] sm:%s2195_s25]  ;;  %v1431_v37 = vld [vmem:[%s3899_s14 + $0x10] sm:%s2195_s25] }
 0x2a6   : > { %1430 = vst [vmem:[%s3916_s5] sm:%s2195_s25] %v1429_v36  ;;  %1432 = vst [vmem:[%s3916_s5 + $0x1c] sm:%s2195_s25] %v1431_v37 }
 0x2a7   : > { %v1433_v38 = vld [vmem:[%s3899_s14 + $0x20] sm:%s2195_s25]  ;;  %v1435_v39 = vld [vmem:[%s3899_s14 + $0x30] sm:%s2195_s25] }
 0x2a8   : > { %1434 = vst [vmem:[%s3916_s5 + $0x38] sm:%s2195_s25] %v1433_v38  ;;  %1436 = vst [vmem:[%s3916_s5 + $0x54] sm:%s2195_s25] %v1435_v39 }
 0x2a9 PF: > { %p9_p4 = scmp.ge.s32.totalorder %s2920_s13, 4   ;;  %s4431_s9 = smov %s2748_s10 }
 0x2aa   : > { %s4432_s10 = smov %s2930_s16  ;;  %s4433_s11 = smov %s2920_s13 }
 0x2ab   :  { %11 = sbr.rel (!%p9_p4) target bundleno = 2 (0x2), region = 319 }

// kernel: dueling_dqn_forward.5
= control target key start
LH: loop header
LB: loop body
LE: loop exit
PB: predicated region body
PF: predicated region fallthrough
CT: control target
= control target key end

     0   :  { %vm701_vm0 = vcmask 1043456   ;;  %vm702_vm1 = vcmask 277508   ;;  %s1231_s1 = inlined_call_operand.vmem [shape: bf16[512,162], index: 1, kind: input, shape index: {}]   ;;  %s1232_s0 = inlined_call_operand.vmem [shape: bf16[64,512], index: 0, kind: input, shape index: {}]   ;;  %s1233_s2 = inlined_call_operand.vmem [shape: bf16[64,162], index: 2, kind: output, shape index: {}]  }
   0x1   :  { %v812_v0 = vld [vmem:[%s1231_s1 + $0x74] ss:$8 sps:$4 sm:$0xff]   ;;  %v816_v2 = vld [vmem:[%s1231_s1 + $0x70] ss:$8 sps:$4 sm:$0xff]   ;;  %v818_v4 = vld [vmem:[%s1231_s1 + $0x64] ss:$8 sps:$4 sm:$0xff]  }
   0x2   :  { %v814_v1 = vld [vmem:[%s1231_s1 + $0x174] ss:$8 sps:$4 sm:$0xff]   ;;  %491 = vmatprep.subr.bf16.mxu0 %v812_v0  ;;  %v817_v3 = vld [vmem:[%s1231_s1 + $0x170] ss:$8 sps:$4 sm:$0xff]   ;;  %v820_v5 = vld [vmem:[%s1231_s1 + $0x164] ss:$8 sps:$4 sm:$0xff]  }
   0x3   :  { %564 = vmatprep.subr.bf16.mxu1 %v814_v1  ;;  %492 = vmatpush1.bf16.msra.mxu0 %v816_v2  ;;  %v822_v6 = vld [vmem:[%s1231_s1 + $0x60] ss:$8 sps:$4 sm:$0xff]   ;;  %v824_v8 = vld [vmem:[%s1231_s1 + $0x54] ss:$8 sps:$4 sm:$0xff]   ;;  %v828_v10 = vld [vmem:[%s1231_s1 + $0x50] ss:$8 sps:$4 sm:$0xff]  }
   0x4   :  { %565 = vmatpush1.bf16.msra.mxu1 %v817_v3  ;;  %493 = vmatprep.subr.bf16.mxu0 %v818_v4  ;;  %v823_v7 = vld [vmem:[%s1231_s1 + $0x160] ss:$8 sps:$4 sm:$0xff]   ;;  %v826_v9 = vld [vmem:[%s1231_s1 + $0x154] ss:$8 sps:$4 sm:$0xff]   ;;  %v829_v11 = vld [vmem:[%s1231_s1 + $0x150] ss:$8 sps:$4 sm:$0xff]  }
   0x5   :  { %566 = vmatprep.subr.bf16.mxu1 %v820_v5  ;;  %v830_v12 = vld [vmem:[%s1231_s1 + $0x44] ss:$8 sps:$4 sm:$0xff]   ;;  %v834_v14 = vld [vmem:[%s1231_s1 + $0x40] ss:$8 sps:$4 sm:$0xff]   ;;  %v836_v16 = vld [vmem:[%s1231_s1 + $0x34] ss:$8 sps:$4 sm:$0xff]  }
   0x6   :  { %v832_v13 = vld [vmem:[%s1231_s1 + $0x144] ss:$8 sps:$4 sm:$0xff]   ;;  %v835_v15 = vld [vmem:[%s1231_s1 + $0x140] ss:$8 sps:$4 sm:$0xff]   ;;  %v838_v17 = vld [vmem:[%s1231_s1 + $0x134] ss:$8 sps:$4 sm:$0xff]  }
   0x7   :  { %494 = vmatpush1.bf16.msra.mxu0 %v822_v6  ;;  %v840_v18 = vld [vmem:[%s1231_s1 + $0x30] ss:$8 sps:$4 sm:$0xff]   ;;  %v842_v20 = vld [vmem:[%s1231_s1 + $0x24] ss:$8 sps:$4 sm:$0xff]   ;;  %v846_v22 = vld [vmem:[%s1231_s1 + $0x20] ss:$8 sps:$4 sm:$0xff]  }
   0x8   :  { %567 = vmatpush1.bf16.msra.mxu1 %v823_v7  ;;  %495 = vmatprep.subr.bf16.mxu0 %v824_v8  ;;  %v841_v19 = vld [vmem:[%s1231_s1 + $0x130] ss:$8 sps:$4 sm:$0xff]   ;;  %v844_v21 = vld [vmem:[%s1231_s1 + $0x124] ss:$8 sps:$4 sm:$0xff]   ;;  %v847_v23 = vld [vmem:[%s1231_s1 + $0x120] ss:$8 sps:$4 sm:$0xff]  }
   0x9   :  { %568 = vmatprep.subr.bf16.mxu1 %v826_v9  ;;  %v848_v24 = vld [vmem:[%s1231_s1 + $0x14] ss:$8 sps:$4 sm:$0xff]   ;;  %v852_v26 = vld [vmem:[%s1231_s1 + $0x10] ss:$8 sps:$4 sm:$0xff]   ;;  %v854_v28 = vld [vmem:[%s1231_s1 + $0x4] ss:$8 sps:$4 sm:$0xff]  }
   0xa   :  { %v850_v25 = vld [vmem:[%s1231_s1 + $0x114] ss:$8 sps:$4 sm:$0xff]   ;;  %v853_v27 = vld [vmem:[%s1231_s1 + $0x110] ss:$8 sps:$4 sm:$0xff]   ;;  %v856_v29 = vld [vmem:[%s1231_s1 + $0x104] ss:$8 sps:$4 sm:$0xff]  }
   0xb   :  { %496 = vmatpush1.bf16.msra.mxu0 %v828_v10  ;;  %v858_v30 = vld [vmem:[%s1231_s1] ss:$8 sps:$4 sm:$0xff]   ;;  %v860_v32 = vld [vmem:[%s1231_s1 + $0xf4] ss:$8 sps:$4 sm:$0xff]   ;;  %v864_v34 = vld [vmem:[%s1231_s1 + $0xf0] ss:$8 sps:$4 sm:$0xff]  }
   0xc   :  { %569 = vmatpush1.bf16.msra.mxu1 %v829_v11  ;;  %497 = vmatprep.subr.bf16.mxu0 %v830_v12  ;;  %v859_v31 = vld [vmem:[%s1231_s1 + $0x100] ss:$8 sps:$4 sm:$0xff]   ;;  %v862_v33 = vld [vmem:[%s1231_s1 + $0x1f4] ss:$8 sps:$4 sm:$0xff]   ;;  %v865_v35 = vld [vmem:[%s1231_s1 + $0x1f0] ss:$8 sps:$4 sm:$0xff]  }
   0xd   :  { %570 = vmatprep.subr.bf16.mxu1 %v832_v13  ;;  %v866_v36 = vld [vmem:[%s1231_s1 + $0xe4] ss:$8 sps:$4 sm:$0xff]   ;;  %v870_v38 = vld [vmem:[%s1231_s1 + $0xe0] ss:$8 sps:$4 sm:$0xff]   ;;  %v872_v40 = vld [vmem:[%s1231_s1 + $0xd4] ss:$8 sps:$4 sm:$0xff]  }
   0xe   :  { %v868_v37 = vld [vmem:[%s1231_s1 + $0x1e4] ss:$8 sps:$4 sm:$0xff]   ;;  %v871_v39 = vld [vmem:[%s1231_s1 + $0x1e0] ss:$8 sps:$4 sm:$0xff]   ;;  %v874_v41 = vld [vmem:[%s1231_s1 + $0x1d4] ss:$8 sps:$4 sm:$0xff]  }
   0xf   :  { %498 = vmatpush1.bf16.msra.mxu0 %v834_v14  ;;  %v876_v42 = vld [vmem:[%s1231_s1 + $0xd0] ss:$8 sps:$4 sm:$0xff]   ;;  %v878_v44 = vld [vmem:[%s1231_s1 + $0xc4] ss:$8 sps:$4 sm:$0xff]   ;;  %v882_v46 = vld [vmem:[%s1231_s1 + $0xc0] ss:$8 sps:$4 sm:$0xff]  }
  0x10   :  { %571 = vmatpush1.bf16.msra.mxu1 %v835_v15  ;;  %499 = vmatprep.subr.bf16.mxu0 %v836_v16  ;;  %v877_v43 = vld [vmem:[%s1231_s1 + $0x1d0] ss:$8 sps:$4 sm:$0xff]   ;;  %v880_v45 = vld [vmem:[%s1231_s1 + $0x1c4] ss:$8 sps:$4 sm:$0xff]   ;;  %v883_v47 = vld [vmem:[%s1231_s1 + $0x1c0] ss:$8 sps:$4 sm:$0xff]  }
  0x11   :  { %572 = vmatprep.subr.bf16.mxu1 %v838_v17  ;;  %v884_v48 = vld [vmem:[%s1231_s1 + $0xb4] ss:$8 sps:$4 sm:$0xff]   ;;  %v888_v52 = vld [vmem:[%s1231_s1 + $0xb0] ss:$8 sps:$4 sm:$0xff]   ;;  %v890_v54 = vld [vmem:[%s1231_s1 + $0xa4] ss:$8 sps:$4 sm:$0xff]  }
  0x12   :  { %v910_v49 = vld [vmem:[%s1232_s0 + $0x4] ss:$16 sps:$4 sm:$0xff]   ;;  %v913_v51 = vld [vmem:[%s1232_s0 + $0xc] ss:$16 sps:$4 sm:$0xff]   ;;  %v889_v53 = vld [vmem:[%s1231_s1 + $0x1b0] ss:$8 sps:$4 sm:$0xff]  }
  0x13   :  { %500 = vmatpush1.bf16.msra.mxu0 %v840_v18  ;;  %v886_v50 = vld [vmem:[%s1231_s1 + $0x1b4] ss:$8 sps:$4 sm:$0xff]   ;;  %523 = vmatprep.mubr.bf16.mxu0 %v910_v49  ;;  %v892_v55 = vld [vmem:[%s1231_s1 + $0x1a4] ss:$8 sps:$4 sm:$0xff]   ;;  %v894_v56 = vld [vmem:[%s1231_s1 + $0xa0] ss:$8 sps:$4 sm:$0xff]  }
  0x14   :  { %573 = vmatpush1.bf16.msra.mxu1 %v841_v19  ;;  %501 = vmatprep.subr.bf16.mxu0 %v842_v20  ;;  %v895_v57 = vld [vmem:[%s1231_s1 + $0x1a0] ss:$8 sps:$4 sm:$0xff]   ;;  %v896_v58 = vld [vmem:[%s1231_s1 + $0x94] ss:$8 sps:$4 sm:$0xff]   ;;  %v900_v60 = vld [vmem:[%s1231_s1 + $0x90] ss:$8 sps:$4 sm:$0xff]  }
  0x15   :  { %574 = vmatprep.subr.bf16.mxu1 %v844_v21  ;;  %596 = vmatprep.mubr.bf16.mxu1 %v913_v51  ;;  %v898_v59 = vld [vmem:[%s1231_s1 + $0x194] ss:$8 sps:$4 sm:$0xff]   ;;  %v901_v61 = vld [vmem:[%s1231_s1 + $0x190] ss:$8 sps:$4 sm:$0xff]   ;;  %v902_v62 = vld [vmem:[%s1231_s1 + $0x84] ss:$8 sps:$4 sm:$0xff]  }
  0x16   :  { %v904_v63 = vld [vmem:[%s1231_s1 + $0x184] ss:$8 sps:$4 sm:$0xff]   ;;  %v906_v0 = vld [vmem:[%s1231_s1 + $0x80] ss:$8 sps:$4 sm:$0xff]   ;;  %vm1187_vm2 = vmor %vm702_vm1, %vm701_vm0 }
  0x17   :  { %502 = vmatpush1.bf16.msra.mxu0 %v846_v22  ;;  %v907_v1 = vld [vmem:[%s1231_s1 + $0x180] ss:$8 sps:$4 sm:$0xff]   ;;  %v914_v4 = vld [vmem:[%s1232_s0 + $0x24] ss:$16 sps:$4 sm:$0xff]   ;;  %v916_v5 = vld [vmem:[%s1232_s0 + $0x2c] ss:$16 sps:$4 sm:$0xff]  }
  0x18   :  { %575 = vmatpush1.bf16.msra.mxu1 %v847_v23  ;;  %503 = vmatprep.subr.bf16.mxu0 %v848_v24  ;;  %v908_v2 = vld [vmem:[%s1232_s0] ss:$16 sps:$4 sm:$0xff]   ;;  %v911_v3 = vld [vmem:[%s1232_s0 + $0x8] ss:$16 sps:$4 sm:$0xff]   ;;  %v920_v8 = vld [vmem:[%s1232_s0 + $0x44] ss:$16 sps:$4 sm:$0xff]  }
  0x19   :  { %576 = vmatprep.subr.bf16.mxu1 %v850_v25  ;;  %v918_v6 = vld [vmem:[%s1232_s0 + $0x20] ss:$16 sps:$4 sm:$0xff]   ;;  %v919_v7 = vld [vmem:[%s1232_s0 + $0x28] ss:$16 sps:$4 sm:$0xff]   ;;  %v922_v9 = vld [vmem:[%s1232_s0 + $0x4c] ss:$16 sps:$4 sm:$0xff]  }
  0x1a   :  { %v924_v10 = vld [vmem:[%s1232_s0 + $0x40] ss:$16 sps:$4 sm:$0xff]   ;;  %v925_v11 = vld [vmem:[%s1232_s0 + $0x48] ss:$16 sps:$4 sm:$0xff]   ;;  %v926_v12 = vld [vmem:[%s1232_s0 + $0x64] ss:$16 sps:$4 sm:$0xff]  }
  0x1b   :  { %504 = vmatpush1.bf16.msra.mxu0 %v852_v26  ;;  %v928_v13 = vld [vmem:[%s1232_s0 + $0x6c] ss:$16 sps:$4 sm:$0xff]   ;;  %v930_v14 = vld [vmem:[%s1232_s0 + $0x60] ss:$16 sps:$4 sm:$0xff]   ;;  %v931_v15 = vld [vmem:[%s1232_s0 + $0x68] ss:$16 sps:$4 sm:$0xff]  }
  0x1c   :  { %577 = vmatpush1.bf16.msra.mxu1 %v853_v27  ;;  %505 = vmatprep.subr.bf16.mxu0 %v854_v28 }
  0x1d   :  { %578 = vmatprep.subr.bf16.mxu1 %v856_v29 }
  0x1f   :  { %506 = vmatpush1.bf16.msra.mxu0 %v858_v30 }
  0x20   :  { %579 = vmatpush1.bf16.msra.mxu1 %v859_v31  ;;  %507 = vmatprep.subr.bf16.mxu0 %v860_v32 }
  0x21   :  { %580 = vmatprep.subr.bf16.mxu1 %v862_v33 }
  0x23   :  { %508 = vmatpush2.bf16.msra.mxu0 %v864_v34 }
  0x24   :  { %581 = vmatpush2.bf16.msra.mxu1 %v865_v35  ;;  %509 = vmatprep.subr.bf16.mxu0 %v866_v36 }
  0x25   :  { %582 = vmatprep.subr.bf16.mxu1 %v868_v37 }
  0x27   :  { %510 = vmatpush2.bf16.msra.mxu0 %v870_v38 }
  0x28   :  { %583 = vmatpush2.bf16.msra.mxu1 %v871_v39  ;;  %511 = vmatprep.subr.bf16.mxu0 %v872_v40 }
  0x29   :  { %584 = vmatprep.subr.bf16.mxu1 %v874_v41 }
  0x2b   :  { %512 = vmatpush2.bf16.msra.mxu0 %v876_v42 }
  0x2c   :  { %585 = vmatpush2.bf16.msra.mxu1 %v877_v43  ;;  %513 = vmatprep.subr.bf16.mxu0 %v878_v44 }
  0x2d   :  { %586 = vmatprep.subr.bf16.mxu1 %v880_v45 }
  0x2f   :  { %514 = vmatpush2.bf16.msra.mxu0 %v882_v46 }
  0x30   :  { %587 = vmatpush2.bf16.msra.mxu1 %v883_v47  ;;  %515 = vmatprep.subr.bf16.mxu0 %v884_v48 }
  0x31   :  { %588 = vmatprep.subr.bf16.mxu1 %v886_v50 }
  0x33   :  { %516 = vmatpush2.bf16.msra.mxu0 %v888_v52 }
  0x34   :  { %589 = vmatpush2.bf16.msra.mxu1 %v889_v53  ;;  %517 = vmatprep.subr.bf16.mxu0 %v890_v54 }
  0x35   :  { %590 = vmatprep.subr.bf16.mxu1 %v892_v55 }
  0x37   :  { %518 = vmatpush2.bf16.msra.mxu0 %v894_v56 }
  0x38   :  { %591 = vmatpush2.bf16.msra.mxu1 %v895_v57  ;;  %519 = vmatprep.subr.bf16.mxu0 %v896_v58 }
  0x39   :  { %592 = vmatprep.subr.bf16.mxu1 %v898_v59 }
  0x3b   :  { %520 = vmatpush2.bf16.msra.mxu0 %v900_v60 }
  0x3c   :  { %593 = vmatpush2.bf16.msra.mxu1 %v901_v61  ;;  %521 = vmatprep.subr.bf16.mxu0 %v902_v62 }
  0x3d   :  { %594 = vmatprep.subr.bf16.mxu1 %v904_v63 }
  0x3f   :  { %522 = vmatpush2.bf16.msra.mxu0 %v906_v0 }
  0x40   :  { %595 = vmatpush2.bf16.msra.mxu1 %v907_v1 }
  0x42   :  { %524 = vmatmul.mubr.bf16.vlgmr.msra.gmra.mxu0 %v908_v2 }
  0x43   :  { %597 = vmatmul.mubr.bf16.vlgmr.msra.gmra.mxu1 %v911_v3  ;;  %533 = vmatprep.mubr.bf16.mxu0 %v914_v4 }
  0x44   :  { %606 = vmatprep.mubr.bf16.mxu1 %v916_v5 }
  0x4a   :  { %534 = vmatmul.mubr.bf16.gmra.mxu0 %v918_v6 }
  0x4b   :  { %607 = vmatmul.mubr.bf16.gmra.mxu1 %v919_v7  ;;  %543 = vmatprep.mubr.bf16.mxu0 %v920_v8 }
  0x4c   :  { %616 = vmatprep.mubr.bf16.mxu1 %v922_v9 }
  0x52   :  { %544 = vmatmul.mubr.bf16.gmra.mxu0 %v924_v10 }
  0x53   :  { %617 = vmatmul.mubr.bf16.gmra.mxu1 %v925_v11  ;;  %553 = vmatprep.mubr.bf16.mxu0 %v926_v12 }
  0x54   :  { %626 = vmatprep.mubr.bf16.mxu1 %v928_v13 }
  0x5a   :  { %554 = vmatmul.mubr.bf16.gmra.mxu0 %v930_v14 }
  0x5b   :  { %627 = vmatmul.mubr.bf16.gmra.mxu1 %v931_v15 }
 0x102   :  { %v525_v16 = vpop.f32.mrf.mxu0 }
 0x103   :  { %v598_v17 = vpop.f32.mrf.mxu1 }
 0x104   :  { %v599_v18 = vadd.f32 %v598_v17, %v525_v16  ;;  %v527_v19 = vpop.f32.mrf.mxu0 }
 0x105   :  { %v600_v20 = vpop.f32.mrf.mxu1 }
 0x106   :  { %v601_v21 = vadd.f32 %v600_v20, %v527_v19  ;;  %v529_v22 = vpop.f32.mrf.mxu0  ;;  %v637_v24 = vmax.f32 %v599_v18, 0.0 }
 0x107   :  { %v602_v23 = vpop.f32.mrf.mxu1 }
 0x108   :  { %v638_v25 = vmax.f32 %v601_v21, 0.0  ;;  %v603_v26 = vadd.f32 %v602_v23, %v529_v22  ;;  %v531_v28 = vpop.f32.mrf.mxu0 }
 0x109   :  { %v604_v29 = vpop.f32.mrf.mxu1 }
 0x10a   :  { %v804_v30 = vpack.c.bf16 %v638_v25, %v637_v24  ;;  %v605_v31 = vadd.f32 %v604_v29, %v531_v28  ;;  %v535_v32 = vpop.f32.mrf.mxu0  ;;  %v639_v34 = vmax.f32 %v603_v26, 0.0 }
 0x10b   :  { %v608_v33 = vpop.f32.mrf.mxu1 }
 0x10c   :  { %704 = vst.msk [vmem:[%s1233_s2] sm:$0xff] %vm1187_vm2, %v804_v30  ;;  %v640_v35 = vmax.f32 %v605_v31, 0.0  ;;  %v609_v36 = vadd.f32 %v608_v33, %v535_v32  ;;  %v537_v37 = vpop.f32.mrf.mxu0 }
 0x10d   :  { %v610_v38 = vpop.f32.mrf.mxu1 }
 0x10e   :  { %v805_v39 = vpack.c.bf16 %v640_v35, %v639_v34  ;;  %v611_v40 = vadd.f32 %v610_v38, %v537_v37  ;;  %v539_v41 = vpop.f32.mrf.mxu0  ;;  %v641_v43 = vmax.f32 %v609_v36, 0.0 }
 0x10f   :  { %v612_v42 = vpop.f32.mrf.mxu1 }
 0x110   :  { %705 = vst.msk [vmem:[%s1233_s2 + $0x8] sm:$0xff] %vm1187_vm2, %v805_v39  ;;  %v642_v44 = vmax.f32 %v611_v40, 0.0  ;;  %v613_v45 = vadd.f32 %v612_v42, %v539_v41  ;;  %v541_v46 = vpop.f32.mrf.mxu0 }
 0x111   :  { %v614_v47 = vpop.f32.mrf.mxu1 }
 0x112   :  { %v806_v48 = vpack.c.bf16 %v642_v44, %v641_v43  ;;  %v615_v49 = vadd.f32 %v614_v47, %v541_v46  ;;  %v545_v50 = vpop.f32.mrf.mxu0  ;;  %v643_v52 = vmax.f32 %v613_v45, 0.0 }
 0x113   :  { %v618_v51 = vpop.f32.mrf.mxu1 }
 0x114   :  { %706 = vst.msk [vmem:[%s1233_s2 + $0x10] sm:$0xff] %vm1187_vm2, %v806_v48  ;;  %v644_v53 = vmax.f32 %v615_v49, 0.0  ;;  %v619_v54 = vadd.f32 %v618_v51, %v545_v50  ;;  %v547_v55 = vpop.f32.mrf.mxu0 }
 0x115   :  { %v620_v56 = vpop.f32.mrf.mxu1 }
 0x116   :  { %v807_v57 = vpack.c.bf16 %v644_v53, %v643_v52  ;;  %v621_v58 = vadd.f32 %v620_v56, %v547_v55  ;;  %v549_v59 = vpop.f32.mrf.mxu0  ;;  %v645_v61 = vmax.f32 %v619_v54, 0.0 }
 0x117   :  { %v622_v60 = vpop.f32.mrf.mxu1 }
 0x118   :  { %707 = vst.msk [vmem:[%s1233_s2 + $0x18] sm:$0xff] %vm1187_vm2, %v807_v57  ;;  %v646_v62 = vmax.f32 %v621_v58, 0.0  ;;  %v623_v63 = vadd.f32 %v622_v60, %v549_v59  ;;  %v551_v0 = vpop.f32.mrf.mxu0 }
 0x119   :  { %v624_v1 = vpop.f32.mrf.mxu1 }
 0x11a   :  { %v808_v2 = vpack.c.bf16 %v646_v62, %v645_v61  ;;  %v625_v3 = vadd.f32 %v624_v1, %v551_v0  ;;  %v555_v4 = vpop.f32.mrf.mxu0  ;;  %v647_v6 = vmax.f32 %v623_v63, 0.0 }
 0x11b   :  { %v628_v5 = vpop.f32.mrf.mxu1 }
 0x11c   :  { %708 = vst.msk [vmem:[%s1233_s2 + $0x20] sm:$0xff] %vm1187_vm2, %v808_v2  ;;  %v648_v7 = vmax.f32 %v625_v3, 0.0  ;;  %v629_v8 = vadd.f32 %v628_v5, %v555_v4  ;;  %v557_v9 = vpop.f32.mrf.mxu0 }
 0x11d   :  { %v630_v10 = vpop.f32.mrf.mxu1 }
 0x11e   :  { %v809_v11 = vpack.c.bf16 %v648_v7, %v647_v6  ;;  %v631_v12 = vadd.f32 %v630_v10, %v557_v9  ;;  %v559_v13 = vpop.f32.mrf.mxu0  ;;  %v649_v15 = vmax.f32 %v629_v8, 0.0 }
 0x11f   :  { %v632_v14 = vpop.f32.mrf.mxu1 }
 0x120   :  { %709 = vst.msk [vmem:[%s1233_s2 + $0x28] sm:$0xff] %vm1187_vm2, %v809_v11  ;;  %v650_v16 = vmax.f32 %v631_v12, 0.0  ;;  %v633_v17 = vadd.f32 %v632_v14, %v559_v13  ;;  %v561_v18 = vpop.f32.mrf.mxu0 }
 0x121   :  { %v634_v19 = vpop.f32.mrf.mxu1 }
 0x122   :  { %v810_v20 = vpack.c.bf16 %v650_v16, %v649_v15  ;;  %v635_v21 = vadd.f32 %v634_v19, %v561_v18  ;;  %v651_v22 = vmax.f32 %v633_v17, 0.0 }
 0x124   :  { %710 = vst.msk [vmem:[%s1233_s2 + $0x30] sm:$0xff] %vm1187_vm2, %v810_v20  ;;  %v652_v23 = vmax.f32 %v635_v21, 0.0 }
 0x126   :  { %v811_v24 = vpack.c.bf16 %v652_v23, %v651_v22 }
 0x128   :  { %711 = vst.msk [vmem:[%s1233_s2 + $0x38] sm:$0xff] %vm1187_vm2, %v811_v24 }

// kernel: dueling_dqn_forward.6
= control target key start
LH: loop header
LB: loop body
LE: loop exit
PB: predicated region body
PF: predicated region fallthrough
CT: control target
= control target key end

     0   :  { %vm424_vm0 = vcmask 523264   ;;  %vm672_vm1 = vcmask 797696   ;;  %s1152_s1 = inlined_call_operand.vmem [shape: bf16[576,98], index: 1, kind: input, shape index: {}]   ;;  %s1153_s0 = inlined_call_operand.vmem [shape: bf16[64,576], index: 0, kind: input, shape index: {}]   ;;  %s1154_s2 = inlined_call_operand.vmem [shape: bf16[64,98], index: 2, kind: output, shape index: {}]  }
   0x1   :  { %v873_v0 = vld [vmem:[%s1152_s1 + $0x78] sm:$0xff]   ;;  %v877_v4 = vld [vmem:[%s1152_s1 + $0x70] sm:$0xff]   ;;  %v881_v8 = vld [vmem:[%s1152_s1 + $0x68] sm:$0xff]  }
   0x2   :  { %v874_v1 = vld [vmem:[%s1152_s1 + $0xf8] sm:$0xff]   ;;  %761 = vmatprep.subr.bf16.mxu0 %v873_v0  ;;  %v878_v5 = vld [vmem:[%s1152_s1 + $0xf0] sm:$0xff]   ;;  %v882_v9 = vld [vmem:[%s1152_s1 + $0xe8] sm:$0xff]  }
   0x3   :  { %v875_v2 = vld [vmem:[%s1152_s1 + $0x38] sm:$0xff]   ;;  %801 = vmatprep.subr.bf16.mxu1 %v874_v1  ;;  %v879_v6 = vld [vmem:[%s1152_s1 + $0x30] sm:$0xff]   ;;  %v883_v10 = vld [vmem:[%s1152_s1 + $0x28] sm:$0xff]  }
   0x4   :  { %v876_v3 = vld [vmem:[%s1152_s1 + $0xb8] sm:$0xff]   ;;  %762 = vmatpush3.bf16.msra.mxu0 %v875_v2  ;;  %v880_v7 = vld [vmem:[%s1152_s1 + $0xb0] sm:$0xff]   ;;  %v884_v11 = vld [vmem:[%s1152_s1 + $0xa8] sm:$0xff]  }
   0x5   :  { %802 = vmatpush3.bf16.msra.mxu1 %v876_v3  ;;  %763 = vmatprep.subr.bf16.mxu0 %v877_v4  ;;  %v885_v12 = vld [vmem:[%s1152_s1 + $0x60] sm:$0xff]   ;;  %v889_v16 = vld [vmem:[%s1152_s1 + $0x58] sm:$0xff]   ;;  %v893_v20 = vld [vmem:[%s1152_s1 + $0x50] sm:$0xff]  }
   0x6   :  { %803 = vmatprep.subr.bf16.mxu1 %v878_v5  ;;  %v886_v13 = vld [vmem:[%s1152_s1 + $0xe0] sm:$0xff]   ;;  %v890_v17 = vld [vmem:[%s1152_s1 + $0xd8] sm:$0xff]   ;;  %v894_v21 = vld [vmem:[%s1152_s1 + $0xd0] sm:$0xff]  }
   0x7   :  { %v887_v14 = vld [vmem:[%s1152_s1 + $0x20] sm:$0xff]   ;;  %v891_v18 = vld [vmem:[%s1152_s1 + $0x18] sm:$0xff]   ;;  %v895_v22 = vld [vmem:[%s1152_s1 + $0x10] sm:$0xff]  }
   0x8   :  { %764 = vmatpush3.bf16.msra.mxu0 %v879_v6  ;;  %v888_v15 = vld [vmem:[%s1152_s1 + $0xa0] sm:$0xff]   ;;  %v892_v19 = vld [vmem:[%s1152_s1 + $0x98] sm:$0xff]   ;;  %v896_v23 = vld [vmem:[%s1152_s1 + $0x90] sm:$0xff]  }
   0x9   :  { %804 = vmatpush3.bf16.msra.mxu1 %v880_v7  ;;  %765 = vmatprep.subr.bf16.mxu0 %v881_v8  ;;  %v897_v24 = vld [vmem:[%s1152_s1 + $0x48] sm:$0xff]   ;;  %v901_v28 = vld [vmem:[%s1152_s1 + $0x40] sm:$0xff]   ;;  %v911_v36 = vld [vmem:[%s1152_s1 + $0x118] sm:$0xff]  }
   0xa   :  { %805 = vmatprep.subr.bf16.mxu1 %v882_v9  ;;  %v898_v25 = vld [vmem:[%s1152_s1 + $0xc8] sm:$0xff]   ;;  %v902_v29 = vld [vmem:[%s1152_s1 + $0xc0] sm:$0xff]   ;;  %v918_v39 = vld [vmem:[%s1152_s1 + $0x110] sm:$0xff]  }
   0xb   :  { %v899_v26 = vld [vmem:[%s1152_s1 + $0x8] sm:$0xff]   ;;  %v903_v30 = vld [vmem:[%s1152_s1] sm:$0xff]   ;;  %v921_v43 = vld [vmem:[%s1153_s0 + $0x5c] ss:$20 sps:$4 sm:$0xff]  }
   0xc   :  { %766 = vmatpush3.bf16.msra.mxu0 %v883_v10  ;;  %v900_v27 = vld [vmem:[%s1152_s1 + $0x88] sm:$0xff]   ;;  %v904_v31 = vld [vmem:[%s1152_s1 + $0x80] sm:$0xff]   ;;  %v926_v48 = vld [vmem:[%s1153_s0 + $0x7c] ss:$20 sps:$4 sm:$0xff]  }
   0xd   :  { %806 = vmatpush3.bf16.msra.mxu1 %v884_v11  ;;  %767 = vmatprep.subr.bf16.mxu0 %v885_v12  ;;  %v905_v32 = vld [vmem:[%s1153_s0] ss:$20 sps:$4 sm:$0xff]   ;;  %v907_v33 = vld [vmem:[%s1153_s0 + $0x4] ss:$20 sps:$4 sm:$0xff]   ;;  %v908_v34 = vld [vmem:[%s1153_s0 + $0x8] ss:$20 sps:$4 sm:$0xff]  }
   0xe   :  { %807 = vmatprep.subr.bf16.mxu1 %v886_v13  ;;  %v910_v35 = vld [vmem:[%s1153_s0 + $0xc] ss:$20 sps:$4 sm:$0xff]   ;;  %469 = vmatprep.mubr.bf16.mxu0 %v907_v33  ;;  %v914_v38 = vld [vmem:[%s1153_s0 + $0x34] ss:$20 sps:$4 sm:$0xff]   ;;  %v917_v41 = vld [vmem:[%s1153_s0 + $0x30] ss:$20 sps:$4 sm:$0xff]  }
   0xf   :  { %534 = vmatprep.mubr.bf16.mxu1 %v910_v35  ;;  %v912_v37 = vld [vmem:[%s1153_s0 + $0x2c] ss:$20 sps:$4 sm:$0xff]   ;;  %v916_v40 = vld [vmem:[%s1153_s0 + $0x28] ss:$20 sps:$4 sm:$0xff]   ;;  %v923_v46 = vld [vmem:[%s1153_s0 + $0x50] ss:$20 sps:$4 sm:$0xff]  }
  0x10   :  { %768 = vmatpush3.bf16.msra.mxu0 %v887_v14  ;;  %v919_v42 = vld [vmem:[%s1153_s0 + $0x54] ss:$20 sps:$4 sm:$0xff]   ;;  %v932_v45 = vld [vmem:[%s1152_s1 + $0x100] sm:$0xff]   ;;  %v924_v47 = vld [vmem:[%s1153_s0 + $0x58] ss:$20 sps:$4 sm:$0xff]  }
  0x11   :  { %808 = vmatpush3.bf16.msra.mxu1 %v888_v15  ;;  %769 = vmatprep.subr.bf16.mxu0 %v889_v16  ;;  %v925_v44 = vld [vmem:[%s1152_s1 + $0x108] sm:$0xff]   ;;  %v928_v49 = vld [vmem:[%s1153_s0 + $0x84] ss:$20 sps:$4 sm:$0xff]   ;;  %v931_v51 = vld [vmem:[%s1153_s0 + $0x80] ss:$20 sps:$4 sm:$0xff]  }
  0x12   :  { %809 = vmatprep.subr.bf16.mxu1 %v890_v17  ;;  %v930_v50 = vld [vmem:[%s1153_s0 + $0x78] ss:$20 sps:$4 sm:$0xff]   ;;  %v933_v52 = vld [vmem:[%s1153_s0 + $0x10] ss:$20 sps:$4 sm:$0xff]   ;;  %v934_v53 = vld [vmem:[%s1153_s0 + $0x60] ss:$20 sps:$4 sm:$0xff]  }
  0x13   :  { %v935_v54 = vld [vmem:[%s1153_s0 + $0x38] ss:$20 sps:$4 sm:$0xff]   ;;  %v936_v55 = vld [vmem:[%s1153_s0 + $0x88] ss:$20 sps:$4 sm:$0xff]  }
  0x14   :  { %770 = vmatpush3.bf16.msra.mxu0 %v891_v18 }
  0x15   :  { %810 = vmatpush3.bf16.msra.mxu1 %v892_v19  ;;  %771 = vmatprep.subr.bf16.mxu0 %v893_v20 }
  0x16   :  { %811 = vmatprep.subr.bf16.mxu1 %v894_v21 }
  0x18   :  { %772 = vmatpush3.bf16.msra.mxu0 %v895_v22 }
  0x19   :  { %812 = vmatpush3.bf16.msra.mxu1 %v896_v23  ;;  %773 = vmatprep.subr.bf16.mxu0 %v897_v24 }
  0x1a   :  { %813 = vmatprep.subr.bf16.mxu1 %v898_v25 }
  0x1c   :  { %774 = vmatpush3.bf16.msra.mxu0 %v899_v26 }
  0x1d   :  { %814 = vmatpush3.bf16.msra.mxu1 %v900_v27  ;;  %775 = vmatprep.subr.bf16.mxu0 %v901_v28 }
  0x1e   :  { %815 = vmatprep.subr.bf16.mxu1 %v902_v29 }
  0x20   :  { %776 = vmatpush3.bf16.msra.mxu0 %v903_v30 }
  0x21   :  { %816 = vmatpush3.bf16.msra.mxu1 %v904_v31  ;;  %849 = vmatprep.subr.bf16.mxu0 %v911_v36 }
  0x22   :  { %865 = vmatprep.subr.bf16.mxu1 %v911_v36 }
  0x23   :  { %470 = vmatmul.mubr.bf16.vlgmr.msra.gmra.mxu0 %v905_v32 }
  0x24   :  { %535 = vmatmul.mubr.bf16.vlgmr.msra.gmra.mxu1 %v908_v34  ;;  %850 = vmatpush3.bf16.msra.mxu0 %v911_v36 }
  0x25   :  { %869 = vmatpush3.bf16.msra.mxu1 %v911_v36  ;;  %477 = vmatprep.mubr.bf16.mxu0 %v912_v37 }
  0x26   :  { %542 = vmatprep.mubr.bf16.mxu1 %v914_v38  ;;  %851 = vmatprep.subr.bf16.mxu0 %v918_v39 }
  0x27   :  { %866 = vmatprep.subr.bf16.mxu1 %v918_v39 }
  0x28   :  { %852 = vmatpush3.bf16.msra.mxu0 %v918_v39 }
  0x29   :  { %870 = vmatpush3.bf16.msra.mxu1 %v918_v39  ;;  %853 = vmatprep.subr.bf16.mxu0 %v925_v44 }
  0x2a   :  { %867 = vmatprep.subr.bf16.mxu1 %v925_v44 }
  0x2b   :  { %478 = vmatmul.mubr.bf16.gmra.mxu0 %v916_v40 }
  0x2c   :  { %543 = vmatmul.mubr.bf16.gmra.mxu1 %v917_v41  ;;  %485 = vmatprep.mubr.bf16.mxu0 %v919_v42 }
  0x2d   :  { %550 = vmatprep.mubr.bf16.mxu1 %v921_v43  ;;  %854 = vmatpush3.bf16.msra.mxu0 %v925_v44 }
  0x2e   :  { %871 = vmatpush3.bf16.msra.mxu1 %v925_v44  ;;  %855 = vmatprep.subr.bf16.mxu0 %v932_v45 }
  0x2f   :  { %868 = vmatprep.subr.bf16.mxu1 %v932_v45 }
  0x31   :  { %856 = vmatpush3.bf16.msra.mxu0 %v932_v45 }
  0x32   :  { %872 = vmatpush3.bf16.msra.mxu1 %v932_v45 }
  0x33   :  { %486 = vmatmul.mubr.bf16.gmra.mxu0 %v923_v46 }
  0x34   :  { %551 = vmatmul.mubr.bf16.gmra.mxu1 %v924_v47  ;;  %493 = vmatprep.mubr.bf16.mxu0 %v926_v48 }
  0x35   :  { %558 = vmatprep.mubr.bf16.mxu1 %v928_v49 }
  0x3b   :  { %494 = vmatmul.mubr.bf16.gmra.mxu0 %v930_v50 }
  0x3c   :  { %559 = vmatmul.mubr.bf16.gmra.mxu1 %v931_v51  ;;  %857 = vmatprep.mubr.msk.bf16.mxu0 %vm424_vm0, %v933_v52 }
  0x3d   :  { %861 = vmatprep.mubr.msk.bf16.mxu1 %vm424_vm0, %v934_v53 }
  0x43   :  { %858 = vmatmul.mubr.msk.bf16.vlgmr.msra.gmra.mxu0 %vm424_vm0, %v935_v54 }
  0x44   :  { %862 = vmatmul.mubr.msk.bf16.vlgmr.msra.gmra.mxu1 %vm424_vm0, %v936_v55 }
  0xe3   :  { %v777_v56 = vpop.f32.mrf.mxu0 }
  0xe4   :  { %v817_v57 = vpop.f32.mrf.mxu1 }
  0xe5   :  { %v778_v58 = vpop.f32.mrf.mxu0 }
  0xe6   :  { %v818_v59 = vpop.f32.mrf.mxu1  ;;  %v779_v25 = vadd.f32 %v778_v58, %v777_v56 }
  0xe7   :  { %v780_v60 = vpop.f32.mrf.mxu0  ;;  %v819_v26 = vadd.f32 %v818_v59, %v817_v57 }
  0xe8   :  { %v820_v61 = vpop.f32.mrf.mxu1 }
  0xe9   :  { %v781_v62 = vpop.f32.mrf.mxu0  ;;  %v537_v43 = vadd.f32 %v819_v26, %v779_v25 }
  0xea   :  { %v821_v63 = vpop.f32.mrf.mxu1  ;;  %v782_v39 = vadd.f32 %v781_v62, %v780_v60 }
  0xeb   :  { %v783_v0 = vpop.f32.mrf.mxu0  ;;  %v822_v40 = vadd.f32 %v821_v63, %v820_v61 }
  0xec   :  { %v823_v1 = vpop.f32.mrf.mxu1 }
  0xed   :  { %v784_v2 = vpop.f32.mrf.mxu0  ;;  %v540_v61 = vadd.f32 %v822_v40, %v782_v39 }
  0xee   :  { %v824_v3 = vpop.f32.mrf.mxu1  ;;  %v785_v19 = vadd.f32 %v784_v2, %v783_v0 }
  0xef   :  { %v786_v4 = vpop.f32.mrf.mxu0  ;;  %v825_v20 = vadd.f32 %v824_v3, %v823_v1 }
  0xf0   :  { %v826_v5 = vpop.f32.mrf.mxu1 }
  0xf1   :  { %v787_v6 = vpop.f32.mrf.mxu0  ;;  %v545_v34 = vadd.f32 %v825_v20, %v785_v19 }
  0xf2   :  { %v827_v7 = vpop.f32.mrf.mxu1  ;;  %v788_v31 = vadd.f32 %v787_v6, %v786_v4 }
  0xf3   :  { %v789_v8 = vpop.f32.mrf.mxu0  ;;  %v828_v32 = vadd.f32 %v827_v7, %v826_v5 }
  0xf4   :  { %v829_v9 = vpop.f32.mrf.mxu1 }
  0xf5   :  { %v790_v10 = vpop.f32.mrf.mxu0  ;;  %v548_v52 = vadd.f32 %v828_v32, %v788_v31 }
  0xf6   :  { %v830_v11 = vpop.f32.mrf.mxu1  ;;  %v791_v28 = vadd.f32 %v790_v10, %v789_v8 }
  0xf7   :  { %v792_v12 = vpop.f32.mrf.mxu0  ;;  %v831_v29 = vadd.f32 %v830_v11, %v829_v9 }
  0xf8   :  { %v832_v13 = vpop.f32.mrf.mxu1 }
  0xf9   :  { %v793_v14 = vpop.f32.mrf.mxu0  ;;  %v553_v48 = vadd.f32 %v831_v29, %v791_v28 }
  0xfa   :  { %v833_v15 = vpop.f32.mrf.mxu1  ;;  %v794_v44 = vadd.f32 %v793_v14, %v792_v12 }
  0xfb   :  { %v795_v16 = vpop.f32.mrf.mxu0  ;;  %v834_v45 = vadd.f32 %v833_v15, %v832_v13 }
  0xfc   :  { %v835_v17 = vpop.f32.mrf.mxu1 }
  0xfd   :  { %v796_v18 = vpop.f32.mrf.mxu0  ;;  %v556_v2 = vadd.f32 %v834_v45, %v794_v44 }
  0xfe   :  { %v836_v21 = vpop.f32.mrf.mxu1  ;;  %v797_v22 = vadd.f32 %v796_v18, %v795_v16 }
  0xff   :  { %v837_v23 = vadd.f32 %v836_v21, %v835_v17  ;;  %v798_v24 = vpop.f32.mrf.mxu0 }
 0x100   :  { %v838_v27 = vpop.f32.mrf.mxu1 }
 0x101   :  { %v799_v30 = vpop.f32.mrf.mxu0  ;;  %v561_v38 = vadd.f32 %v837_v23, %v797_v22 }
 0x102   :  { %v839_v33 = vpop.f32.mrf.mxu1  ;;  %v800_v35 = vadd.f32 %v799_v30, %v798_v24 }
 0x103   :  { %v840_v36 = vadd.f32 %v839_v33, %v838_v27  ;;  %v859_v37 = vpop.f32.mrf.mxu0 }
 0x104   :  { %v610_v41 = vadd.f32 %v859_v37, %v545_v34  ;;  %v863_v42 = vpop.f32.mrf.mxu1 }
 0x105   :  { %v626_v46 = vadd.f32 %v863_v42, %v561_v38  ;;  %v601_v47 = vpop.f32.mrf.mxu0  ;;  %v564_v56 = vadd.f32 %v840_v36, %v800_v35 }
 0x106   :  { %v634_v49 = vmax.f32 %v610_v41, 0.0  ;;  %v602_v50 = vadd.f32 %v601_v47, %v537_v43  ;;  %v617_v51 = vpop.f32.mrf.mxu1 }
 0x107   :  { %v638_v53 = vmax.f32 %v626_v46, 0.0  ;;  %v618_v54 = vadd.f32 %v617_v51, %v553_v48  ;;  %v860_v55 = vpop.f32.mrf.mxu0 }
 0x108   :  { %v755_v57 = vpack.c.bf16 %v634_v49, %v634_v49  ;;  %v632_v58 = vmax.f32 %v602_v50, 0.0  ;;  %v613_v59 = vadd.f32 %v860_v55, %v548_v52  ;;  %v864_v60 = vpop.f32.mrf.mxu1 }
 0x109   :  { %v759_v62 = vpack.c.bf16 %v638_v53, %v638_v53  ;;  %v636_v63 = vmax.f32 %v618_v54, 0.0  ;;  %v629_v0 = vadd.f32 %v864_v60, %v564_v56  ;;  %v604_v1 = vpop.f32.mrf.mxu0 }
 0x10a   :  { %675 = vst.msk [vmem:[%s1154_s2 + $0x8] sm:$0xf] %vm672_vm1, %v755_v57  ;;  %v753_v3 = vpack.c.bf16 %v632_v58, %v632_v58  ;;  %v635_v4 = vmax.f32 %v613_v59, 0.0  ;;  %v605_v5 = vadd.f32 %v604_v1, %v540_v61  ;;  %v620_v6 = vpop.f32.mrf.mxu1 }
 0x10b   :  { %679 = vst.msk [vmem:[%s1154_s2 + $0x18] sm:$0xf] %vm672_vm1, %v759_v62  ;;  %v757_v7 = vpack.c.bf16 %v636_v63, %v636_v63  ;;  %v639_v8 = vmax.f32 %v629_v0, 0.0  ;;  %v621_v9 = vadd.f32 %v620_v6, %v556_v2 }
 0x10c   :  { %673 = vst.msk [vmem:[%s1154_s2] sm:$0xf] %vm672_vm1, %v753_v3  ;;  %v756_v10 = vpack.c.bf16 %v635_v4, %v635_v4  ;;  %v633_v11 = vmax.f32 %v605_v5, 0.0 }
 0x10d   :  { %677 = vst.msk [vmem:[%s1154_s2 + $0x10] sm:$0xf] %vm672_vm1, %v757_v7  ;;  %v760_v12 = vpack.c.bf16 %v639_v8, %v639_v8  ;;  %v637_v13 = vmax.f32 %v621_v9, 0.0 }
 0x10e   :  { %676 = vst.msk [vmem:[%s1154_s2 + $0xc] sm:$0xf] %vm672_vm1, %v756_v10  ;;  %v754_v14 = vpack.c.bf16 %v633_v11, %v633_v11 }
 0x10f   :  { %680 = vst.msk [vmem:[%s1154_s2 + $0x1c] sm:$0xf] %vm672_vm1, %v760_v12  ;;  %v758_v15 = vpack.c.bf16 %v637_v13, %v637_v13 }
 0x110   :  { %674 = vst.msk [vmem:[%s1154_s2 + $0x4] sm:$0xf] %vm672_vm1, %v754_v14 }
 0x111   :  { %678 = vst.msk [vmem:[%s1154_s2 + $0x14] sm:$0xf] %vm672_vm1, %v758_v15 }

// kernel: dueling_dqn_forward.7
= control target key start
LH: loop header
LB: loop body
LE: loop exit
PB: predicated region body
PF: predicated region fallthrough
CT: control target
= control target key end

     0   :  { %s4530_s0 = inlined_call_operand.vmem [shape: bf16[2,3200], index: 0, kind: input, shape index: {}]   ;;  %s4531_s1 = inlined_call_operand.vmem [shape: bf16[3200,1024], index: 1, kind: input, shape index: {}]   ;;  %s4532_s2 = inlined_call_operand.vmem [shape: f32[1,1024], index: 2, kind: input, shape index: {}]   ;;  %s4533_s3 = inlined_call_operand.vmem [shape: f32[1,512], index: 3, kind: input, shape index: {}]   ;;  %s4534_s4 = inlined_call_operand.<no memory space> [shape: f32[1,1], index: 4, kind: input, shape index: {}]   ;;  %s4535_s5 = inlined_call_operand.vmem [shape: bf16[512,128], index: 5, kind: input, shape index: {}]   ;;  %s4536_s6 = inlined_call_operand.vmem [shape: f32[1,128], index: 6, kind: input, shape index: {}]   ;;  %s4537_s7 = inlined_call_operand.hbm [shape: f32[2,128], index: 7, kind: output, shape index: {}]  }
   0x1   :  { %v12_v0 = vstv %s4534_s4 }
   0x2   :  { %13 = vst [vmem:[#allocation3] sm:$0x1] %v12_v0 }
   0x3   :  { %14 = vsyncpa [#allocation5], 0  ;;  %s3962_s26 = smov 0  }
   0x4 LB: > { %s3968_s27 = sadd.s32 4294967295, %s3911_s26   ;;  %p3412_p0 = scmp.ge.s32.totalorder %s3911_s26, 1  ;;  %s3911_s26 = sphi %s3962_s26, %s20_s26  }
   0x5   : > { %p247_p1 = scmp.lt.s32.totalorder %s3911_s26, 6 }
   0x7   : > { %p248_p2 = pnand %p3412_p0, %p247_p1 }
   0x8   : > { %s279_s4 = smul.u32 (!%p248_p2), 5, %s3968_s27  ;;  %p3415_p5 = scmp.ne.s32.totalorder (!%p248_p2), %s3968_s27, 0 }
   0x9   : > { %251 = sbr.rel (%p248_p2) target bundleno = 1014 (0x3f6), region = 48 }
   0xa   : > { %s284_s28 = smul.u32 (!%p248_p2), 80, %s3968_s27  ;;  %p280_p3 = scmp.lt.s32.totalorder (!%p248_p2), %s279_s4, 24 }
   0xc   : > { %p285_p4 = scmp.lt.s32.totalorder (!%p248_p2), %s284_s28, 399 }
   0xe   : > { %s4539_s4 = smov (!%p280_p3, %s279_s4), 24  ;;  %s4541_s28 = smov (!%p285_p4, %s284_s28), 399 }
   0xf   : > { %s282_s8 = scalar_lea.vmem %s4530_s0, %s4539_s4  ;;  %s3775_s9 = sshll.u32 %s4541_s28, 5 }
  0x10   : > { %s3983_s12 = scalar_lea.vmem %s4531_s1, %s3775_s9  ;;  %295 = sbr.rel (%p3415_p5) target bundleno = 23 (0x17), region = 52 }
  0x15   : > { %v3913_v1 = vmov 0.0  }
  0x16   : > { %296 = vst [vmem:[#allocation2] sm:$0xff] %v3913_v1  ;;  %297 = vst [vmem:[#allocation2 + $0x8] sm:$0xff] %v3913_v1 }
  0x17 PF: > { %v357_v2 = vld [vmem:[%s3983_s12 + $0x1c0] sm:$0xff]  ;;  %v3914_v34 = vmov 1966171168   ;;  %v626_v36 = vlaneseq  ;;  %p3736_p6 = scmp.ne.s32.totalorder %s3968_s27, 4 }
  0x18   : > { %v361_v3 = vld [vmem:[%s3983_s12 + $0x1e0] sm:$0xff]  ;;  %v624_v35 = vunpack.c.l.s4 %v3914_v34 }
  0x19   : > { %v485_v4 = vld [vmem:[%s3983_s12 + $0x5c0] sm:$0xff]  ;;  %v3473_v5 = vcombine.high %v357_v2, %v361_v3  ;;  %v3472_v7 = vcombine.low %v357_v2, %v361_v3  ;;  %v4008_v46 = vshrl.u32 %v626_v36, 7 }
  0x1a   : > { %v489_v6 = vld [vmem:[%s3983_s12 + $0x5e0] sm:$0xff]  ;;  %v625_v45 = vunpack.c.0.s8 %v624_v35 }
  0x1b   : > { %v349_v8 = vld [vmem:[%s3983_s12 + $0x180] sm:$0xff]  ;;  %v3601_v10 = vcombine.high %v485_v4, %v489_v6  ;;  %v3600_v11 = vcombine.low %v485_v4, %v489_v6  ;;  %2266 = vmatprep.subr.bf16.mxu0 %v3473_v5 }
  0x1c   : > { %v353_v9 = vld [vmem:[%s3983_s12 + $0x1a0] sm:$0xff]  ;;  %2267 = vmatpush1.bf16.msra.mxu0 %v3472_v7  ;;  %v4015_v55 = vsub.s32 %v625_v45, %v4008_v46 }
  0x1d   : > { %v3465_v12 = vcombine.high %v349_v8, %v353_v9  ;;  %v477_v13 = vld [vmem:[%s3983_s12 + $0x580] sm:$0xff]  ;;  %2307 = vmatprep.subr.bf16.mxu1 %v3601_v10  ;;  %v3464_v20 = vcombine.low %v349_v8, %v353_v9 }
  0x1e   : > { %v481_v14 = vld [vmem:[%s3983_s12 + $0x5a0] sm:$0xff]  ;;  %2308 = vmatpush1.bf16.msra.mxu1 %v3600_v11 }
  0x1f   : > { %v341_v15 = vld [vmem:[%s3983_s12 + $0x140] sm:$0xff]  ;;  %v3593_v16 = vcombine.high %v477_v13, %v481_v14  ;;  %2268 = vmatprep.subr.bf16.mxu0 %v3465_v12  ;;  %v3592_v21 = vcombine.low %v477_v13, %v481_v14 }
  0x20   : > { %v345_v17 = vld [vmem:[%s3983_s12 + $0x160] sm:$0xff]  ;;  %2269 = vmatpush1.bf16.msra.mxu0 %v3464_v20 }
  0x21   : > { %v469_v18 = vld [vmem:[%s3983_s12 + $0x540] sm:$0xff]  ;;  %v3457_v22 = vcombine.high %v341_v15, %v345_v17  ;;  %2309 = vmatprep.subr.bf16.mxu1 %v3593_v16  ;;  %v3456_v28 = vcombine.low %v341_v15, %v345_v17 }
  0x22   : > { %v473_v19 = vld [vmem:[%s3983_s12 + $0x560] sm:$0xff]  ;;  %2310 = vmatpush1.bf16.msra.mxu1 %v3592_v21 }
  0x23   : > { %v3585_v23 = vcombine.high %v469_v18, %v473_v19  ;;  %v333_v24 = vld [vmem:[%s3983_s12 + $0x100] sm:$0xff]  ;;  %2270 = vmatprep.subr.bf16.mxu0 %v3457_v22  ;;  %v3584_v29 = vcombine.low %v469_v18, %v473_v19 }
  0x24   : > { %v337_v25 = vld [vmem:[%s3983_s12 + $0x120] sm:$0xff]  ;;  %2271 = vmatpush1.bf16.msra.mxu0 %v3456_v28 }
  0x25   : > { %v461_v26 = vld [vmem:[%s3983_s12 + $0x500] sm:$0xff]  ;;  %v3449_v30 = vcombine.high %v333_v24, %v337_v25  ;;  %2311 = vmatprep.subr.bf16.mxu1 %v3585_v23  ;;  %v3448_v39 = vcombine.low %v333_v24, %v337_v25 }
  0x26   : > { %v465_v27 = vld [vmem:[%s3983_s12 + $0x520] sm:$0xff]  ;;  %2312 = vmatpush1.bf16.msra.mxu1 %v3584_v29 }
  0x27   : > { %v3577_v31 = vcombine.high %v461_v26, %v465_v27  ;;  %v325_v32 = vld [vmem:[%s3983_s12 + $0xc0] sm:$0xff]  ;;  %2272 = vmatprep.subr.bf16.mxu0 %v3449_v30  ;;  %v3576_v40 = vcombine.low %v461_v26, %v465_v27 }
  0x28   : > { %v329_v33 = vld [vmem:[%s3983_s12 + $0xe0] sm:$0xff]  ;;  %2273 = vmatpush1.bf16.msra.mxu0 %v3448_v39 }
  0x29   : > { %v453_v37 = vld [vmem:[%s3983_s12 + $0x4c0] sm:$0xff]  ;;  %v3441_v41 = vcombine.high %v325_v32, %v329_v33  ;;  %2313 = vmatprep.subr.bf16.mxu1 %v3577_v31  ;;  %v3440_v49 = vcombine.low %v325_v32, %v329_v33 }
  0x2a   : > { %v457_v38 = vld [vmem:[%s3983_s12 + $0x4e0] sm:$0xff]  ;;  %2314 = vmatpush1.bf16.msra.mxu1 %v3576_v40 }
  0x2b   : > { %v3569_v42 = vcombine.high %v453_v37, %v457_v38  ;;  %v317_v43 = vld [vmem:[%s3983_s12 + $0x80] sm:$0xff]  ;;  %2274 = vmatprep.subr.bf16.mxu0 %v3441_v41  ;;  %v3568_v50 = vcombine.low %v453_v37, %v457_v38 }
  0x2c   : > { %v321_v44 = vld [vmem:[%s3983_s12 + $0xa0] sm:$0xff]  ;;  %2275 = vmatpush1.bf16.msra.mxu0 %v3440_v49 }
  0x2d   : > { %v445_v47 = vld [vmem:[%s3983_s12 + $0x480] sm:$0xff]  ;;  %v3433_v51 = vcombine.high %v317_v43, %v321_v44  ;;  %2315 = vmatprep.subr.bf16.mxu1 %v3569_v42  ;;  %v3432_v58 = vcombine.low %v317_v43, %v321_v44 }
  0x2e   : > { %v449_v48 = vld [vmem:[%s3983_s12 + $0x4a0] sm:$0xff]  ;;  %2316 = vmatpush1.bf16.msra.mxu1 %v3568_v50 }
  0x2f   : > { %v3561_v52 = vcombine.high %v445_v47, %v449_v48  ;;  %v309_v53 = vld [vmem:[%s3983_s12 + $0x40] sm:$0xff]  ;;  %2276 = vmatprep.subr.bf16.mxu0 %v3433_v51  ;;  %v3560_v59 = vcombine.low %v445_v47, %v449_v48 }
  0x30   : > { %v313_v54 = vld [vmem:[%s3983_s12 + $0x60] sm:$0xff]  ;;  %2277 = vmatpush1.bf16.msra.mxu0 %v3432_v58 }
  0x31   : > { %v437_v56 = vld [vmem:[%s3983_s12 + $0x440] sm:$0xff]  ;;  %v3425_v60 = vcombine.high %v309_v53, %v313_v54  ;;  %2317 = vmatprep.subr.bf16.mxu1 %v3561_v52  ;;  %v3424_v4 = vcombine.low %v309_v53, %v313_v54 }
  0x32   : > { %v441_v57 = vld [vmem:[%s3983_s12 + $0x460] sm:$0xff]  ;;  %2318 = vmatpush1.bf16.msra.mxu1 %v3560_v59 }
  0x33   : > { %v300_v61 = vld [vmem:[%s282_s8] sm:$0x1f]  ;;  %v3553_v62 = vcombine.high %v437_v56, %v441_v57  ;;  %2278 = vmatprep.subr.bf16.mxu0 %v3425_v60  ;;  %v3552_v6 = vcombine.low %v437_v56, %v441_v57 }
  0x34   : > { %v301_v63 = vld [vmem:[%s3983_s12] sm:$0xff]  ;;  %v4027_v1 = vrot.slane %v300_v61, %v4015_v55  ;;  %2279 = vmatpush1.bf16.msra.mxu0 %v3424_v4  ;;  %v622_v16 = vcombine.high %v300_v61, %v300_v61 }
  0x35   : > { %v305_v0 = vld [vmem:[%s3983_s12 + $0x20] sm:$0xff]  ;;  %2319 = vmatprep.subr.bf16.mxu1 %v3553_v62 }
  0x36   : > { %v429_v2 = vld [vmem:[%s3983_s12 + $0x400] sm:$0xff]  ;;  %v637_v5 = vcombine.high %v4027_v1, %v4027_v1  ;;  %v3417_v7 = vcombine.high %v301_v63, %v305_v0  ;;  %v3416_v14 = vcombine.low %v301_v63, %v305_v0  ;;  %2320 = vmatpush1.bf16.msra.mxu1 %v3552_v6  ;;  %v636_v25 = vrot.slane %v622_v16, %v4015_v55 }
  0x37   : > { %v433_v3 = vld [vmem:[%s3983_s12 + $0x420] sm:$0xff] }
  0x38   : > { %v3545_v8 = vcombine.high %v429_v2, %v433_v3  ;;  %v421_v9 = vld [vmem:[%s3983_s12 + $0x3c0] sm:$0xff]  ;;  %v4036_v11 = vrot.slane %v637_v5, %v4015_v55  ;;  %2280 = vmatprep.subr.bf16.mxu0 %v3417_v7  ;;  %v3544_v17 = vcombine.low %v429_v2, %v433_v3  ;;  %v4054_v31 = vrot.slane %v636_v25, %v4015_v55 }
  0x39   : > { %v425_v10 = vld [vmem:[%s3983_s12 + $0x3e0] sm:$0xff]  ;;  %2281 = vmatpush1.bf16.msra.mxu0 %v3416_v14 }
  0x3a   : > { %v549_v12 = vld [vmem:[%s3983_s12 + $0x7c0] sm:$0xff]  ;;  %2298 = vmatprep.mubr.bf16.mxu0 %v4036_v11  ;;  %v4043_v15 = vcombine.high %v4036_v11, %v4036_v11  ;;  %v3537_v18 = vcombine.high %v421_v9, %v425_v10  ;;  %2321 = vmatprep.subr.bf16.mxu1 %v3545_v8  ;;  %v3536_v24 = vcombine.low %v421_v9, %v425_v10 }
  0x3b   : > { %v553_v13 = vld [vmem:[%s3983_s12 + $0x7e0] sm:$0xff]  ;;  %2322 = vmatpush1.bf16.msra.mxu1 %v3544_v17 }
  0x3c   : > { %v3665_v19 = vcombine.high %v549_v12, %v553_v13  ;;  %v413_v20 = vld [vmem:[%s3983_s12 + $0x380] sm:$0xff]  ;;  %2339 = vmatprep.mubr.bf16.mxu1 %v4043_v15  ;;  %2282 = vmatprep.subr.bf16.mxu0 %v3537_v18  ;;  %v3664_v26 = vcombine.low %v549_v12, %v553_v13 }
  0x3d   : > { %v417_v21 = vld [vmem:[%s3983_s12 + $0x3a0] sm:$0xff]  ;;  %2283 = vmatpush2.bf16.msra.mxu0 %v3536_v24  ;;  %v4084_v24 = vrot.slane %v4027_v1, %v4015_v55 }
  0x3e   : > { %v541_v22 = vld [vmem:[%s3983_s12 + $0x780] sm:$0xff]  ;;  %v3529_v27 = vcombine.high %v413_v20, %v417_v21  ;;  %2323 = vmatprep.subr.bf16.mxu1 %v3665_v19  ;;  %v3528_v34 = vcombine.low %v413_v20, %v417_v21  ;;  %v358_v21 = vld [vmem:[%s3983_s12 + $0x1c8] sm:$0xff] }
  0x3f   : > { %v545_v23 = vld [vmem:[%s3983_s12 + $0x7a0] sm:$0xff]  ;;  %2324 = vmatpush2.bf16.msra.mxu1 %v3664_v26 }
  0x40   : > { %v3657_v28 = vcombine.high %v541_v22, %v545_v23  ;;  %v405_v29 = vld [vmem:[%s3983_s12 + $0x340] sm:$0xff]  ;;  %2284 = vmatprep.subr.bf16.mxu0 %v3529_v27  ;;  %v3656_v35 = vcombine.low %v541_v22, %v545_v23  ;;  %v362_v22 = vld [vmem:[%s3983_s12 + $0x1e8] sm:$0xff] }
  0x41   : > { %v409_v30 = vld [vmem:[%s3983_s12 + $0x360] sm:$0xff]  ;;  %2285 = vmatpush2.bf16.msra.mxu0 %v3528_v34  ;;  %v3475_v27 = vcombine.high %v358_v21, %v362_v22  ;;  %v3474_v1 = vcombine.low %v358_v21, %v362_v22  ;;  %v306_v21 = vld [vmem:[%s3983_s12 + $0x28] sm:$0xff] }
  0x42   : > { %v533_v32 = vld [vmem:[%s3983_s12 + $0x740] sm:$0xff]  ;;  %v3521_v36 = vcombine.high %v405_v29, %v409_v30  ;;  %2325 = vmatprep.subr.bf16.mxu1 %v3657_v28  ;;  %v3520_v42 = vcombine.low %v405_v29, %v409_v30  ;;  %v350_v30 = vld [vmem:[%s3983_s12 + $0x188] sm:$0xff] }
  0x43   : > { %v537_v33 = vld [vmem:[%s3983_s12 + $0x760] sm:$0xff]  ;;  %2326 = vmatpush2.bf16.msra.mxu1 %v3656_v35 }
  0x44   : > { %v3649_v37 = vcombine.high %v533_v32, %v537_v33  ;;  %v397_v38 = vld [vmem:[%s3983_s12 + $0x300] sm:$0xff]  ;;  %2286 = vmatprep.subr.bf16.mxu0 %v3521_v36  ;;  %v3648_v43 = vcombine.low %v533_v32, %v537_v33  ;;  %v354_v32 = vld [vmem:[%s3983_s12 + $0x1a8] sm:$0xff]  ;;  %v4092_v33 = vcombine.high %v4084_v24, %v4084_v24 }
  0x45   : > { %v401_v39 = vld [vmem:[%s3983_s12 + $0x320] sm:$0xff]  ;;  %2287 = vmatpush2.bf16.msra.mxu0 %v3520_v42  ;;  %v3467_v35 = vcombine.high %v350_v30, %v354_v32 }
  0x46   : > { %v525_v40 = vld [vmem:[%s3983_s12 + $0x700] sm:$0xff]  ;;  %v3513_v44 = vcombine.high %v397_v38, %v401_v39  ;;  %2327 = vmatprep.subr.bf16.mxu1 %v3649_v37  ;;  %v3512_v51 = vcombine.low %v397_v38, %v401_v39  ;;  %v342_v38 = vld [vmem:[%s3983_s12 + $0x148] sm:$0xff] }
  0x47   : > { %v529_v41 = vld [vmem:[%s3983_s12 + $0x720] sm:$0xff]  ;;  %2328 = vmatpush2.bf16.msra.mxu1 %v3648_v43  ;;  %v346_v39 = vld [vmem:[%s3983_s12 + $0x168] sm:$0xff] }
  0x48   : > { %v3641_v45 = vcombine.high %v525_v40, %v529_v41  ;;  %v389_v47 = vld [vmem:[%s3983_s12 + $0x2c0] sm:$0xff]  ;;  %2288 = vmatprep.subr.bf16.mxu0 %v3513_v44  ;;  %v3640_v52 = vcombine.low %v525_v40, %v529_v41  ;;  %v3466_v41 = vcombine.low %v350_v30, %v354_v32  ;;  %v3459_v43 = vcombine.high %v342_v38, %v346_v39  ;;  %v426_v30 = vld [vmem:[%s3983_s12 + $0x3e8] sm:$0xff] }
  0x49   : > { %v393_v48 = vld [vmem:[%s3983_s12 + $0x2e0] sm:$0xff]  ;;  %2289 = vmatpush2.bf16.msra.mxu0 %v3512_v51  ;;  %v3458_v51 = vcombine.low %v342_v38, %v346_v39  ;;  %v418_v38 = vld [vmem:[%s3983_s12 + $0x3a8] sm:$0xff] }
  0x4a   : > { %v517_v49 = vld [vmem:[%s3983_s12 + $0x6c0] sm:$0xff]  ;;  %v3505_v53 = vcombine.high %v389_v47, %v393_v48  ;;  %2329 = vmatprep.subr.bf16.mxu1 %v3641_v45  ;;  %v3504_v60 = vcombine.low %v389_v47, %v393_v48  ;;  %v3915_v47 = vmov 0   ;;  %v334_v48 = vld [vmem:[%s3983_s12 + $0x108] sm:$0xff] }
  0x4b   : > { %v521_v50 = vld [vmem:[%s3983_s12 + $0x6e0] sm:$0xff]  ;;  %2330 = vmatpush2.bf16.msra.mxu1 %v3640_v52 }
  0x4c   : > { %v3633_v54 = vcombine.high %v517_v49, %v521_v50  ;;  %v381_v56 = vld [vmem:[%s3983_s12 + $0x280] sm:$0xff]  ;;  %2290 = vmatprep.subr.bf16.mxu0 %v3505_v53  ;;  %v3632_v61 = vcombine.low %v517_v49, %v521_v50  ;;  %v338_v49 = vld [vmem:[%s3983_s12 + $0x128] sm:$0xff] }
  0x4d   : > { %v385_v57 = vld [vmem:[%s3983_s12 + $0x2a0] sm:$0xff]  ;;  %2291 = vmatpush2.bf16.msra.mxu0 %v3504_v60  ;;  %v3451_v53 = vcombine.high %v334_v48, %v338_v49  ;;  %v3450_v60 = vcombine.low %v334_v48, %v338_v49  ;;  %v410_v48 = vld [vmem:[%s3983_s12 + $0x368] sm:$0xff] }
  0x4e   : > { %v509_v58 = vld [vmem:[%s3983_s12 + $0x680] sm:$0xff]  ;;  %v3497_v62 = vcombine.high %v381_v56, %v385_v57  ;;  %2331 = vmatprep.subr.bf16.mxu1 %v3633_v54  ;;  %v3496_v5 = vcombine.low %v381_v56, %v385_v57  ;;  %v326_v57 = vld [vmem:[%s3983_s12 + $0xc8] sm:$0xff] }
  0x4f   : > { %v513_v59 = vld [vmem:[%s3983_s12 + $0x6a0] sm:$0xff]  ;;  %2332 = vmatpush2.bf16.msra.mxu1 %v3632_v61 }
  0x50   : > { %v3625_v63 = vcombine.high %v509_v58, %v513_v59  ;;  %v373_v0 = vld [vmem:[%s3983_s12 + $0x240] sm:$0xff]  ;;  %2292 = vmatprep.subr.bf16.mxu0 %v3497_v62  ;;  %v3624_v6 = vcombine.low %v509_v58, %v513_v59  ;;  %v330_v58 = vld [vmem:[%s3983_s12 + $0xe8] sm:$0xff] }
  0x51   : > { %v377_v2 = vld [vmem:[%s3983_s12 + $0x260] sm:$0xff]  ;;  %2293 = vmatpush2.bf16.msra.mxu0 %v3496_v5  ;;  %v3443_v62 = vcombine.high %v326_v57, %v330_v58  ;;  %v3442_v5 = vcombine.low %v326_v57, %v330_v58  ;;  %v402_v57 = vld [vmem:[%s3983_s12 + $0x328] sm:$0xff] }
  0x52   : > { %v501_v3 = vld [vmem:[%s3983_s12 + $0x640] sm:$0xff]  ;;  %v3489_v7 = vcombine.high %v373_v0, %v377_v2  ;;  %2333 = vmatprep.subr.bf16.mxu1 %v3625_v63  ;;  %v3488_v14 = vcombine.low %v373_v0, %v377_v2  ;;  %v318_v2 = vld [vmem:[%s3983_s12 + $0x88] sm:$0xff] }
  0x53   : > { %v505_v4 = vld [vmem:[%s3983_s12 + $0x660] sm:$0xff]  ;;  %2334 = vmatpush2.bf16.msra.mxu1 %v3624_v6 }
  0x54   : > { %v3617_v8 = vcombine.high %v501_v3, %v505_v4  ;;  %v365_v9 = vld [vmem:[%s3983_s12 + $0x200] sm:$0xff]  ;;  %2294 = vmatprep.subr.bf16.mxu0 %v3489_v7  ;;  %v3616_v16 = vcombine.low %v501_v3, %v505_v4  ;;  %v322_v3 = vld [vmem:[%s3983_s12 + $0xa8] sm:$0xff] }
  0x55   : > { %v369_v10 = vld [vmem:[%s3983_s12 + $0x220] sm:$0xff]  ;;  %2295 = vmatpush2.bf16.msra.mxu0 %v3488_v14  ;;  %v3435_v7 = vcombine.high %v318_v2, %v322_v3  ;;  %v3434_v14 = vcombine.low %v318_v2, %v322_v3  ;;  %v394_v2 = vld [vmem:[%s3983_s12 + $0x2e8] sm:$0xff] }
  0x56   : > { %v493_v12 = vld [vmem:[%s3983_s12 + $0x600] sm:$0xff]  ;;  %v3481_v17 = vcombine.high %v365_v9, %v369_v10  ;;  %2335 = vmatprep.subr.bf16.mxu1 %v3617_v8  ;;  %v3480_v23 = vcombine.low %v365_v9, %v369_v10  ;;  %v310_v10 = vld [vmem:[%s3983_s12 + $0x48] sm:$0xff] }
  0x57   : > { %v497_v13 = vld [vmem:[%s3983_s12 + $0x620] sm:$0xff]  ;;  %2336 = vmatpush2.bf16.msra.mxu1 %v3616_v16 }
  0x58   : > { %v3609_v18 = vcombine.high %v493_v12, %v497_v13  ;;  %v613_v19 = vld [vmem:[%s3983_s12 + $0x9c0] sm:$0xff]  ;;  %2296 = vmatprep.subr.bf16.mxu0 %v3481_v17  ;;  %v3608_v25 = vcombine.low %v493_v12, %v497_v13  ;;  %v314_v12 = vld [vmem:[%s3983_s12 + $0x68] sm:$0xff] }
  0x59   : > { %v617_v20 = vld [vmem:[%s3983_s12 + $0x9e0] sm:$0xff]  ;;  %2297 = vmatpush2.bf16.msra.mxu0 %v3480_v23  ;;  %v3427_v17 = vcombine.high %v310_v10, %v314_v12  ;;  %v3426_v23 = vcombine.low %v310_v10, %v314_v12  ;;  %v386_v10 = vld [vmem:[%s3983_s12 + $0x2a8] sm:$0xff] }
  0x5a   : > { %v3729_v26 = vcombine.high %v613_v19, %v617_v20  ;;  %2337 = vmatprep.subr.bf16.mxu1 %v3609_v18  ;;  %v605_v28 = vld [vmem:[%s3983_s12 + $0x980] sm:$0xff]  ;;  %v3728_v55 = vcombine.low %v613_v19, %v617_v20  ;;  %v302_v20 = vld [vmem:[%s3983_s12 + $0x8] sm:$0xff] }
  0x5b   : > { %v609_v29 = vld [vmem:[%s3983_s12 + $0x9a0] sm:$0xff]  ;;  %2338 = vmatpush2.bf16.msra.mxu1 %v3608_v25 }
  0x5c   : > { %2348 = vmatprep.subr.bf16.mxu0 %v3729_v26  ;;  %v3721_v34 = vcombine.high %v605_v28, %v609_v29  ;;  %2389 = vmatprep.subr.bf16.mxu1 %v3475_v27  ;;  %v597_v36 = vld [vmem:[%s3983_s12 + $0x940] sm:$0xff]  ;;  %v3720_v40 = vcombine.low %v605_v28, %v609_v29  ;;  %v3419_v26 = vcombine.high %v302_v20, %v306_v21  ;;  %v486_v27 = vld [vmem:[%s3983_s12 + $0x5c8] sm:$0xff] }
  0x5d   : > { %v601_v37 = vld [vmem:[%s3983_s12 + $0x960] sm:$0xff]  ;;  %2299 = vmatmul.mubr.bf16.vlgmr.msra.gmra.mxu0 %v4084_v24  ;;  %v490_v28 = vld [vmem:[%s3983_s12 + $0x5e8] sm:$0xff] }
  0x5e   : > { %2340 = vmatmul.mubr.bf16.vlgmr.msra.gmra.mxu1 %v4092_v33  ;;  %2349 = vmatpush1.bf16.msra.mxu0 %v3728_v55  ;;  %v3713_v42 = vcombine.high %v597_v36, %v601_v37  ;;  %v589_v44 = vld [vmem:[%s3983_s12 + $0x900] sm:$0xff]  ;;  %v3712_v50 = vcombine.low %v597_v36, %v601_v37  ;;  %v422_v29 = vld [vmem:[%s3983_s12 + $0x3c8] sm:$0xff]  ;;  %v3418_v55 = vcombine.low %v302_v20, %v306_v21 }
  0x5f   : > { %2390 = vmatpush1.bf16.msra.mxu1 %v3474_v1  ;;  %2350 = vmatprep.subr.bf16.mxu0 %v3721_v34  ;;  %v593_v45 = vld [vmem:[%s3983_s12 + $0x920] sm:$0xff]  ;;  %v3603_v1 = vcombine.high %v486_v27, %v490_v28  ;;  %v3539_v34 = vcombine.high %v422_v29, %v426_v30  ;;  %v482_v36 = vld [vmem:[%s3983_s12 + $0x5a8] sm:$0xff]  ;;  %v3602_v39 = vcombine.low %v486_v27, %v490_v28 }
  0x60   : > { %2391 = vmatprep.subr.bf16.mxu1 %v3467_v35  ;;  %2380 = vmatprep.mubr.bf16.mxu0 %v3915_v47  ;;  %v3705_v52 = vcombine.high %v589_v44, %v593_v45  ;;  %v581_v54 = vld [vmem:[%s3983_s12 + $0x8c0] sm:$0xff]  ;;  %v3704_v59 = vcombine.low %v589_v44, %v593_v45  ;;  %v478_v35 = vld [vmem:[%s3983_s12 + $0x588] sm:$0xff] }
  0x61   : > { %2421 = vmatprep.mubr.bf16.mxu1 %v4036_v11  ;;  %v585_v56 = vld [vmem:[%s3983_s12 + $0x8e0] sm:$0xff]  ;;  %v414_v37 = vld [vmem:[%s3983_s12 + $0x388] sm:$0xff]  ;;  %v3594_v49 = vcombine.low %v478_v35, %v482_v36 }
  0x62   : > { %2351 = vmatpush1.bf16.msra.mxu0 %v3720_v40  ;;  %v3697_v61 = vcombine.high %v581_v54, %v585_v56  ;;  %v573_v63 = vld [vmem:[%s3983_s12 + $0x880] sm:$0xff]  ;;  %v3696_v4 = vcombine.low %v581_v54, %v585_v56  ;;  %v3538_v40 = vcombine.low %v422_v29, %v426_v30  ;;  %v474_v44 = vld [vmem:[%s3983_s12 + $0x568] sm:$0xff] }
  0x63   : > { %2392 = vmatpush1.bf16.msra.mxu1 %v3466_v41  ;;  %2352 = vmatprep.subr.bf16.mxu0 %v3713_v42  ;;  %v577_v0 = vld [vmem:[%s3983_s12 + $0x8a0] sm:$0xff]  ;;  %v3595_v41 = vcombine.high %v478_v35, %v482_v36  ;;  %v3531_v42 = vcombine.high %v414_v37, %v418_v38  ;;  %v406_v45 = vld [vmem:[%s3983_s12 + $0x348] sm:$0xff] }
  0x64   : > { %2393 = vmatprep.subr.bf16.mxu1 %v3459_v43  ;;  %v3689_v6 = vcombine.high %v573_v63, %v577_v0  ;;  %v565_v8 = vld [vmem:[%s3983_s12 + $0x840] sm:$0xff]  ;;  %v3688_v13 = vcombine.low %v573_v63, %v577_v0  ;;  %v470_v43 = vld [vmem:[%s3983_s12 + $0x548] sm:$0xff] }
  0x65   : > { %v569_v9 = vld [vmem:[%s3983_s12 + $0x860] sm:$0xff]  ;;  %v466_v54 = vld [vmem:[%s3983_s12 + $0x528] sm:$0xff]  ;;  %v3586_v58 = vcombine.low %v470_v43, %v474_v44 }
  0x66   : > { %2353 = vmatpush1.bf16.msra.mxu0 %v3712_v50  ;;  %v3681_v16 = vcombine.high %v565_v8, %v569_v9  ;;  %v557_v18 = vld [vmem:[%s3983_s12 + $0x800] sm:$0xff]  ;;  %v3680_v22 = vcombine.low %v565_v8, %v569_v9  ;;  %v3530_v50 = vcombine.low %v414_v37, %v418_v38  ;;  %v398_v56 = vld [vmem:[%s3983_s12 + $0x308] sm:$0xff] }
  0x67   : > { %2394 = vmatpush1.bf16.msra.mxu1 %v3458_v51  ;;  %2354 = vmatprep.subr.bf16.mxu0 %v3705_v52  ;;  %v561_v19 = vld [vmem:[%s3983_s12 + $0x820] sm:$0xff]  ;;  %v3587_v51 = vcombine.high %v470_v43, %v474_v44  ;;  %v3523_v52 = vcombine.high %v406_v45, %v410_v48  ;;  %v458_v63 = vld [vmem:[%s3983_s12 + $0x4e8] sm:$0xff] }
  0x68   : > { %2395 = vmatprep.subr.bf16.mxu1 %v3451_v53  ;;  %v3673_v25 = vcombine.high %v557_v18, %v561_v19  ;;  %v3672_v32 = vcombine.low %v557_v18, %v561_v19  ;;  %v462_v53 = vld [vmem:[%s3983_s12 + $0x508] sm:$0xff] }
  0x69   : > { %v390_v0 = vld [vmem:[%s3983_s12 + $0x2c8] sm:$0xff]  ;;  %v3578_v3 = vcombine.low %v462_v53, %v466_v54 }
  0x6a   : > { %2355 = vmatpush1.bf16.msra.mxu0 %v3704_v59  ;;  %v3522_v59 = vcombine.low %v406_v45, %v410_v48  ;;  %v450_v8 = vld [vmem:[%s3983_s12 + $0x4a8] sm:$0xff] }
  0x6b   : > { %2396 = vmatpush1.bf16.msra.mxu1 %v3450_v60  ;;  %2356 = vmatprep.subr.bf16.mxu0 %v3697_v61  ;;  %v3579_v60 = vcombine.high %v462_v53, %v466_v54  ;;  %v3515_v61 = vcombine.high %v398_v56, %v402_v57  ;;  %v382_v9 = vld [vmem:[%s3983_s12 + $0x288] sm:$0xff] }
  0x6c   : > { %2397 = vmatprep.subr.bf16.mxu1 %v3443_v62  ;;  %v454_v62 = vld [vmem:[%s3983_s12 + $0x4c8] sm:$0xff] }
  0x6d   : > { %v3570_v12 = vcombine.low %v454_v62, %v458_v63  ;;  %v442_v18 = vld [vmem:[%s3983_s12 + $0x468] sm:$0xff] }
  0x6e   : > { %2357 = vmatpush1.bf16.msra.mxu0 %v3696_v4  ;;  %v3514_v4 = vcombine.low %v398_v56, %v402_v57  ;;  %v374_v19 = vld [vmem:[%s3983_s12 + $0x248] sm:$0xff] }
  0x6f   : > { %2398 = vmatpush1.bf16.msra.mxu1 %v3442_v5  ;;  %2358 = vmatprep.subr.bf16.mxu0 %v3689_v6  ;;  %v3571_v5 = vcombine.high %v454_v62, %v458_v63  ;;  %v3507_v6 = vcombine.high %v390_v0, %v394_v2  ;;  %v378_v20 = vld [vmem:[%s3983_s12 + $0x268] sm:$0xff] }
  0x70   : > { %2399 = vmatprep.subr.bf16.mxu1 %v3435_v7  ;;  %v446_v7 = vld [vmem:[%s3983_s12 + $0x488] sm:$0xff] }
  0x71   : > { %v3562_v21 = vcombine.low %v446_v7, %v450_v8  ;;  %v434_v27 = vld [vmem:[%s3983_s12 + $0x428] sm:$0xff] }
  0x72   : > { %2359 = vmatpush1.bf16.msra.mxu0 %v3688_v13  ;;  %v3506_v13 = vcombine.low %v390_v0, %v394_v2  ;;  %v366_v28 = vld [vmem:[%s3983_s12 + $0x208] sm:$0xff] }
  0x73   : > { %2400 = vmatpush1.bf16.msra.mxu1 %v3434_v14  ;;  %2360 = vmatprep.subr.bf16.mxu0 %v3681_v16  ;;  %v3563_v14 = vcombine.high %v446_v7, %v450_v8  ;;  %v3499_v16 = vcombine.high %v382_v9, %v386_v10  ;;  %v370_v29 = vld [vmem:[%s3983_s12 + $0x228] sm:$0xff] }
  0x74   : > { %2401 = vmatprep.subr.bf16.mxu1 %v3427_v17  ;;  %v438_v17 = vld [vmem:[%s3983_s12 + $0x448] sm:$0xff] }
  0x75   : > { %v3554_v30 = vcombine.low %v438_v17, %v442_v18  ;;  %v554_v35 = vld [vmem:[%s3983_s12 + $0x7e8] sm:$0xff] }
  0x76   : > { %2361 = vmatpush1.bf16.msra.mxu0 %v3680_v22  ;;  %v3498_v22 = vcombine.low %v382_v9, %v386_v10  ;;  %v614_v36 = vld [vmem:[%s3983_s12 + $0x9c8] sm:$0xff] }
  0x77   : > { %2402 = vmatpush1.bf16.msra.mxu1 %v3426_v23  ;;  %2362 = vmatprep.subr.bf16.mxu0 %v3673_v25  ;;  %v3555_v23 = vcombine.high %v438_v17, %v442_v18  ;;  %v3491_v25 = vcombine.high %v374_v19, %v378_v20  ;;  %v618_v37 = vld [vmem:[%s3983_s12 + $0x9e8] sm:$0xff] }
  0x78   : > { %2403 = vmatprep.subr.bf16.mxu1 %v3419_v26  ;;  %v430_v26 = vld [vmem:[%s3983_s12 + $0x408] sm:$0xff] }
  0x79   : > { %v3546_v38 = vcombine.low %v430_v26, %v434_v27  ;;  %v546_v43 = vld [vmem:[%s3983_s12 + $0x7a8] sm:$0xff] }
  0x7a   : > { %2363 = vmatpush1.bf16.msra.mxu0 %v3672_v32  ;;  %v3490_v32 = vcombine.low %v374_v19, %v378_v20  ;;  %v606_v44 = vld [vmem:[%s3983_s12 + $0x988] sm:$0xff] }
  0x7b   : > { %2404 = vmatpush1.bf16.msra.mxu1 %v3418_v55  ;;  %2430 = vmatprep.subr.bf16.mxu0 %v3603_v1  ;;  %v3547_v55 = vcombine.high %v430_v26, %v434_v27  ;;  %v3483_v1 = vcombine.high %v366_v28, %v370_v29  ;;  %v610_v45 = vld [vmem:[%s3983_s12 + $0x9a8] sm:$0xff] }
  0x7c   : > { %2405 = vmatprep.subr.bf16.mxu1 %v3539_v34  ;;  %v550_v34 = vld [vmem:[%s3983_s12 + $0x7c8] sm:$0xff] }
  0x7d   : > { %2381 = vmatmul.mubr.bf16.vlgmr.msra.gmra.mxu0 %v4054_v31  ;;  %v3666_v48 = vcombine.low %v550_v34, %v554_v35  ;;  %v538_v53 = vld [vmem:[%s3983_s12 + $0x768] sm:$0xff] }
  0x7e   : > { %2431 = vmatpush1.bf16.msra.mxu0 %v3602_v39  ;;  %2462 = vmatprep.mubr.bf16.mxu0 %v4043_v15  ;;  %v3482_v39 = vcombine.low %v366_v28, %v370_v29  ;;  %v598_v54 = vld [vmem:[%s3983_s12 + $0x948] sm:$0xff] }
  0x7f   : > { %2406 = vmatpush2.bf16.msra.mxu1 %v3538_v40  ;;  %2432 = vmatprep.subr.bf16.mxu0 %v3595_v41  ;;  %v3667_v40 = vcombine.high %v550_v34, %v554_v35  ;;  %v3731_v41 = vcombine.high %v614_v36, %v618_v37  ;;  %v602_v56 = vld [vmem:[%s3983_s12 + $0x968] sm:$0xff] }
  0x80   : > { %2407 = vmatprep.subr.bf16.mxu1 %v3531_v42  ;;  %v542_v42 = vld [vmem:[%s3983_s12 + $0x788] sm:$0xff] }
  0x81   : > { %v3658_v57 = vcombine.low %v542_v42, %v546_v43  ;;  %v530_v62 = vld [vmem:[%s3983_s12 + $0x728] sm:$0xff] }
  0x82   : > { %2433 = vmatpush1.bf16.msra.mxu0 %v3594_v49  ;;  %v3730_v49 = vcombine.low %v614_v36, %v618_v37  ;;  %v590_v63 = vld [vmem:[%s3983_s12 + $0x908] sm:$0xff] }
  0x83   : > { %2408 = vmatpush2.bf16.msra.mxu1 %v3530_v50  ;;  %2434 = vmatprep.subr.bf16.mxu0 %v3587_v51  ;;  %v3659_v50 = vcombine.high %v542_v42, %v546_v43  ;;  %v3723_v51 = vcombine.high %v606_v44, %v610_v45  ;;  %v594_v0 = vld [vmem:[%s3983_s12 + $0x928] sm:$0xff]  ;;  %v363_v42 = vld [vmem:[%s3983_s12 + $0x1f0] sm:$0xff] }
  0x84   : > { %2409 = vmatprep.subr.bf16.mxu1 %v3523_v52  ;;  %v534_v52 = vld [vmem:[%s3983_s12 + $0x748] sm:$0xff]  ;;  %v487_v43 = vld [vmem:[%s3983_s12 + $0x5d0] sm:$0xff] }
  0x85   : > { %v3650_v2 = vcombine.low %v534_v52, %v538_v53  ;;  %v522_v7 = vld [vmem:[%s3983_s12 + $0x6e8] sm:$0xff] }
  0x86   : > { %2435 = vmatpush1.bf16.msra.mxu0 %v3586_v58  ;;  %v3722_v58 = vcombine.low %v606_v44, %v610_v45  ;;  %v582_v8 = vld [vmem:[%s3983_s12 + $0x8c8] sm:$0xff]  ;;  %v491_v44 = vld [vmem:[%s3983_s12 + $0x5f0] sm:$0xff] }
  0x87   : > { %2410 = vmatpush2.bf16.msra.mxu1 %v3522_v59  ;;  %2436 = vmatprep.subr.bf16.mxu0 %v3579_v60  ;;  %v3651_v59 = vcombine.high %v534_v52, %v538_v53  ;;  %v3715_v60 = vcombine.high %v598_v54, %v602_v56  ;;  %v586_v9 = vld [vmem:[%s3983_s12 + $0x8e8] sm:$0xff]  ;;  %v355_v52 = vld [vmem:[%s3983_s12 + $0x1b0] sm:$0xff] }
  0x88   : > { %2411 = vmatprep.subr.bf16.mxu1 %v3515_v61  ;;  %v526_v61 = vld [vmem:[%s3983_s12 + $0x708] sm:$0xff]  ;;  %v479_v53 = vld [vmem:[%s3983_s12 + $0x590] sm:$0xff] }
  0x89   : > { %v3642_v10 = vcombine.low %v526_v61, %v530_v62  ;;  %v514_v17 = vld [vmem:[%s3983_s12 + $0x6a8] sm:$0xff] }
  0x8a   : > { %2437 = vmatpush1.bf16.msra.mxu0 %v3578_v3  ;;  %v3714_v3 = vcombine.low %v598_v54, %v602_v56  ;;  %v574_v18 = vld [vmem:[%s3983_s12 + $0x888] sm:$0xff]  ;;  %v483_v54 = vld [vmem:[%s3983_s12 + $0x5b0] sm:$0xff] }
  0x8b   : > { %2412 = vmatpush2.bf16.msra.mxu1 %v3514_v4  ;;  %2438 = vmatprep.subr.bf16.mxu0 %v3571_v5  ;;  %v3643_v4 = vcombine.high %v526_v61, %v530_v62  ;;  %v3707_v5 = vcombine.high %v590_v63, %v594_v0  ;;  %v578_v19 = vld [vmem:[%s3983_s12 + $0x8a8] sm:$0xff]  ;;  %v347_v61 = vld [vmem:[%s3983_s12 + $0x170] sm:$0xff] }
  0x8c   : > { %2413 = vmatprep.subr.bf16.mxu1 %v3507_v6  ;;  %v518_v6 = vld [vmem:[%s3983_s12 + $0x6c8] sm:$0xff]  ;;  %v471_v62 = vld [vmem:[%s3983_s12 + $0x550] sm:$0xff] }
  0x8d   : > { %v3634_v20 = vcombine.low %v518_v6, %v522_v7  ;;  %v506_v26 = vld [vmem:[%s3983_s12 + $0x668] sm:$0xff] }
  0x8e   : > { %2439 = vmatpush1.bf16.msra.mxu0 %v3570_v12  ;;  %v3706_v12 = vcombine.low %v590_v63, %v594_v0  ;;  %v566_v27 = vld [vmem:[%s3983_s12 + $0x848] sm:$0xff]  ;;  %v475_v63 = vld [vmem:[%s3983_s12 + $0x570] sm:$0xff] }
  0x8f   : > { %2414 = vmatpush2.bf16.msra.mxu1 %v3506_v13  ;;  %2440 = vmatprep.subr.bf16.mxu0 %v3563_v14  ;;  %v3635_v13 = vcombine.high %v518_v6, %v522_v7  ;;  %v3699_v14 = vcombine.high %v582_v8, %v586_v9  ;;  %v570_v28 = vld [vmem:[%s3983_s12 + $0x868] sm:$0xff]  ;;  %v339_v6 = vld [vmem:[%s3983_s12 + $0x130] sm:$0xff] }
  0x90   : > { %2415 = vmatprep.subr.bf16.mxu1 %v3499_v16  ;;  %v510_v16 = vld [vmem:[%s3983_s12 + $0x688] sm:$0xff]  ;;  %v463_v7 = vld [vmem:[%s3983_s12 + $0x510] sm:$0xff] }
  0x91   : > { %v3626_v29 = vcombine.low %v510_v16, %v514_v17  ;;  %v498_v34 = vld [vmem:[%s3983_s12 + $0x628] sm:$0xff] }
  0x92   : > { %2441 = vmatpush1.bf16.msra.mxu0 %v3562_v21  ;;  %v3698_v21 = vcombine.low %v582_v8, %v586_v9  ;;  %v558_v35 = vld [vmem:[%s3983_s12 + $0x808] sm:$0xff]  ;;  %v467_v8 = vld [vmem:[%s3983_s12 + $0x530] sm:$0xff] }
  0x93   : > { %2416 = vmatpush2.bf16.msra.mxu1 %v3498_v22  ;;  %2442 = vmatprep.subr.bf16.mxu0 %v3555_v23  ;;  %v3627_v22 = vcombine.high %v510_v16, %v514_v17  ;;  %v3691_v23 = vcombine.high %v574_v18, %v578_v19  ;;  %v562_v36 = vld [vmem:[%s3983_s12 + $0x828] sm:$0xff]  ;;  %v331_v16 = vld [vmem:[%s3983_s12 + $0xf0] sm:$0xff] }
  0x94   : > { %2417 = vmatprep.subr.bf16.mxu1 %v3491_v25  ;;  %v502_v25 = vld [vmem:[%s3983_s12 + $0x648] sm:$0xff]  ;;  %v455_v17 = vld [vmem:[%s3983_s12 + $0x4d0] sm:$0xff] }
  0x95   : > { %v3618_v37 = vcombine.low %v502_v25, %v506_v26 }
  0x96   : > { %2443 = vmatpush1.bf16.msra.mxu0 %v3554_v30  ;;  %v3690_v30 = vcombine.low %v574_v18, %v578_v19  ;;  %v459_v18 = vld [vmem:[%s3983_s12 + $0x4f0] sm:$0xff] }
  0x97   : > { %2418 = vmatpush2.bf16.msra.mxu1 %v3490_v32  ;;  %2444 = vmatprep.subr.bf16.mxu0 %v3547_v55  ;;  %v3619_v32 = vcombine.high %v502_v25, %v506_v26  ;;  %v3683_v55 = vcombine.high %v566_v27, %v570_v28  ;;  %v323_v25 = vld [vmem:[%s3983_s12 + $0xb0] sm:$0xff] }
  0x98   : > { %2419 = vmatprep.subr.bf16.mxu1 %v3483_v1  ;;  %v494_v1 = vld [vmem:[%s3983_s12 + $0x608] sm:$0xff]  ;;  %v447_v26 = vld [vmem:[%s3983_s12 + $0x490] sm:$0xff] }
  0x99   : > { %v3610_v45 = vcombine.low %v494_v1, %v498_v34 }
  0x9a   : > { %2445 = vmatpush1.bf16.msra.mxu0 %v3546_v38  ;;  %v3682_v38 = vcombine.low %v566_v27, %v570_v28  ;;  %v451_v27 = vld [vmem:[%s3983_s12 + $0x4b0] sm:$0xff] }
  0x9b   : > { %2420 = vmatpush2.bf16.msra.mxu1 %v3482_v39  ;;  %2446 = vmatprep.subr.bf16.mxu0 %v3667_v40  ;;  %v3611_v39 = vcombine.high %v494_v1, %v498_v34  ;;  %v3675_v40 = vcombine.high %v558_v35, %v562_v36  ;;  %v315_v1 = vld [vmem:[%s3983_s12 + $0x70] sm:$0xff] }
  0x9c   : > { %2471 = vmatprep.subr.bf16.mxu1 %v3731_v41  ;;  %v359_v41 = vld [vmem:[%s3983_s12 + $0x1d0] sm:$0xff] }
  0x9d   : > { %v3476_v56 = vcombine.low %v359_v41, %v363_v42  ;;  %v439_v34 = vld [vmem:[%s3983_s12 + $0x450] sm:$0xff] }
  0x9e   : > { %2422 = vmatmul.mubr.bf16.vlgmr.msra.gmra.mxu1 %v4084_v24  ;;  %2447 = vmatpush2.bf16.msra.mxu0 %v3666_v48  ;;  %v3674_v48 = vcombine.low %v558_v35, %v562_v36  ;;  %v443_v35 = vld [vmem:[%s3983_s12 + $0x470] sm:$0xff] }
  0x9f   : > { %2472 = vmatpush1.bf16.msra.mxu1 %v3730_v49  ;;  %2448 = vmatprep.subr.bf16.mxu0 %v3659_v50  ;;  %v3477_v49 = vcombine.high %v359_v41, %v363_v42  ;;  %v3605_v50 = vcombine.high %v487_v43, %v491_v44  ;;  %v307_v41 = vld [vmem:[%s3983_s12 + $0x30] sm:$0xff] }
  0xa0   : > { %2473 = vmatprep.subr.bf16.mxu1 %v3723_v51  ;;  %2503 = vmatprep.mubr.bf16.mxu1 %v3915_v47  ;;  %v351_v51 = vld [vmem:[%s3983_s12 + $0x190] sm:$0xff] }
  0xa1   : > { %v3468_v0 = vcombine.low %v351_v51, %v355_v52  ;;  %v431_v42 = vld [vmem:[%s3983_s12 + $0x410] sm:$0xff] }
  0xa2   : > { %2449 = vmatpush2.bf16.msra.mxu0 %v3658_v57  ;;  %v3604_v57 = vcombine.low %v487_v43, %v491_v44  ;;  %v435_v43 = vld [vmem:[%s3983_s12 + $0x430] sm:$0xff] }
  0xa3   : > { %2474 = vmatpush1.bf16.msra.mxu1 %v3722_v58  ;;  %2450 = vmatprep.subr.bf16.mxu0 %v3651_v59  ;;  %v3469_v58 = vcombine.high %v351_v51, %v355_v52  ;;  %v3597_v59 = vcombine.high %v479_v53, %v483_v54  ;;  %v427_v51 = vld [vmem:[%s3983_s12 + $0x3f0] sm:$0xff] }
  0xa4   : > { %2475 = vmatprep.subr.bf16.mxu1 %v3715_v60  ;;  %v343_v60 = vld [vmem:[%s3983_s12 + $0x150] sm:$0xff] }
  0xa5   : > { %v3460_v9 = vcombine.low %v343_v60, %v347_v61  ;;  %v551_v52 = vld [vmem:[%s3983_s12 + $0x7d0] sm:$0xff] }
  0xa6   : > { %2451 = vmatpush2.bf16.msra.mxu0 %v3650_v2  ;;  %v3596_v2 = vcombine.low %v479_v53, %v483_v54  ;;  %v555_v53 = vld [vmem:[%s3983_s12 + $0x7f0] sm:$0xff] }
  0xa7   : > { %2476 = vmatpush1.bf16.msra.mxu1 %v3714_v3  ;;  %2452 = vmatprep.subr.bf16.mxu0 %v3643_v4  ;;  %v3461_v3 = vcombine.high %v343_v60, %v347_v61  ;;  %v3589_v4 = vcombine.high %v471_v62, %v475_v63  ;;  %v419_v60 = vld [vmem:[%s3983_s12 + $0x3b0] sm:$0xff] }
  0xa8   : > { %2477 = vmatprep.subr.bf16.mxu1 %v3707_v5  ;;  %v335_v5 = vld [vmem:[%s3983_s12 + $0x110] sm:$0xff] }
  0xa9   : > { %v3452_v19 = vcombine.low %v335_v5, %v339_v6  ;;  %v543_v61 = vld [vmem:[%s3983_s12 + $0x790] sm:$0xff] }
  0xaa   : > { %2453 = vmatpush2.bf16.msra.mxu0 %v3642_v10  ;;  %v3588_v10 = vcombine.low %v471_v62, %v475_v63  ;;  %v547_v62 = vld [vmem:[%s3983_s12 + $0x7b0] sm:$0xff] }
  0xab   : > { %2478 = vmatpush1.bf16.msra.mxu1 %v3706_v12  ;;  %2454 = vmatprep.subr.bf16.mxu0 %v3635_v13  ;;  %v3453_v12 = vcombine.high %v335_v5, %v339_v6  ;;  %v3581_v13 = vcombine.high %v463_v7, %v467_v8  ;;  %v411_v5 = vld [vmem:[%s3983_s12 + $0x370] sm:$0xff] }
  0xac   : > { %2479 = vmatprep.subr.bf16.mxu1 %v3699_v14  ;;  %v327_v14 = vld [vmem:[%s3983_s12 + $0xd0] sm:$0xff] }
  0xad   : > { %v3444_v28 = vcombine.low %v327_v14, %v331_v16  ;;  %v535_v6 = vld [vmem:[%s3983_s12 + $0x750] sm:$0xff] }
  0xae   : > { %2455 = vmatpush2.bf16.msra.mxu0 %v3634_v20  ;;  %v3580_v20 = vcombine.low %v463_v7, %v467_v8  ;;  %v539_v7 = vld [vmem:[%s3983_s12 + $0x770] sm:$0xff] }
  0xaf   : > { %2480 = vmatpush1.bf16.msra.mxu1 %v3698_v21  ;;  %2456 = vmatprep.subr.bf16.mxu0 %v3627_v22  ;;  %v3445_v21 = vcombine.high %v327_v14, %v331_v16  ;;  %v3573_v22 = vcombine.high %v455_v17, %v459_v18  ;;  %v403_v14 = vld [vmem:[%s3983_s12 + $0x330] sm:$0xff] }
  0xb0   : > { %2481 = vmatprep.subr.bf16.mxu1 %v3691_v23  ;;  %v319_v23 = vld [vmem:[%s3983_s12 + $0x90] sm:$0xff] }
  0xb1   : > { %v3436_v36 = vcombine.low %v319_v23, %v323_v25  ;;  %v527_v16 = vld [vmem:[%s3983_s12 + $0x710] sm:$0xff] }
  0xb2   : > { %2457 = vmatpush2.bf16.msra.mxu0 %v3626_v29  ;;  %v3572_v29 = vcombine.low %v455_v17, %v459_v18  ;;  %v531_v17 = vld [vmem:[%s3983_s12 + $0x730] sm:$0xff] }
  0xb3   : > { %2482 = vmatpush1.bf16.msra.mxu1 %v3690_v30  ;;  %2458 = vmatprep.subr.bf16.mxu0 %v3619_v32  ;;  %v3437_v30 = vcombine.high %v319_v23, %v323_v25  ;;  %v3565_v32 = vcombine.high %v447_v26, %v451_v27  ;;  %v395_v23 = vld [vmem:[%s3983_s12 + $0x2f0] sm:$0xff] }
  0xb4   : > { %2483 = vmatprep.subr.bf16.mxu1 %v3683_v55  ;;  %v311_v55 = vld [vmem:[%s3983_s12 + $0x50] sm:$0xff] }
  0xb5   : > { %v3428_v44 = vcombine.low %v311_v55, %v315_v1  ;;  %v519_v25 = vld [vmem:[%s3983_s12 + $0x6d0] sm:$0xff] }
  0xb6   : > { %2459 = vmatpush2.bf16.msra.mxu0 %v3618_v37  ;;  %v3564_v37 = vcombine.low %v447_v26, %v451_v27  ;;  %v523_v26 = vld [vmem:[%s3983_s12 + $0x6f0] sm:$0xff] }
  0xb7   : > { %2484 = vmatpush1.bf16.msra.mxu1 %v3682_v38  ;;  %2460 = vmatprep.subr.bf16.mxu0 %v3611_v39  ;;  %v3429_v38 = vcombine.high %v311_v55, %v315_v1  ;;  %v3557_v39 = vcombine.high %v439_v34, %v443_v35  ;;  %v387_v55 = vld [vmem:[%s3983_s12 + $0x2b0] sm:$0xff] }
  0xb8   : > { %2485 = vmatprep.subr.bf16.mxu1 %v3675_v40  ;;  %v303_v40 = vld [vmem:[%s3983_s12 + $0x10] sm:$0xff] }
  0xb9   : > { %v3420_v54 = vcombine.low %v303_v40, %v307_v41  ;;  %v511_v1 = vld [vmem:[%s3983_s12 + $0x690] sm:$0xff] }
  0xba   : > { %2461 = vmatpush2.bf16.msra.mxu0 %v3610_v45  ;;  %v3556_v45 = vcombine.low %v439_v34, %v443_v35  ;;  %v515_v34 = vld [vmem:[%s3983_s12 + $0x6b0] sm:$0xff] }
  0xbb   : > { %2486 = vmatpush1.bf16.msra.mxu1 %v3674_v48  ;;  %2512 = vmatprep.subr.bf16.mxu0 %v3477_v49  ;;  %v3421_v48 = vcombine.high %v303_v40, %v307_v41  ;;  %v3549_v49 = vcombine.high %v431_v42, %v435_v43  ;;  %v379_v40 = vld [vmem:[%s3983_s12 + $0x270] sm:$0xff] }
  0xbc   : > { %2553 = vmatprep.subr.bf16.mxu1 %v3605_v50  ;;  %v423_v50 = vld [vmem:[%s3983_s12 + $0x3d0] sm:$0xff] }
  0xbd   : > { %2463 = vmatmul.mubr.bf16.vlgmr.msra.gmra.mxu0 %v4092_v33  ;;  %v3540_v63 = vcombine.low %v423_v50, %v427_v51  ;;  %v503_v41 = vld [vmem:[%s3983_s12 + $0x650] sm:$0xff] }
  0xbe   : > { %2504 = vmatmul.mubr.bf16.vlgmr.msra.gmra.mxu1 %v4054_v31  ;;  %2513 = vmatpush1.bf16.msra.mxu0 %v3476_v56  ;;  %v3548_v56 = vcombine.low %v431_v42, %v435_v43  ;;  %v507_v42 = vld [vmem:[%s3983_s12 + $0x670] sm:$0xff] }
  0xbf   : > { %2554 = vmatpush1.bf16.msra.mxu1 %v3604_v57  ;;  %2514 = vmatprep.subr.bf16.mxu0 %v3469_v58  ;;  %v3541_v57 = vcombine.high %v423_v50, %v427_v51  ;;  %v3669_v58 = vcombine.high %v551_v52, %v555_v53  ;;  %v371_v50 = vld [vmem:[%s3983_s12 + $0x230] sm:$0xff] }
  0xc0   : > { %2555 = vmatprep.subr.bf16.mxu1 %v3597_v59  ;;  %2544 = vmatprep.mubr.bf16.mxu0 %v4036_v11  ;;  %v415_v59 = vld [vmem:[%s3983_s12 + $0x390] sm:$0xff] }
  0xc1   : > { %2585 = vmatprep.mubr.bf16.mxu1 %v4043_v15  ;;  %v3532_v8 = vcombine.low %v415_v59, %v419_v60  ;;  %v495_v51 = vld [vmem:[%s3983_s12 + $0x610] sm:$0xff] }
  0xc2   : > { %2515 = vmatpush1.bf16.msra.mxu0 %v3468_v0  ;;  %v3668_v0 = vcombine.low %v551_v52, %v555_v53  ;;  %v499_v52 = vld [vmem:[%s3983_s12 + $0x630] sm:$0xff] }
  0xc3   : > { %2556 = vmatpush1.bf16.msra.mxu1 %v3596_v2  ;;  %2516 = vmatprep.subr.bf16.mxu0 %v3461_v3  ;;  %v3533_v2 = vcombine.high %v415_v59, %v419_v60  ;;  %v3661_v3 = vcombine.high %v543_v61, %v547_v62  ;;  %v619_v59 = vld [vmem:[%s3983_s12 + $0x9f0] sm:$0xff]  ;;  %v360_v60 = vld [vmem:[%s3983_s12 + $0x1d8] sm:$0xff] }
  0xc4   : > { %2557 = vmatprep.subr.bf16.mxu1 %v3589_v4  ;;  %v407_v4 = vld [vmem:[%s3983_s12 + $0x350] sm:$0xff] }
  0xc5   : > { %v3524_v18 = vcombine.low %v407_v4, %v411_v5 }
  0xc6   : > { %2517 = vmatpush1.bf16.msra.mxu0 %v3460_v9  ;;  %v3660_v9 = vcombine.low %v543_v61, %v547_v62  ;;  %v364_v61 = vld [vmem:[%s3983_s12 + $0x1f8] sm:$0xff] }
  0xc7   : > { %2558 = vmatpush1.bf16.msra.mxu1 %v3588_v10  ;;  %2518 = vmatprep.subr.bf16.mxu0 %v3453_v12  ;;  %v3525_v10 = vcombine.high %v407_v4, %v411_v5  ;;  %v3653_v12 = vcombine.high %v535_v6, %v539_v7  ;;  %v611_v4 = vld [vmem:[%s3983_s12 + $0x9b0] sm:$0xff]  ;;  %v352_v5 = vld [vmem:[%s3983_s12 + $0x198] sm:$0xff] }
  0xc8   : > { %2559 = vmatprep.subr.bf16.mxu1 %v3581_v13  ;;  %v399_v13 = vld [vmem:[%s3983_s12 + $0x310] sm:$0xff] }
  0xc9   : > { %v3516_v27 = vcombine.low %v399_v13, %v403_v14 }
  0xca   : > { %2519 = vmatpush1.bf16.msra.mxu0 %v3452_v19  ;;  %v3652_v19 = vcombine.low %v535_v6, %v539_v7  ;;  %v356_v6 = vld [vmem:[%s3983_s12 + $0x1b8] sm:$0xff] }
  0xcb   : > { %2560 = vmatpush1.bf16.msra.mxu1 %v3580_v20  ;;  %2520 = vmatprep.subr.bf16.mxu0 %v3445_v21  ;;  %v3517_v20 = vcombine.high %v399_v13, %v403_v14  ;;  %v3645_v21 = vcombine.high %v527_v16, %v531_v17  ;;  %v603_v13 = vld [vmem:[%s3983_s12 + $0x970] sm:$0xff]  ;;  %v344_v14 = vld [vmem:[%s3983_s12 + $0x158] sm:$0xff] }
  0xcc   : > { %2561 = vmatprep.subr.bf16.mxu1 %v3573_v22  ;;  %v391_v22 = vld [vmem:[%s3983_s12 + $0x2d0] sm:$0xff] }
  0xcd   : > { %v3508_v35 = vcombine.low %v391_v22, %v395_v23 }
  0xce   : > { %2521 = vmatpush1.bf16.msra.mxu0 %v3444_v28  ;;  %v3644_v28 = vcombine.low %v527_v16, %v531_v17  ;;  %v348_v16 = vld [vmem:[%s3983_s12 + $0x178] sm:$0xff] }
  0xcf   : > { %2562 = vmatpush1.bf16.msra.mxu1 %v3572_v29  ;;  %2522 = vmatprep.subr.bf16.mxu0 %v3437_v30  ;;  %v3509_v29 = vcombine.high %v391_v22, %v395_v23  ;;  %v3637_v30 = vcombine.high %v519_v25, %v523_v26  ;;  %v595_v22 = vld [vmem:[%s3983_s12 + $0x930] sm:$0xff]  ;;  %v336_v23 = vld [vmem:[%s3983_s12 + $0x118] sm:$0xff] }
  0xd0   : > { %2563 = vmatprep.subr.bf16.mxu1 %v3565_v32  ;;  %v383_v32 = vld [vmem:[%s3983_s12 + $0x290] sm:$0xff] }
  0xd1   : > { %v3500_v43 = vcombine.low %v383_v32, %v387_v55 }
  0xd2   : > { %2523 = vmatpush1.bf16.msra.mxu0 %v3436_v36  ;;  %v3636_v36 = vcombine.low %v519_v25, %v523_v26  ;;  %v340_v25 = vld [vmem:[%s3983_s12 + $0x138] sm:$0xff] }
  0xd3   : > { %2564 = vmatpush1.bf16.msra.mxu1 %v3564_v37  ;;  %2524 = vmatprep.subr.bf16.mxu0 %v3429_v38  ;;  %v3501_v37 = vcombine.high %v383_v32, %v387_v55  ;;  %v3629_v38 = vcombine.high %v511_v1, %v515_v34  ;;  %v587_v32 = vld [vmem:[%s3983_s12 + $0x8f0] sm:$0xff]  ;;  %v328_v55 = vld [vmem:[%s3983_s12 + $0xd8] sm:$0xff] }
  0xd4   : > { %2565 = vmatprep.subr.bf16.mxu1 %v3557_v39  ;;  %v375_v39 = vld [vmem:[%s3983_s12 + $0x250] sm:$0xff] }
  0xd5   : > { %v3492_v53 = vcombine.low %v375_v39, %v379_v40 }
  0xd6   : > { %2525 = vmatpush1.bf16.msra.mxu0 %v3428_v44  ;;  %v3628_v44 = vcombine.low %v511_v1, %v515_v34  ;;  %v332_v1 = vld [vmem:[%s3983_s12 + $0xf8] sm:$0xff] }
  0xd7   : > { %2566 = vmatpush1.bf16.msra.mxu1 %v3556_v45  ;;  %2526 = vmatprep.subr.bf16.mxu0 %v3421_v48  ;;  %v3493_v45 = vcombine.high %v375_v39, %v379_v40  ;;  %v3621_v48 = vcombine.high %v503_v41, %v507_v42  ;;  %v320_v39 = vld [vmem:[%s3983_s12 + $0x98] sm:$0xff] }
  0xd8   : > { %2567 = vmatprep.subr.bf16.mxu1 %v3549_v49  ;;  %v367_v49 = vld [vmem:[%s3983_s12 + $0x210] sm:$0xff]  ;;  %v324_v40 = vld [vmem:[%s3983_s12 + $0xb8] sm:$0xff] }
  0xd9   : > { %v3484_v62 = vcombine.low %v367_v49, %v371_v50 }
  0xda   : > { %2527 = vmatpush1.bf16.msra.mxu0 %v3420_v54  ;;  %v3620_v54 = vcombine.low %v503_v41, %v507_v42  ;;  %v3446_v42 = vcombine.low %v328_v55, %v332_v1 }
  0xdb   : > { %2568 = vmatpush1.bf16.msra.mxu1 %v3548_v56  ;;  %2528 = vmatprep.subr.bf16.mxu0 %v3541_v57  ;;  %v3485_v56 = vcombine.high %v367_v49, %v371_v50  ;;  %v3613_v57 = vcombine.high %v495_v51, %v499_v52  ;;  %v312_v49 = vld [vmem:[%s3983_s12 + $0x58] sm:$0xff] }
  0xdc   : > { %2569 = vmatprep.subr.bf16.mxu1 %v3669_v58  ;;  %v615_v58 = vld [vmem:[%s3983_s12 + $0x9d0] sm:$0xff]  ;;  %v316_v50 = vld [vmem:[%s3983_s12 + $0x78] sm:$0xff] }
  0xdd   : > { %v3732_v7 = vcombine.low %v615_v58, %v619_v59 }
  0xde   : > { %2529 = vmatpush2.bf16.msra.mxu0 %v3540_v63  ;;  %v3612_v63 = vcombine.low %v495_v51, %v499_v52  ;;  %v3438_v52 = vcombine.low %v320_v39, %v324_v40 }
  0xdf   : > { %2570 = vmatpush2.bf16.msra.mxu1 %v3668_v0  ;;  %2530 = vmatprep.subr.bf16.mxu0 %v3533_v2  ;;  %v3733_v0 = vcombine.high %v615_v58, %v619_v59  ;;  %v3479_v2 = vcombine.high %v360_v60, %v364_v61  ;;  %v304_v58 = vld [vmem:[%s3983_s12 + $0x18] sm:$0xff] }
  0xe0   : > { %2571 = vmatprep.subr.bf16.mxu1 %v3661_v3  ;;  %v607_v3 = vld [vmem:[%s3983_s12 + $0x990] sm:$0xff]  ;;  %v308_v59 = vld [vmem:[%s3983_s12 + $0x38] sm:$0xff] }
  0xe1   : > { %v3724_v17 = vcombine.low %v607_v3, %v611_v4 }
  0xe2   : > { %2531 = vmatpush2.bf16.msra.mxu0 %v3532_v8  ;;  %v3478_v8 = vcombine.low %v360_v60, %v364_v61  ;;  %v3430_v61 = vcombine.low %v312_v49, %v316_v50 }
  0xe3   : > { %2572 = vmatpush2.bf16.msra.mxu1 %v3660_v9  ;;  %2532 = vmatprep.subr.bf16.mxu0 %v3525_v10  ;;  %v3725_v9 = vcombine.high %v607_v3, %v611_v4  ;;  %v3471_v10 = vcombine.high %v352_v5, %v356_v6  ;;  %v424_v3 = vld [vmem:[%s3983_s12 + $0x3d8] sm:$0xff] }
  0xe4   : > { %2573 = vmatprep.subr.bf16.mxu1 %v3653_v12  ;;  %v599_v12 = vld [vmem:[%s3983_s12 + $0x950] sm:$0xff]  ;;  %v428_v4 = vld [vmem:[%s3983_s12 + $0x3f8] sm:$0xff] }
  0xe5   : > { %v3716_v26 = vcombine.low %v599_v12, %v603_v13 }
  0xe6   : > { %2533 = vmatpush2.bf16.msra.mxu0 %v3524_v18  ;;  %v3470_v18 = vcombine.low %v352_v5, %v356_v6  ;;  %v3422_v6 = vcombine.low %v304_v58, %v308_v59 }
  0xe7   : > { %2574 = vmatpush2.bf16.msra.mxu1 %v3652_v19  ;;  %2534 = vmatprep.subr.bf16.mxu0 %v3517_v20  ;;  %v3717_v19 = vcombine.high %v599_v12, %v603_v13  ;;  %v3463_v20 = vcombine.high %v344_v14, %v348_v16  ;;  %v416_v12 = vld [vmem:[%s3983_s12 + $0x398] sm:$0xff] }
  0xe8   : > { %2575 = vmatprep.subr.bf16.mxu1 %v3645_v21  ;;  %v591_v21 = vld [vmem:[%s3983_s12 + $0x910] sm:$0xff]  ;;  %v420_v13 = vld [vmem:[%s3983_s12 + $0x3b8] sm:$0xff] }
  0xe9   : > { %v3708_v34 = vcombine.low %v591_v21, %v595_v22 }
  0xea   : > { %2535 = vmatpush2.bf16.msra.mxu0 %v3516_v27  ;;  %v3462_v27 = vcombine.low %v344_v14, %v348_v16  ;;  %v3542_v16 = vcombine.low %v424_v3, %v428_v4 }
  0xeb   : > { %2576 = vmatpush2.bf16.msra.mxu1 %v3644_v28  ;;  %2536 = vmatprep.subr.bf16.mxu0 %v3509_v29  ;;  %v3709_v28 = vcombine.high %v591_v21, %v595_v22  ;;  %v3455_v29 = vcombine.high %v336_v23, %v340_v25  ;;  %v408_v22 = vld [vmem:[%s3983_s12 + $0x358] sm:$0xff] }
  0xec   : > { %2577 = vmatprep.subr.bf16.mxu1 %v3637_v30  ;;  %v583_v30 = vld [vmem:[%s3983_s12 + $0x8d0] sm:$0xff] }
  0xed   : > { %v3700_v41 = vcombine.low %v583_v30, %v587_v32 }
  0xee   : > { %2537 = vmatpush2.bf16.msra.mxu0 %v3508_v35  ;;  %v3701_v35 = vcombine.high %v583_v30, %v587_v32 }
  0xef   : > { %2578 = vmatpush2.bf16.msra.mxu1 %v3636_v36  ;;  %2538 = vmatprep.subr.bf16.mxu0 %v3501_v37  ;;  %v3447_v36 = vcombine.high %v328_v55, %v332_v1  ;;  %v575_v37 = vld [vmem:[%s3983_s12 + $0x890] sm:$0xff]  ;;  %v464_v1 = vld [vmem:[%s3983_s12 + $0x518] sm:$0xff] }
  0xf0   : > { %2579 = vmatprep.subr.bf16.mxu1 %v3629_v38  ;;  %v579_v38 = vld [vmem:[%s3983_s12 + $0x8b0] sm:$0xff] }
  0xf1   : > { %v3692_v51 = vcombine.low %v575_v37, %v579_v38 }
  0xf2   : > { %2539 = vmatpush2.bf16.msra.mxu0 %v3500_v43  ;;  %v3693_v43 = vcombine.high %v575_v37, %v579_v38 }
  0xf3   : > { %2580 = vmatpush2.bf16.msra.mxu1 %v3628_v44  ;;  %2540 = vmatprep.subr.bf16.mxu0 %v3493_v45  ;;  %v3439_v44 = vcombine.high %v320_v39, %v324_v40  ;;  %v567_v45 = vld [vmem:[%s3983_s12 + $0x850] sm:$0xff] }
  0xf4   : > { %2581 = vmatprep.subr.bf16.mxu1 %v3621_v48  ;;  %v571_v48 = vld [vmem:[%s3983_s12 + $0x870] sm:$0xff] }
  0xf5   : > { %v3684_v60 = vcombine.low %v567_v45, %v571_v48 }
  0xf6   : > { %2541 = vmatpush2.bf16.msra.mxu0 %v3492_v53  ;;  %v3685_v53 = vcombine.high %v567_v45, %v571_v48  ;;  %v460_v45 = vld [vmem:[%s3983_s12 + $0x4f8] sm:$0xff] }
  0xf7   : > { %2582 = vmatpush2.bf16.msra.mxu1 %v3620_v54  ;;  %2542 = vmatprep.subr.bf16.mxu0 %v3485_v56  ;;  %v3431_v54 = vcombine.high %v312_v49, %v316_v50  ;;  %v559_v56 = vld [vmem:[%s3983_s12 + $0x810] sm:$0xff]  ;;  %v392_v48 = vld [vmem:[%s3983_s12 + $0x2d8] sm:$0xff] }
  0xf8   : > { %2583 = vmatprep.subr.bf16.mxu1 %v3613_v57  ;;  %v563_v57 = vld [vmem:[%s3983_s12 + $0x830] sm:$0xff]  ;;  %v396_v49 = vld [vmem:[%s3983_s12 + $0x2f8] sm:$0xff] }
  0xf9   : > { %v3676_v5 = vcombine.low %v559_v56, %v563_v57 }
  0xfa   : > { %2543 = vmatpush2.bf16.msra.mxu0 %v3484_v62  ;;  %v3677_v62 = vcombine.high %v559_v56, %v563_v57  ;;  %v452_v56 = vld [vmem:[%s3983_s12 + $0x4b8] sm:$0xff] }
  0xfb   : > { %2584 = vmatpush2.bf16.msra.mxu1 %v3612_v63  ;;  %2594 = vmatprep.subr.bf16.mxu0 %v3733_v0  ;;  %v3423_v63 = vcombine.high %v304_v58, %v308_v59  ;;  %v488_v0 = vld [vmem:[%s3983_s12 + $0x5d8] sm:$0xff] }
  0xfc   : > { %2635 = vmatprep.subr.bf16.mxu1 %v3479_v2  ;;  %v492_v2 = vld [vmem:[%s3983_s12 + $0x5f8] sm:$0xff] }
  0xfd   : > { %2545 = vmatmul.mubr.bf16.vlgmr.msra.gmra.mxu0 %v4084_v24  ;;  %v3606_v14 = vcombine.low %v488_v0, %v492_v2  ;;  %v384_v57 = vld [vmem:[%s3983_s12 + $0x298] sm:$0xff] }
  0xfe   : > { %2586 = vmatmul.mubr.bf16.vlgmr.msra.gmra.mxu1 %v4092_v33  ;;  %2595 = vmatpush1.bf16.msra.mxu0 %v3732_v7  ;;  %v3607_v7 = vcombine.high %v488_v0, %v492_v2  ;;  %v388_v58 = vld [vmem:[%s3983_s12 + $0x2b8] sm:$0xff] }
  0xff   : > { %2636 = vmatpush1.bf16.msra.mxu1 %v3478_v8  ;;  %2596 = vmatprep.subr.bf16.mxu0 %v3725_v9  ;;  %v3543_v8 = vcombine.high %v424_v3, %v428_v4  ;;  %v480_v9 = vld [vmem:[%s3983_s12 + $0x598] sm:$0xff] }
 0x100   : > { %2637 = vmatprep.subr.bf16.mxu1 %v3471_v10  ;;  %2626 = vmatprep.mubr.bf16.mxu0 %v3915_v47  ;;  %v484_v10 = vld [vmem:[%s3983_s12 + $0x5b8] sm:$0xff] }
 0x101   : > { %2667 = vmatprep.mubr.bf16.mxu1 %v4036_v11  ;;  %v3454_v11 = vcombine.low %v336_v23, %v340_v25  ;;  %v412_v23 = vld [vmem:[%s3983_s12 + $0x378] sm:$0xff] }
 0x102   : > { %2597 = vmatpush1.bf16.msra.mxu0 %v3724_v17  ;;  %v3599_v17 = vcombine.high %v480_v9, %v484_v10  ;;  %v3527_v55 = vcombine.high %v408_v22, %v412_v23  ;;  %v3526_v40 = vcombine.low %v408_v22, %v412_v23  ;;  %v444_v0 = vld [vmem:[%s3983_s12 + $0x478] sm:$0xff] }
 0x103   : > { %2638 = vmatpush1.bf16.msra.mxu1 %v3470_v18  ;;  %2598 = vmatprep.subr.bf16.mxu0 %v3717_v19  ;;  %v3535_v18 = vcombine.high %v416_v12, %v420_v13  ;;  %v472_v19 = vld [vmem:[%s3983_s12 + $0x558] sm:$0xff] }
 0x104   : > { %2639 = vmatprep.subr.bf16.mxu1 %v3463_v20  ;;  %v476_v20 = vld [vmem:[%s3983_s12 + $0x578] sm:$0xff] }
 0x105   : > { %v3591_v30 = vcombine.high %v472_v19, %v476_v20  ;;  %v3590_v38 = vcombine.low %v472_v19, %v476_v20  ;;  %v376_v2 = vld [vmem:[%s3983_s12 + $0x258] sm:$0xff] }
 0x106   : > { %2599 = vmatpush1.bf16.msra.mxu0 %v3716_v26  ;;  %v3598_v26 = vcombine.low %v480_v9, %v484_v10  ;;  %v380_v3 = vld [vmem:[%s3983_s12 + $0x278] sm:$0xff] }
 0x107   : > { %2640 = vmatpush1.bf16.msra.mxu1 %v3462_v27  ;;  %2600 = vmatprep.subr.bf16.mxu0 %v3709_v28  ;;  %v436_v9 = vld [vmem:[%s3983_s12 + $0x438] sm:$0xff] }
 0x108   : > { %2641 = vmatprep.subr.bf16.mxu1 %v3455_v29  ;;  %v3534_v29 = vcombine.low %v416_v12, %v420_v13  ;;  %v368_v10 = vld [vmem:[%s3983_s12 + $0x218] sm:$0xff] }
 0x109   : > { %v372_v12 = vld [vmem:[%s3983_s12 + $0x238] sm:$0xff] }
 0x10a   : > { %2601 = vmatpush1.bf16.msra.mxu0 %v3708_v34  ;;  %v468_v34 = vld [vmem:[%s3983_s12 + $0x538] sm:$0xff]  ;;  %v3486_v23 = vcombine.low %v368_v10, %v372_v12 }
 0x10b   : > { %2642 = vmatpush1.bf16.msra.mxu1 %v3454_v11  ;;  %2602 = vmatprep.subr.bf16.mxu0 %v3701_v35  ;;  %v3582_v50 = vcombine.low %v464_v1, %v468_v34  ;;  %v556_v19 = vld [vmem:[%s3983_s12 + $0x7f8] sm:$0xff] }
 0x10c   : > { %2643 = vmatprep.subr.bf16.mxu1 %v3447_v36  ;;  %v400_v36 = vld [vmem:[%s3983_s12 + $0x318] sm:$0xff] }
 0x10d   : > { %v616_v20 = vld [vmem:[%s3983_s12 + $0x9d8] sm:$0xff] }
 0x10e   : > { %2603 = vmatpush1.bf16.msra.mxu0 %v3700_v41  ;;  %v3583_v41 = vcombine.high %v464_v1, %v468_v34 }
 0x10f   : > { %2644 = vmatpush1.bf16.msra.mxu1 %v3446_v42  ;;  %2604 = vmatprep.subr.bf16.mxu0 %v3693_v43 }
 0x110   : > { %2645 = vmatprep.subr.bf16.mxu1 %v3439_v44  ;;  %v456_v44 = vld [vmem:[%s3983_s12 + $0x4d8] sm:$0xff] }
 0x111   : > { %v3574_v59 = vcombine.low %v456_v44, %v460_v45 }
 0x112   : > { %2605 = vmatpush1.bf16.msra.mxu0 %v3692_v51 }
 0x113   : > { %2646 = vmatpush1.bf16.msra.mxu1 %v3438_v52  ;;  %2606 = vmatprep.subr.bf16.mxu0 %v3685_v53  ;;  %v3575_v52 = vcombine.high %v456_v44, %v460_v45  ;;  %v3511_v53 = vcombine.high %v392_v48, %v396_v49 }
 0x114   : > { %2647 = vmatprep.subr.bf16.mxu1 %v3431_v54  ;;  %v448_v54 = vld [vmem:[%s3983_s12 + $0x498] sm:$0xff] }
 0x115   : > { %v3566_v4 = vcombine.low %v448_v54, %v452_v56 }
 0x116   : > { %2607 = vmatpush1.bf16.msra.mxu0 %v3684_v60  ;;  %v3510_v60 = vcombine.low %v392_v48, %v396_v49  ;;  %v528_v49 = vld [vmem:[%s3983_s12 + $0x718] sm:$0xff] }
 0x117   : > { %2648 = vmatpush1.bf16.msra.mxu1 %v3430_v61  ;;  %2608 = vmatprep.subr.bf16.mxu0 %v3677_v62  ;;  %v3567_v61 = vcombine.high %v448_v54, %v452_v56  ;;  %v3503_v62 = vcombine.high %v384_v57, %v388_v58 }
 0x118   : > { %2649 = vmatprep.subr.bf16.mxu1 %v3423_v63  ;;  %v440_v63 = vld [vmem:[%s3983_s12 + $0x458] sm:$0xff] }
 0x119   : > { %v3558_v13 = vcombine.low %v440_v63, %v444_v0 }
 0x11a   : > { %2609 = vmatpush1.bf16.msra.mxu0 %v3676_v5  ;;  %v3502_v5 = vcombine.low %v384_v57, %v388_v58  ;;  %v520_v57 = vld [vmem:[%s3983_s12 + $0x6d8] sm:$0xff] }
 0x11b   : > { %2650 = vmatpush1.bf16.msra.mxu1 %v3422_v6  ;;  %2676 = vmatprep.subr.bf16.mxu0 %v3607_v7  ;;  %v3559_v6 = vcombine.high %v440_v63, %v444_v0  ;;  %v3495_v7 = vcombine.high %v376_v2, %v380_v3  ;;  %v524_v58 = vld [vmem:[%s3983_s12 + $0x6f8] sm:$0xff] }
 0x11c   : > { %2651 = vmatprep.subr.bf16.mxu1 %v3543_v8  ;;  %v432_v8 = vld [vmem:[%s3983_s12 + $0x418] sm:$0xff]  ;;  %v3639_v63 = vcombine.high %v520_v57, %v524_v58 }
 0x11d   : > { %v2300_v21 = vpop.f32.mrf.mxu0  ;;  %2627 = vmatmul.mubr.bf16.vlgmr.msra.gmra.mxu0 %v4054_v31  ;;  %v3550_v22 = vcombine.low %v432_v8, %v436_v9 }
 0x11e   : > { %v2341_v25 = vpop.f32.mrf.mxu1  ;;  %2677 = vmatpush1.bf16.msra.mxu0 %v3606_v14  ;;  %2708 = vmatprep.mubr.bf16.mxu0 %v4043_v15  ;;  %v404_v15 = vld [vmem:[%s3983_s12 + $0x338] sm:$0xff]  ;;  %v3494_v14 = vcombine.low %v376_v2, %v380_v3 }
 0x11f   : > { %v4308_v27 = vadd.f32 %v2341_v25, %v2300_v21  ;;  %2652 = vmatpush2.bf16.msra.mxu1 %v3542_v16  ;;  %v2302_v28 = vpop.f32.mrf.mxu0  ;;  %2678 = vmatprep.subr.bf16.mxu0 %v3599_v17  ;;  %v3519_v43 = vcombine.high %v400_v36, %v404_v15  ;;  %v3518_v51 = vcombine.low %v400_v36, %v404_v15  ;;  %v620_v21 = vld [vmem:[%s3983_s12 + $0x9f8] sm:$0xff] }
 0x120   : > { %v2343_v32 = vpop.f32.mrf.mxu1  ;;  %2653 = vmatprep.subr.bf16.mxu1 %v3535_v18  ;;  %v3551_v16 = vcombine.high %v432_v8, %v436_v9  ;;  %v3487_v17 = vcombine.high %v368_v10, %v372_v12  ;;  %v552_v18 = vld [vmem:[%s3983_s12 + $0x7d8] sm:$0xff]  ;;  %v3734_v1 = vcombine.low %v616_v20, %v620_v21 }
 0x121   : > { %v4312_v11 = vadd.f32 %v2343_v32, %v2302_v28  ;;  %v2304_v35 = vpop.f32.mrf.mxu0  ;;  %v3671_v25 = vcombine.high %v552_v18, %v556_v19  ;;  %v544_v28 = vld [vmem:[%s3983_s12 + $0x798] sm:$0xff] }
 0x122   : > { %v2345_v37 = vpop.f32.mrf.mxu1  ;;  %2679 = vmatpush1.bf16.msra.mxu0 %v3598_v26  ;;  %v3735_v26 = vcombine.high %v616_v20, %v620_v21  ;;  %v612_v32 = vld [vmem:[%s3983_s12 + $0x9b8] sm:$0xff] }
 0x123   : > { %2654 = vmatpush2.bf16.msra.mxu1 %v3534_v29  ;;  %v2305_v39 = vpop.f32.mrf.mxu0  ;;  %2680 = vmatprep.subr.bf16.mxu0 %v3591_v30  ;;  %v548_v29 = vld [vmem:[%s3983_s12 + $0x7b8] sm:$0xff] }
 0x124   : > { %v2346_v42 = vpop.f32.mrf.mxu1  ;;  %2655 = vmatprep.subr.bf16.mxu1 %v3527_v55  ;;  %v608_v30 = vld [vmem:[%s3983_s12 + $0x998] sm:$0xff]  ;;  %v3670_v55 = vcombine.low %v552_v18, %v556_v19  ;;  %v3663_v34 = vcombine.high %v544_v28, %v548_v29 }
 0x125   : > { %v3727_v35 = vcombine.high %v608_v30, %v612_v32  ;;  %v536_v36 = vld [vmem:[%s3983_s12 + $0x758] sm:$0xff] }
 0x126   : > { %2681 = vmatpush1.bf16.msra.mxu0 %v3590_v38  ;;  %v540_v15 = vld [vmem:[%s3983_s12 + $0x778] sm:$0xff] }
 0x127   : > { %2656 = vmatpush2.bf16.msra.mxu1 %v3526_v40  ;;  %2682 = vmatprep.subr.bf16.mxu0 %v3583_v41  ;;  %v600_v38 = vld [vmem:[%s3983_s12 + $0x958] sm:$0xff]  ;;  %v3662_v41 = vcombine.low %v544_v28, %v548_v29  ;;  %v3655_v44 = vcombine.high %v536_v36, %v540_v15 }
 0x128   : > { %2657 = vmatprep.subr.bf16.mxu1 %v3519_v43  ;;  %v604_v39 = vld [vmem:[%s3983_s12 + $0x978] sm:$0xff]  ;;  %v3726_v43 = vcombine.low %v608_v30, %v612_v32 }
 0x129   : > { %v3719_v48 = vcombine.high %v600_v38, %v604_v39  ;;  %v3718_v54 = vcombine.low %v600_v38, %v604_v39  ;;  %v512_v2 = vld [vmem:[%s3983_s12 + $0x698] sm:$0xff] }
 0x12a   : > { %2683 = vmatpush1.bf16.msra.mxu0 %v3582_v50  ;;  %v592_v50 = vld [vmem:[%s3983_s12 + $0x918] sm:$0xff] }
 0x12b   : > { %2658 = vmatpush2.bf16.msra.mxu1 %v3518_v51  ;;  %2684 = vmatprep.subr.bf16.mxu0 %v3575_v52  ;;  %v596_v51 = vld [vmem:[%s3983_s12 + $0x938] sm:$0xff] }
 0x12c   : > { %2659 = vmatprep.subr.bf16.mxu1 %v3511_v53  ;;  %v3654_v53 = vcombine.low %v536_v36, %v540_v15  ;;  %v516_v3 = vld [vmem:[%s3983_s12 + $0x6b8] sm:$0xff]  ;;  %v3916_v36 = vmov 1983009808  }
 0x12d   : > { %v3631_v8 = vcombine.high %v512_v2, %v516_v3  ;;  %v504_v10 = vld [vmem:[%s3983_s12 + $0x658] sm:$0xff]  ;;  %v2769_v15 = vunpack.c.l.s4 %v3916_v36 }
 0x12e   : > { %2685 = vmatpush1.bf16.msra.mxu0 %v3574_v59  ;;  %v584_v59 = vld [vmem:[%s3983_s12 + $0x8d8] sm:$0xff] }
 0x12f   : > { %2660 = vmatpush2.bf16.msra.mxu1 %v3510_v60  ;;  %2686 = vmatprep.subr.bf16.mxu0 %v3567_v61  ;;  %v588_v60 = vld [vmem:[%s3983_s12 + $0x8f8] sm:$0xff]  ;;  %v2770_v38 = vunpack.c.0.s8 %v2769_v15 }
 0x130   : > { %2661 = vmatprep.subr.bf16.mxu1 %v3503_v62  ;;  %v3710_v62 = vcombine.low %v592_v50, %v596_v51  ;;  %v3703_v0 = vcombine.high %v584_v59, %v588_v60  ;;  %v508_v12 = vld [vmem:[%s3983_s12 + $0x678] sm:$0xff] }
 0x131   : > { %v3623_v18 = vcombine.high %v504_v10, %v508_v12  ;;  %v496_v20 = vld [vmem:[%s3983_s12 + $0x618] sm:$0xff] }
 0x132   : > { %2687 = vmatpush1.bf16.msra.mxu0 %v3566_v4  ;;  %v576_v4 = vld [vmem:[%s3983_s12 + $0x898] sm:$0xff] }
 0x133   : > { %2662 = vmatpush2.bf16.msra.mxu1 %v3502_v5  ;;  %2688 = vmatprep.subr.bf16.mxu0 %v3559_v6  ;;  %v580_v5 = vld [vmem:[%s3983_s12 + $0x8b8] sm:$0xff]  ;;  %v3638_v6 = vcombine.low %v520_v57, %v524_v58 }
 0x134   : > { %2663 = vmatprep.subr.bf16.mxu1 %v3495_v7  ;;  %v3702_v7 = vcombine.low %v584_v59, %v588_v60  ;;  %v3695_v9 = vcombine.high %v576_v4, %v580_v5  ;;  %v500_v21 = vld [vmem:[%s3983_s12 + $0x638] sm:$0xff] }
 0x135   : > { %v3615_v28 = vcombine.high %v496_v20, %v500_v21  ;;  %v3614_v30 = vcombine.low %v496_v20, %v500_v21 }
 0x136   : > { %2689 = vmatpush1.bf16.msra.mxu0 %v3558_v13  ;;  %v568_v13 = vld [vmem:[%s3983_s12 + $0x858] sm:$0xff] }
 0x137   : > { %2664 = vmatpush2.bf16.msra.mxu1 %v3494_v14  ;;  %2690 = vmatprep.subr.bf16.mxu0 %v3551_v16  ;;  %v572_v14 = vld [vmem:[%s3983_s12 + $0x878] sm:$0xff]  ;;  %v3630_v16 = vcombine.low %v512_v2, %v516_v3 }
 0x138   : > { %2665 = vmatprep.subr.bf16.mxu1 %v3487_v17  ;;  %v3694_v17 = vcombine.low %v576_v4, %v580_v5  ;;  %v3687_v19 = vcombine.high %v568_v13, %v572_v14 }
 0x13a   : > { %2691 = vmatpush1.bf16.msra.mxu0 %v3550_v22  ;;  %v560_v22 = vld [vmem:[%s3983_s12 + $0x818] sm:$0xff] }
 0x13b   : > { %2666 = vmatpush2.bf16.msra.mxu1 %v3486_v23  ;;  %2692 = vmatprep.subr.bf16.mxu0 %v3671_v25  ;;  %v564_v23 = vld [vmem:[%s3983_s12 + $0x838] sm:$0xff]  ;;  %v3622_v25 = vcombine.low %v504_v10, %v508_v12 }
 0x13c   : > { %2717 = vmatprep.subr.bf16.mxu1 %v3735_v26  ;;  %v3686_v26 = vcombine.low %v568_v13, %v572_v14  ;;  %v3679_v29 = vcombine.high %v560_v22, %v564_v23  ;;  %v3678_v32 = vcombine.low %v560_v22, %v564_v23 }
 0x13d   : > { %v2382_v37 = vpop.f32.mrf.mxu0 }
 0x13e   : > { %v4345_v40 = vadd.f32 %v2382_v37, %v4308_v27  ;;  %2668 = vmatmul.mubr.bf16.vlgmr.msra.gmra.mxu1 %v4084_v24  ;;  %2693 = vmatpush2.bf16.msra.mxu0 %v3670_v55  ;;  %v532_v27 = vld [vmem:[%s3983_s12 + $0x738] sm:$0xff] }
 0x13f   : > { %2718 = vmatpush1.bf16.msra.mxu1 %v3734_v1  ;;  %v2384_v42 = vpop.f32.mrf.mxu0  ;;  %2694 = vmatprep.subr.bf16.mxu0 %v3663_v34  ;;  %v3647_v56 = vcombine.high %v528_v49, %v532_v27  ;;  %v3646_v61 = vcombine.low %v528_v49, %v532_v27  ;;  %v4377_v49 = vsub.s32 %v2770_v38, %v4008_v46 }
 0x140   : > { %v4349_v45 = vadd.f32 %v2384_v42, %v4312_v11  ;;  %2719 = vmatprep.subr.bf16.mxu1 %v3727_v35  ;;  %2749 = vmatprep.mubr.bf16.mxu1 %v3915_v47  ;;  %v3711_v47 = vcombine.high %v592_v50, %v596_v51 }
 0x141   : > { %v2386_v24 = vpop.f32.mrf.mxu0 }
 0x142   : > { %v2766_v52 = vcombine.low %v4345_v40, %v4349_v45  ;;  %2695 = vmatpush2.bf16.msra.mxu0 %v3662_v41 }
 0x143   : > { %2720 = vmatpush1.bf16.msra.mxu1 %v3726_v43  ;;  %v2387_v11 = vpop.f32.mrf.mxu0  ;;  %2696 = vmatprep.subr.bf16.mxu0 %v3655_v44 }
 0x144   : > { %2721 = vmatprep.subr.bf16.mxu1 %v3719_v48 }
 0x146   : > { %2697 = vmatpush2.bf16.msra.mxu0 %v3654_v53  ;;  %v2774_v53 = vrot.slane %v2766_v52, %v4377_v49 }
 0x147   : > { %2722 = vmatpush1.bf16.msra.mxu1 %v3718_v54  ;;  %2698 = vmatprep.subr.bf16.mxu0 %v3647_v56  ;;  %v298_v54 = vld [vmem:[#allocation2] sm:$0xff] }
 0x148   : > { %2723 = vmatprep.subr.bf16.mxu1 %v3711_v47 }
 0x14a   : > { %2699 = vmatpush2.bf16.msra.mxu0 %v3646_v61 }
 0x14b   : > { %2724 = vmatpush1.bf16.msra.mxu1 %v3710_v62  ;;  %2700 = vmatprep.subr.bf16.mxu0 %v3639_v63 }
 0x14c   : > { %2725 = vmatprep.subr.bf16.mxu1 %v3703_v0 }
 0x14e   : > { %2701 = vmatpush2.bf16.msra.mxu0 %v3638_v6 }
 0x14f   : > { %2726 = vmatpush1.bf16.msra.mxu1 %v3702_v7  ;;  %2702 = vmatprep.subr.bf16.mxu0 %v3631_v8 }
 0x150   : > { %2727 = vmatprep.subr.bf16.mxu1 %v3695_v9 }
 0x152   : > { %2703 = vmatpush2.bf16.msra.mxu0 %v3630_v16 }
 0x153   : > { %2728 = vmatpush1.bf16.msra.mxu1 %v3694_v17  ;;  %2704 = vmatprep.subr.bf16.mxu0 %v3623_v18 }
 0x154   : > { %2729 = vmatprep.subr.bf16.mxu1 %v3687_v19 }
 0x156   : > { %2705 = vmatpush2.bf16.msra.mxu0 %v3622_v25 }
 0x157   : > { %2730 = vmatpush1.bf16.msra.mxu1 %v3686_v26  ;;  %2706 = vmatprep.subr.bf16.mxu0 %v3615_v28 }
 0x158   : > { %2731 = vmatprep.subr.bf16.mxu1 %v3679_v29 }
 0x15a   : > { %2707 = vmatpush2.bf16.msra.mxu0 %v3614_v30 }
 0x15b   : > { %2732 = vmatpush1.bf16.msra.mxu1 %v3678_v32  ;;  %v299_v32 = vld [vmem:[#allocation2 + $0x8] sm:$0xff] }
 0x15d   : > { %2709 = vmatmul.mubr.bf16.vlgmr.msra.gmra.mxu0 %v4092_v33 }
 0x15e   : > { %v2423_v55 = vpop.f32.mrf.mxu1  ;;  %2750 = vmatmul.mubr.bf16.vlgmr.msra.gmra.mxu1 %v4054_v31 }
 0x160   : > { %v2425_v1 = vpop.f32.mrf.mxu1 }
 0x162   : > { %v2427_v34 = vpop.f32.mrf.mxu1 }
 0x164   : > { %v2428_v35 = vpop.f32.mrf.mxu1 }
 0x17d   : > { %v2464_v37 = vpop.f32.mrf.mxu0 }
 0x17e   : > { %v2465_v39 = vadd.f32 %v2464_v37, %v2423_v55  ;;  %v2505_v41 = vpop.f32.mrf.mxu1 }
 0x17f   : > { %v2466_v42 = vpop.f32.mrf.mxu0 }
 0x180   : > { %v2467_v43 = vadd.f32 %v2466_v42, %v2425_v1  ;;  %v2507_v44 = vpop.f32.mrf.mxu1  ;;  %v2506_v33 = vadd.f32 %v2505_v41, %v2465_v39 }
 0x181   : > { %v2468_v48 = vpop.f32.mrf.mxu0 }
 0x182   : > { %v2508_v27 = vadd.f32 %v2507_v44, %v2467_v43  ;;  %v2509_v24 = vpop.f32.mrf.mxu1 }
 0x183   : > { %v2469_v31 = vpop.f32.mrf.mxu0 }
 0x184   : > { %v2767_v50 = vcombine.low %v2506_v33, %v2508_v27  ;;  %v2510_v51 = vpop.f32.mrf.mxu1 }
 0x186   : > { %v2781_v11 = vrot.slane %v2767_v50, %v4377_v49 }
 0x188   : > { %v2782_v56 = vcombine.low %v2774_v53, %v2781_v11 }
 0x18a   : > { %v2802_v47 = vadd.f32 %v2782_v56, %v298_v54 }
 0x18c   : > { %2804 = vst [vmem:[#allocation2] sm:$0xff] %v2802_v47 }
 0x1bd   : > { %v2546_v57 = vpop.f32.mrf.mxu0 }
 0x1be   : > { %v2587_v58 = vpop.f32.mrf.mxu1 }
 0x1bf   : > { %v2588_v59 = vadd.f32 %v2587_v58, %v2546_v57  ;;  %v2548_v60 = vpop.f32.mrf.mxu0 }
 0x1c0   : > { %v2589_v61 = vpop.f32.mrf.mxu1 }
 0x1c1   : > { %v2590_v62 = vadd.f32 %v2589_v61, %v2548_v60  ;;  %v2550_v63 = vpop.f32.mrf.mxu0 }
 0x1c2   : > { %v2591_v0 = vpop.f32.mrf.mxu1 }
 0x1c3   : > { %v2551_v2 = vpop.f32.mrf.mxu0 }
 0x1c4   : > { %v2592_v3 = vpop.f32.mrf.mxu1 }
 0x1dd   : > { %v2628_v4 = vpop.f32.mrf.mxu0 }
 0x1de   : > { %v2629_v5 = vadd.f32 %v2628_v4, %v2588_v59 }
 0x1df   : > { %v2630_v40 = vpop.f32.mrf.mxu0 }
 0x1e0   : > { %v2631_v45 = vadd.f32 %v2630_v40, %v2590_v62 }
 0x1e1   : > { %v2632_v52 = vpop.f32.mrf.mxu0 }
 0x1e2   : > { %v2783_v6 = vcombine.low %v2629_v5, %v2631_v45 }
 0x1e3   : > { %v2633_v7 = vpop.f32.mrf.mxu0 }
 0x1e4   : > { %v2791_v29 = vrot.slane %v2783_v6, %v4377_v49 }
 0x1fe   : > { %v2669_v8 = vpop.f32.mrf.mxu1 }
 0x200   : > { %v2671_v9 = vpop.f32.mrf.mxu1 }
 0x202   : > { %v2673_v10 = vpop.f32.mrf.mxu1 }
 0x204   : > { %v2674_v12 = vpop.f32.mrf.mxu1 }
 0x21d   : > { %v2710_v13 = vpop.f32.mrf.mxu0 }
 0x21e   : > { %v2711_v14 = vadd.f32 %v2710_v13, %v2669_v8  ;;  %v2751_v16 = vpop.f32.mrf.mxu1 }
 0x21f   : > { %v2712_v17 = vpop.f32.mrf.mxu0 }
 0x220   : > { %v2713_v18 = vadd.f32 %v2712_v17, %v2671_v9  ;;  %v2753_v19 = vpop.f32.mrf.mxu1  ;;  %v2752_v21 = vadd.f32 %v2751_v16, %v2711_v14 }
 0x221   : > { %v2714_v20 = vpop.f32.mrf.mxu0 }
 0x222   : > { %v2754_v22 = vadd.f32 %v2753_v19, %v2713_v18  ;;  %v2755_v23 = vpop.f32.mrf.mxu1 }
 0x223   : > { %v2715_v25 = vpop.f32.mrf.mxu0 }
 0x224   : > { %v2784_v26 = vcombine.low %v2752_v21, %v2754_v22  ;;  %v2756_v28 = vpop.f32.mrf.mxu1 }
 0x226   : > { %v2798_v30 = vrot.slane %v2784_v26, %v4377_v49 }
 0x228   : > { %v2799_v55 = vcombine.low %v2791_v29, %v2798_v30  ;;  %2809 = sbr.rel (%p3736_p6) target bundleno = 999 (0x3e7), region = 56 }
 0x22a   : > { %v2803_v1 = vadd.f32 %v2799_v55, %v299_v32 }
 0x22c   : > { %2805 = vst [vmem:[#allocation2 + $0x8] sm:$0xff] %v2803_v1 }
 0x22d   : > { %v3845_v34 = vld [vmem:[%s4535_s5 + $0x78] sm:$0xff]   ;;  %v3849_v37 = vld [vmem:[%s4535_s5 + $0x70] sm:$0xff]   ;;  %v3853_v42 = vld [vmem:[%s4535_s5 + $0x68] sm:$0xff]   ;;  %v2816_v56 = vsub.s32 0, %v4008_v46  ;;  %v2820_v57 = vsub.s32 1, %v4008_v46  ;;  %v2824_v59 = vsub.s32 2, %v4008_v46 }
 0x22e   : > { %v3846_v35 = vld [vmem:[%s4535_s5 + $0xf8] sm:$0xff]   ;;  %3776 = vmatprep.subr.bf16.mxu0 %v3845_v34  ;;  %v3850_v38 = vld [vmem:[%s4535_s5 + $0xf0] sm:$0xff]   ;;  %v3854_v43 = vld [vmem:[%s4535_s5 + $0xe8] sm:$0xff]   ;;  %v2828_v61 = vsub.s32 3, %v4008_v46  ;;  %v2832_v63 = vsub.s32 4, %v4008_v46  ;;  %v2836_v2 = vsub.s32 5, %v4008_v46 }
 0x22f   : > { %v3847_v36 = vld [vmem:[%s4535_s5 + $0x38] sm:$0xff]   ;;  %3798 = vmatprep.subr.bf16.mxu1 %v3846_v35  ;;  %v3851_v39 = vld [vmem:[%s4535_s5 + $0x30] sm:$0xff]   ;;  %v3855_v44 = vld [vmem:[%s4535_s5 + $0x28] sm:$0xff]   ;;  %v2840_v5 = vsub.s32 6, %v4008_v46  ;;  %v2844_v40 = vsub.s32 7, %v4008_v46  ;;  %vm2945_vm0 = vcmask 1041408  }
 0x230   : > { %v3848_v15 = vld [vmem:[%s4535_s5 + $0xb8] sm:$0xff]   ;;  %3777 = vmatpush3.bf16.msra.mxu0 %v3847_v36  ;;  %v3852_v41 = vld [vmem:[%s4535_s5 + $0xb0] sm:$0xff]   ;;  %v3856_v48 = vld [vmem:[%s4535_s5 + $0xa8] sm:$0xff]  }
 0x231   : > { %3799 = vmatpush3.bf16.msra.mxu1 %v3848_v15  ;;  %3778 = vmatprep.subr.bf16.mxu0 %v3849_v37  ;;  %v3857_v33 = vld [vmem:[%s4535_s5 + $0x60] sm:$0xff]   ;;  %v3861_v50 = vld [vmem:[%s4535_s5 + $0x58] sm:$0xff]   ;;  %v3865_v54 = vld [vmem:[%s4535_s5 + $0x50] sm:$0xff]  }
 0x232   : > { %3800 = vmatprep.subr.bf16.mxu1 %v3850_v38  ;;  %v3858_v27 = vld [vmem:[%s4535_s5 + $0xe0] sm:$0xff]   ;;  %v3862_v51 = vld [vmem:[%s4535_s5 + $0xd8] sm:$0xff]   ;;  %v3866_v47 = vld [vmem:[%s4535_s5 + $0xd0] sm:$0xff]  }
 0x233   : > { %v3859_v24 = vld [vmem:[%s4535_s5 + $0x20] sm:$0xff]   ;;  %v3863_v53 = vld [vmem:[%s4535_s5 + $0x18] sm:$0xff]   ;;  %v3867_v58 = vld [vmem:[%s4535_s5 + $0x10] sm:$0xff]  }
 0x234   : > { %3779 = vmatpush3.bf16.msra.mxu0 %v3851_v39  ;;  %v3860_v31 = vld [vmem:[%s4535_s5 + $0xa0] sm:$0xff]   ;;  %v3864_v11 = vld [vmem:[%s4535_s5 + $0x98] sm:$0xff]   ;;  %v3868_v60 = vld [vmem:[%s4535_s5 + $0x90] sm:$0xff]  }
 0x235   : > { %3801 = vmatpush3.bf16.msra.mxu1 %v3852_v41  ;;  %3780 = vmatprep.subr.bf16.mxu0 %v3853_v42  ;;  %v3869_v62 = vld [vmem:[%s4535_s5 + $0x48] sm:$0xff]   ;;  %v2812_v3 = vld [vmem:[%s4532_s2] sm:$0xff] }
 0x236   : > { %3802 = vmatprep.subr.bf16.mxu1 %v3854_v43  ;;  %v3870_v0 = vld [vmem:[%s4535_s5 + $0xc8] sm:$0xff]   ;;  %v2886_v4 = vld [vmem:[%s4533_s3] sm:$0xf]  ;;  %v2817_v45 = vrot.slane %v2812_v3, %v2816_v56  ;;  %v2821_v52 = vrot.slane %v2812_v3, %v2820_v57  ;;  %v2825_v6 = vrot.slane %v2812_v3, %v2824_v59  ;;  %v2829_v7 = vrot.slane %v2812_v3, %v2828_v61 }
 0x237   : > { %v3871_v8 = vld [vmem:[%s4535_s5 + $0x8] sm:$0xff]   ;;  %v2891_v9 = vrot.slane %v2886_v4, %v2816_v56  ;;  %v2895_v10 = vrot.slane %v2886_v4, %v2820_v57  ;;  %v2899_v12 = vrot.slane %v2886_v4, %v2824_v59  ;;  %v2903_v13 = vrot.slane %v2886_v4, %v2828_v61  ;;  %v3873_v46 = vld [vmem:[%s4535_s5 + $0x40] sm:$0xff]  }
 0x238   : > { %3781 = vmatpush3.bf16.msra.mxu0 %v3855_v44  ;;  %v3872_v14 = vld [vmem:[%s4535_s5 + $0x88] sm:$0xff]   ;;  %v2846_v16 = vcombine.low %v2817_v45, %v2821_v52  ;;  %v2847_v17 = vcombine.low %v2825_v6, %v2829_v7  ;;  %v2833_v18 = vrot.slane %v2812_v3, %v2832_v63  ;;  %v2837_v19 = vrot.slane %v2812_v3, %v2836_v2  ;;  %v2810_v20 = vld [vmem:[#allocation2] sm:$0xff] }
 0x239   : > { %3803 = vmatpush3.bf16.msra.mxu1 %v3856_v48  ;;  %3782 = vmatprep.subr.bf16.mxu0 %v3857_v33  ;;  %v2904_v21 = vcombine.low %v2891_v9, %v2895_v10  ;;  %v2905_v22 = vcombine.low %v2899_v12, %v2903_v13  ;;  %v3874_v23 = vld [vmem:[%s4535_s5 + $0xc0] sm:$0xff]   ;;  %v2841_v25 = vrot.slane %v2812_v3, %v2840_v5  ;;  %v2811_v41 = vld [vmem:[#allocation2 + $0x8] sm:$0xff]  ;;  %v3737_v5 = vld [vmem:[#allocation3] ss:$0 sm:$0xff] }
 0x23a   : > { %3804 = vmatprep.subr.bf16.mxu1 %v3858_v27  ;;  %v2845_v26 = vrot.slane %v2812_v3, %v2844_v40  ;;  %v2854_v28 = vrot.slane %v2846_v16, %v4377_v49  ;;  %v2861_v29 = vrot.slane %v2847_v17, %v4377_v49  ;;  %v3875_v30 = vld [vmem:[%s4535_s5] sm:$0xff]   ;;  %v2863_v32 = vcombine.low %v2833_v18, %v2837_v19 }
 0x23b   : > { %v2912_v55 = vrot.slane %v2904_v21, %v4377_v49  ;;  %v2919_v1 = vrot.slane %v2905_v22, %v4377_v49  ;;  %v3876_v34 = vld [vmem:[%s4535_s5 + $0x80] sm:$0xff]  }
 0x23c   : > { %3783 = vmatpush3.bf16.msra.mxu0 %v3859_v24  ;;  %v2864_v35 = vcombine.low %v2841_v25, %v2845_v26  ;;  %v2862_v36 = vcombine.low %v2854_v28, %v2861_v29  ;;  %v2871_v15 = vrot.slane %v2863_v32, %v4377_v49  ;;  %v3738_v7 = vld [vmem:[%s4536_s6] ss:$0 sm:$0xff] }
 0x23d   : > { %3805 = vmatpush3.bf16.msra.mxu1 %v3860_v31  ;;  %3784 = vmatprep.subr.bf16.mxu0 %v3861_v50  ;;  %v2920_v39 = vcombine.low %v2912_v55, %v2919_v1 }
 0x23e   : > { %3806 = vmatprep.subr.bf16.mxu1 %v3862_v51  ;;  %v2878_v37 = vrot.slane %v2864_v35, %v4377_v49  ;;  %v2882_v38 = vadd.f32 %v2862_v36, %v2810_v20 }
 0x240   : > { %3785 = vmatpush3.bf16.msra.mxu0 %v3863_v53  ;;  %v2879_v42 = vcombine.low %v2871_v15, %v2878_v37  ;;  %v2884_v43 = vmax.f32 %v2882_v38, 0.0 }
 0x241   : > { %3807 = vmatpush3.bf16.msra.mxu1 %v3864_v11  ;;  %3786 = vmatprep.subr.bf16.mxu0 %v3865_v54 }
 0x242   : > { %3808 = vmatprep.subr.bf16.mxu1 %v3866_v47  ;;  %v2883_v44 = vadd.f32 %v2879_v42, %v2811_v41  ;;  %v2922_v48 = vmul.f32 %v2920_v39, %v2884_v43 }
 0x244   : > { %3787 = vmatpush3.bf16.msra.mxu0 %v3867_v58  ;;  %v2885_v33 = vmax.f32 %v2883_v44, 0.0  ;;  %v2924_v27 = vcombine.high %v2922_v48, %v2922_v48  ;;  %v2931_v24 = vrot.slane %v2922_v48, %v4377_v49 }
 0x245   : > { %3809 = vmatpush3.bf16.msra.mxu1 %v3868_v60  ;;  %3788 = vmatprep.subr.bf16.mxu0 %v3869_v62 }
 0x246   : > { %3810 = vmatprep.subr.bf16.mxu1 %v3870_v0  ;;  %v2971_v31 = vrot.slane %v2885_v33, %v4377_v49  ;;  %v2964_v50 = vcombine.high %v2885_v33, %v2885_v33  ;;  %v2938_v51 = vrot.slane %v2924_v27, %v4377_v49  ;;  %v2939_v53 = vcombine.high %v2931_v24, %v2931_v24 }
 0x247   : > { %v2946_v11 = vsel %vm2945_vm0, %v2931_v24, 0.0 }
 0x248   : > { %3789 = vmatpush3.bf16.msra.mxu0 %v3871_v8  ;;  %v2979_v54 = vcombine.high %v2971_v31, %v2971_v31  ;;  %v2978_v56 = vrot.slane %v2964_v50, %v4377_v49  ;;  %v2940_v47 = vcombine.high %v2938_v51, %v2938_v51  ;;  %v2947_v57 = vsel %vm2945_vm0, %v2939_v53, 0.0 }
 0x249   : > { %3811 = vmatpush3.bf16.msra.mxu1 %v3872_v14  ;;  %3790 = vmatprep.subr.bf16.mxu0 %v3873_v46  ;;  %v2949_v58 = vsel %vm2945_vm0, %v2938_v51, 0.0  ;;  %v2985_v59 = vpack.c.bf16 %v2971_v31, %v2971_v31  ;;  %v2948_v60 = vadd.f32 %v2947_v57, %v2946_v11  ;;  %v3917_v49 = vmov 0  }
 0x24a   : > { %3812 = vmatprep.subr.bf16.mxu1 %v3874_v23  ;;  %v2986_v61 = vpack.c.bf16 %v2979_v54, %v2979_v54  ;;  %v2980_v62 = vcombine.high %v2978_v56, %v2978_v56  ;;  %v2951_v63 = vsel %vm2945_vm0, %v2940_v47, 0.0  ;;  %v2987_v0 = vpack.c.bf16 %v2978_v56, %v2978_v56  ;;  %3843 = vset.pattern.permute.xlu1 %v3917_v49 }
 0x24b   : > { %v2950_v2 = vadd.f32 %v2949_v58, %v2948_v60  ;;  %3844 = vset.pattern.permute.xlu0 %v3917_v49 }
 0x24c   : > { %3791 = vmatpush3.bf16.msra.mxu0 %v3875_v30  ;;  %3284 = vmatprep.mubr.bf16.mxu0 %v2986_v61  ;;  %v2988_v3 = vpack.c.bf16 %v2980_v62, %v2980_v62 }
 0x24d   : > { %3813 = vmatpush3.bf16.msra.mxu1 %v3876_v34  ;;  %v2952_v4 = vadd.f32 %v2951_v63, %v2950_v2 }
 0x24e   : > { %3324 = vmatprep.mubr.bf16.mxu1 %v2988_v3 }
 0x24f   : > { %3285 = vmatmul.mubr.bf16.vlgmr.msra.gmra.mxu0 %v2985_v59  ;;  %2953 = vadd.xlane.f32.xlu0 %v2952_v4 }
 0x250   : > { %3325 = vmatmul.mubr.bf16.vlgmr.msra.gmra.mxu1 %v2987_v0 }
 0x2d8   : > { %v2954_v40 = vpop.xlane.xlu0 %2953 }
 0x2d9   : > { %v2962_v45 = vadd.f32 %v3737_v5, %v2954_v40 }
 0x2db   : > { %3347 = vperm.xlu1 %3843, %v2962_v45  }
 0x30f   : > { %v3792_v52 = vpop.f32.mrf.mxu0 }
 0x310   : > { %v3814_v6 = vpop.f32.mrf.mxu1 }
 0x311   : > { %v3793_v8 = vpop.f32.mrf.mxu0 }
 0x312   : > { %v3794_v9 = vadd.f32 %v3793_v8, %v3792_v52  ;;  %v3815_v10 = vpop.f32.mrf.mxu1 }
 0x313   : > { %v3795_v12 = vpop.f32.mrf.mxu0  ;;  %v3816_v14 = vadd.f32 %v3815_v10, %v3814_v6 }
 0x314   : > { %v3287_v13 = vadd.f32 %v3794_v9, %v3738_v7  ;;  %v3817_v16 = vpop.f32.mrf.mxu1 }
 0x315   : > { %v3796_v17 = vpop.f32.mrf.mxu0 }
 0x316   : > { %v3327_v46 = vadd.f32 %v3816_v14, %v3287_v13  ;;  %v3818_v18 = vpop.f32.mrf.mxu1 }
 0x318   : > { %v3332_v19 = vsel %vm2945_vm0, %v3327_v46, 0.0 }
 0x319   : > { %3333 = vadd.xlane.f32.xlu0 %v3332_v19 }
 0x356   : > { %v3348_v29 = vpop.permute.xlu1 %3347 }
 0x357   : > { %v3350_v30 = vadd.f32 %v3348_v29, %v3327_v46 }
 0x3a2   : > { %v3334_v20 = vpop.xlane.xlu0 %3333 }
 0x3a3   : > { %v3335_v21 = vrot.slane %v3334_v20, 4 }
 0x3a5   : > { %v3336_v22 = vadd.f32 %v3335_v21, %v3334_v20 }
 0x3a7   : > { %v3337_v23 = vrot.slane %v3336_v22, 2 }
 0x3a9   : > { %v3338_v25 = vadd.f32 %v3337_v23, %v3336_v22 }
 0x3ab   : > { %v3339_v26 = vrot.slane %v3338_v25, 1 }
 0x3ad   : > { %v3340_v28 = vadd.f32 %v3339_v26, %v3338_v25 }
 0x3af   : > { %3820 = vpush %v3340_v28 }
 0x3e0   : > { %s3821_s19 = spop %3820 }
 0x3e1   : > { %s3344_s20 = smul.f32 0.083333336, %s3821_s19 }
 0x3e3   : > { %v3351_v32 = vstv %s3344_s20 }
 0x3e4   : > { %v3352_v55 = vsub.f32 %v3350_v30, %v3351_v32 }
 0x3e6   : > { %3353 = vst [vmem:[#allocation4] sm:$0x3] %v3352_v55 }
 0x3e7 PF: > { %p3826_p7 = scmp.eq.s32.totalorder %s3968_s27, 4  ;;  %s3918_s21 = smov [#allocation4]  }
 0x3e8   : > { %s3361_s22 = sshll.u32 %s3918_s21, 4  ;;  %s3362_s22 = int_to_ptr.vmem [resolvable:$true] %s3361_s22 }
 0x3e9   : > { %s3877_s23 = scalar_lea.vmem %s3362_s22, 32  ;;  %p3884_p11 = scmp.lt.s32.totalorder %s3362_s22, %s3362_s22 }
 0x3ea   : > { %p3878_p8 = scmp.ne.s32.totalorder %s3362_s22, %s3877_s23  ;;  %p3885_p12 = scmp.lt.s32.totalorder %s3877_s23, %s3877_s23 }
 0x3ec   : > { %p3879_p9 = pnand %p3878_p8, %p3826_p7  ;;  %p3886_p13 = por %p3885_p12, %p3884_p11 }
 0x3ee   : > { %p3880_p10 = pneg %p3879_p9 }
 0x3f0   : > { %p3887_p0 = pnand %p3886_p13, %p3880_p10 }
 0x3f2   : > { %3890 = shalt.err (!%p3887_p0)
}
 0x3f3   : > { %3823 = dma.vmem_to_hbm [thread:$0]  (%p3826_p7), %s3362_s22, 32, %s4537_s7, [#allocation5]  }
 0x3f4   : > { %3906 = dma.done.wait (%p3826_p7), [#allocation5], 32  }
 0x3f5   : > { %3908 = vsyncadd (%p3826_p7), [#allocation5], 4294967264 }
 0x3f6 PF: > { %s20_s26 = sadd.s32 1, %s3911_s26  }
 0x3f7   : > { %p17_p1 = scmp.ge.s32.totalorder %s20_s26, 7  }
 0x3f9   :  { %19 = sbr.rel (!%p17_p1) target bundleno = 4 (0x4), region = 86 }
 0x3fe   :  { %3374 = vsyncpa [#allocation5], 1 }
 0x3ff   :  { %3376 = vsyncpa [#allocation5 + $0x1], 1 }

</bundles_post_ra>
